<compile_context>
chip_gen: v5e
topology: v5e:2x2
jax: 0.10.0
libtpu: 0.0.40
codegen_flags: <defaults>
</compile_context>

<pallas_src>
import math

import jax
import jax.numpy as jnp
from jax.experimental import pallas as pl
from jax.experimental.pallas import tpu as pltpu

SHARED_DIM = 128
SIM_DIM = 64
Z_DIM = 2
BN_EPS = 1e-5
NUM_FTRS = 1000            # resnet34 fc.out_features
NUM_FTRS_PAD = 1024        # lane-aligned contraction dim for the si_w1 matmul

# ---- packed output slab layout (lanes), width 384 = 3 * 128 ----------------
OUT_TEXT_Z = 0             # [0:64]    text_z
OUT_IMAGE_Z = 64           # [64:128]  image_z
OUT_FUSION = 128           # [128:320] text_image_fusion
OUT_CLASS = 320            # [320:322] class_output (rest of [320:384] zero)
OUT_WIDTH = 384

# ---- bias slab row indices (each row is one bias, zero-padded to 256 lanes) -
B_SI1, B_SI2, B_IA1, B_IA2 = 0, 1, 2, 3
B_ST1, B_ST2, B_TA1, B_TA2 = 4, 5, 6, 7
B_FU1, B_FU2, B_CL1, B_CL2 = 8, 9, 10, 11
B_ENC1, B_HEAD = 12, 13
BIAS_ROWS = 16


# ---------------------------------------------------------------------------
# Single fused forward kernel
# ---------------------------------------------------------------------------
def _fused_forward_kernel(bert_ref, img_ref, eps_ref,
                          w256_ref, w128_ref, w64_ref, bias_ref, out_ref):
    f32 = jnp.float32
    H = bert_ref.shape[2]                     # bert hidden dim (static)

    def bias(row, width):
        return bias_ref[row:row + 1, 0:width]             # (1, width) f32

    def mm(x, w_bf16):
        # bf16 weights in VMEM, f32 activations, f32 MXU accumulation.
        return jnp.dot(x, w_bf16.astype(f32), preferred_element_type=f32)

    def dense(x, w, brow, bwidth, act="relu"):
        # BatchNorm (eval) already folded into (w, b); Dropout (eval) = id.
        h = mm(x, w) + bias(brow, bwidth)
        if act == "relu":
            return jnp.maximum(h, 0.0)
        if act == "leaky":
            return jnp.where(h > 0, h, 0.1 * h)            # LeakyReLU(0.1)
        return h

    # ---- image tower: shared_image -> image_aligner -------------------------
    x = dense(img_ref[...], w256_ref[0:1024, :], B_SI1, 256)
    x = dense(x, w128_ref[0:256, :], B_SI2, 128)
    x = dense(x, w128_ref[512:640, :], B_IA1, 128)
    image_z = dense(x, w64_ref[0:128, :], B_IA2, 64)

    # ---- text tower: seq mean (leading axis) -> shared_text -> text_aligner -
    last_hidden = jnp.mean(bert_ref[...], axis=0)          # (B, H), VPU adds
    t = dense(last_hidden, w256_ref[1024:1024 + H, :], B_ST1, 256)
    t = dense(t, w128_ref[256:512, :], B_ST2, 128)
    t = dense(t, w128_ref[640:768, :], B_TA1, 128)
    text_z = dense(t, w64_ref[128:256, :], B_TA2, 64)

    # ---- correlation = fusion(cat([text_z, image_z])) -----------------------
    tz_iz = jnp.concatenate([text_z, image_z], axis=1)     # (B, 128)
    c = dense(tz_iz, w128_ref[768:896, :], B_FU1, 128)
    correlation = dense(c, w64_ref[256:384, :], B_FU2, 64)  # Linear+ReLU (no BN)

    # ---- AmbiguityLearning: fused block-diagonal VIB encoders ---------------
    h_enc = dense(tz_iz, w128_ref[896:1024, :], B_ENC1, 128, act="leaky")
    p8 = mm(h_enc, w64_ref[640:768, :]) + bias(B_HEAD, 64)  # real lanes [0:8]
    mu_cat = p8[:, 0:4]                                     # [mu1 | mu2]
    sig_cat = jax.nn.softplus(p8[:, 4:8]) + 1e-7            # [sig1 | sig2]
    z_cat = mu_cat + sig_cat * eps_ref[...]                 # rsample, eps=[e1|e2]

    mu1, mu2 = mu_cat[:, 0:2], mu_cat[:, 2:4]
    sig1, sig2 = sig_cat[:, 0:2], sig_cat[:, 2:4]
    z1, z2 = z_cat[:, 0:2], z_cat[:, 2:4]

    def log_prob(z, mu, sig):
        # Independent(Normal(mu, sig), 1).log_prob(z): sum over event dim.
        return jnp.sum(-0.5 * ((z - mu) / sig) ** 2 - jnp.log(sig)
                       - 0.5 * jnp.log(2.0 * jnp.pi),
                       axis=-1, keepdims=True)

    kl_1_2 = log_prob(z1, mu1, sig1) - log_prob(z1, mu2, sig2)
    kl_2_1 = log_prob(z2, mu2, sig2) - log_prob(z2, mu1, sig1)
    skl = jnp.clip(jax.nn.sigmoid(0.5 * (kl_1_2 + kl_2_1)), 0.25, 0.75)  # (B,1)

    # ---- weighted fusion + sim_classifier (cl_w1 split: no 192-lane concat) -
    w_uni = 1.0 - skl
    ft = w_uni * text_z
    fi = w_uni * image_z
    fc = skl * correlation
    h = (mm(ft, w64_ref[384:448, :]) + mm(fi, w64_ref[448:512, :])
         + mm(fc, w64_ref[512:576, :]) + bias(B_CL1, 64))
    h = jnp.maximum(h, 0.0)
    class_out = mm(h, w64_ref[576:640, :]) + bias(B_CL2, 64)  # logits at [0:2]

    # single lane-dense (B, 384) store
    out_ref[...] = jnp.concatenate([text_z, image_z, ft, fi, fc, class_out],
                                   axis=1)


# ---------------------------------------------------------------------------
# Host-side wrapper (single grid-less pallas_call)
# ---------------------------------------------------------------------------
def cnn_fusion_forward(packed, bert_output, image_feats, eps1, eps2):
    w256, w128, w64, biases = packed
    batch = image_feats.shape[0]

    pad = NUM_FTRS_PAD - image_feats.shape[1]
    if pad > 0:                                   # zero-pad 1000 -> 1024 (exact)
        image_feats = jnp.pad(image_feats, ((0, 0), (0, pad)))
    bert_sbh = jnp.transpose(bert_output, (1, 0, 2))      # (S, B, H)
    eps = jnp.concatenate([eps1, eps2], axis=1)           # (B, 4)

    slab = pl.pallas_call(
        _fused_forward_kernel,
        out_shape=jax.ShapeDtypeStruct((batch, OUT_WIDTH), jnp.float32),
        in_specs=[pl.BlockSpec(memory_space=pltpu.MemorySpace.VMEM)] * 7,
        out_specs=pl.BlockSpec(memory_space=pltpu.MemorySpace.VMEM),
    )(bert_sbh, image_feats, eps, w256, w128, w64, biases)

    class_output = slab[:, OUT_CLASS:OUT_CLASS + 2]
    text_image_fusion = slab[:, OUT_FUSION:OUT_FUSION + 3 * SIM_DIM]
    image_z = slab[:, OUT_IMAGE_Z:OUT_IMAGE_Z + SIM_DIM]
    text_z = slab[:, OUT_TEXT_Z:OUT_TEXT_Z + SIM_DIM]
    return class_output, text_image_fusion, image_z, text_z


# ---------------------------------------------------------------------------
# Parameter construction (PyTorch-style uniform init, eval-BN folded)
# ---------------------------------------------------------------------------
def _linear(key, fan_in, fan_out):
    k1, k2 = jax.random.split(key)
    bound = 1.0 / math.sqrt(fan_in)
    w = jax.random.uniform(k1, (fan_in, fan_out), jnp.float32, -bound, bound)
    b = jax.random.uniform(k2, (fan_out,), jnp.float32, -bound, bound)
    return w, b


def _fold_bn(w, b, out_dim):
    # TODO(synk): fresh eval-mode BN stats (gamma=1, beta=0, mean=0, var=1);
    # fold real running stats/affine params here when loading a checkpoint.
    gamma = jnp.ones((out_dim,), jnp.float32)
    beta = jnp.zeros((out_dim,), jnp.float32)
    mean = jnp.zeros((out_dim,), jnp.float32)
    var = jnp.ones((out_dim,), jnp.float32)
    scale = gamma * jax.lax.rsqrt(var + BN_EPS)
    return w * scale[None, :], (b - mean) * scale + beta


def init_params(key, bert_hidden_dim, num_ftrs=NUM_FTRS):
    ks = iter(jax.random.split(key, 16))

    def lin_bn(fi, fo):
        w, b = _linear(next(ks), fi, fo)
        return _fold_bn(w, b, fo)

    def lin(fi, fo):
        return _linear(next(ks), fi, fo)

    p = {}
    # shared_image: Linear(num_ftrs,256)+BN+ReLU+Drop, Linear(256,128)+BN+ReLU
    w, b = lin_bn(num_ftrs, 256)
    p["si_w1"] = jnp.pad(w, ((0, NUM_FTRS_PAD - num_ftrs), (0, 0)))  # exact pad
    p["si_b1"] = b
    p["si_w2"], p["si_b2"] = lin_bn(256, SHARED_DIM)
    # image_aligner
    p["ia_w1"], p["ia_b1"] = lin_bn(SHARED_DIM, SHARED_DIM)
    p["ia_w2"], p["ia_b2"] = lin_bn(SHARED_DIM, SIM_DIM)
    # shared_text_linear
    p["st_w1"], p["st_b1"] = lin_bn(bert_hidden_dim, 256)
    p["st_w2"], p["st_b2"] = lin_bn(256, SHARED_DIM)
    # text_aligner
    p["ta_w1"], p["ta_b1"] = lin_bn(SHARED_DIM, SHARED_DIM)
    p["ta_w2"], p["ta_b2"] = lin_bn(SHARED_DIM, SIM_DIM)
    # fusion: Linear(128,128)+BN+ReLU, Linear(128,64)+ReLU
    p["fu_w1"], p["fu_b1"] = lin_bn(2 * SIM_DIM, 2 * SIM_DIM)
    p["fu_w2"], p["fu_b2"] = lin(2 * SIM_DIM, SIM_DIM)
    # sim_classifier: Linear(192,64)+BN+ReLU, Linear(64,2)
    p["cl_w1"], p["cl_b1"] = lin_bn(3 * SIM_DIM, SIM_DIM)
    p["cl_w2"], p["cl_b2"] = lin(SIM_DIM, 2)
    # AmbiguityLearning encoders: Linear(64,64)+LeakyReLU(0.1), Linear(64,4)
    p["et_w1"], p["et_b1"] = lin(SIM_DIM, SIM_DIM)
    p["et_w2"], p["et_b2"] = lin(SIM_DIM, 2 * Z_DIM)
    p["ei_w1"], p["ei_b1"] = lin(SIM_DIM, SIM_DIM)
    p["ei_w2"], p["ei_b2"] = lin(SIM_DIM, 2 * Z_DIM)
    return p


def pack_params(p):
    """Pack all folded params into 3 bf16 weight slabs + 1 f32 bias slab."""
    f32, bf16 = jnp.float32, jnp.bfloat16

    # slab of width 256: si_w1 rows [0:1024], st_w1 rows [1024:1024+H]
    w256 = jnp.concatenate([p["si_w1"], p["st_w1"]], axis=0).astype(bf16)

    # fused VIB encoder first layer: block-diagonal over [text_z | image_z]
    z64 = jnp.zeros((SIM_DIM, SIM_DIM), f32)
    enc_w1 = jnp.block([[p["et_w1"], z64], [z64, p["ei_w1"]]])         # (128,128)

    # slab of width 128
    w128 = jnp.concatenate([p["si_w2"], p["st_w2"], p["ia_w1"], p["ta_w1"],
                            p["fu_w1"], enc_w1], axis=0).astype(bf16)  # (1024,128)

    # fused mu/sigma head, lane layout [mu1, mu2, sig1, sig2], padded to 64
    head = jnp.zeros((2 * SIM_DIM, SIM_DIM), f32)
    head = head.at[0:SIM_DIM, 0:2].set(p["et_w2"][:, :Z_DIM])
    head = head.at[0:SIM_DIM, 4:6].set(p["et_w2"][:, Z_DIM:])
    head = head.at[SIM_DIM:, 2:4].set(p["ei_w2"][:, :Z_DIM])
    head = head.at[SIM_DIM:, 6:8].set(p["ei_w2"][:, Z_DIM:])

    cl_w2 = jnp.zeros((SIM_DIM, SIM_DIM), f32).at[:, 0:2].set(p["cl_w2"])

    # slab of width 64
    w64 = jnp.concatenate([p["ia_w2"], p["ta_w2"], p["fu_w2"],
                           p["cl_w1"][0:64], p["cl_w1"][64:128],
                           p["cl_w1"][128:192], cl_w2, head],
                          axis=0).astype(bf16)                          # (768,64)

    # bias slab: one bias per row, zero-padded to 256 lanes, f32
    def row(v):
        v = jnp.asarray(v, f32)
        return jnp.pad(v, (0, 256 - v.shape[0]))[None, :]

    head_b = jnp.zeros((SIM_DIM,), f32)
    head_b = head_b.at[0:2].set(p["et_b2"][:Z_DIM])
    head_b = head_b.at[2:4].set(p["ei_b2"][:Z_DIM])
    head_b = head_b.at[4:6].set(p["et_b2"][Z_DIM:])
    head_b = head_b.at[6:8].set(p["ei_b2"][Z_DIM:])
    cl_b2 = jnp.zeros((SIM_DIM,), f32).at[0:2].set(p["cl_b2"])
    enc_b1 = jnp.concatenate([p["et_b1"], p["ei_b1"]])

    biases = jnp.concatenate([
        row(p["si_b1"]), row(p["si_b2"]), row(p["ia_b1"]), row(p["ia_b2"]),
        row(p["st_b1"]), row(p["st_b2"]), row(p["ta_b1"]), row(p["ta_b2"]),
        row(p["fu_b1"]), row(p["fu_b2"]), row(p["cl_b1"]), row(cl_b2),
        row(enc_b1), row(head_b),
        row(jnp.zeros((256,), f32)), row(jnp.zeros((256,), f32))],
        axis=0)                                                          # (16,256)

    return w256, w128, w64, biases


if __name__ == "__main__":
    BATCH = 8
    SEQ = 8
    BERT_HIDDEN = 64          # args.bert_hidden_dim (kept small)

    key = jax.random.PRNGKey(0)
    k_param, k_bert, k_img, k_e1, k_e2 = jax.random.split(key, 5)

    params = init_params(k_param, BERT_HIDDEN, NUM_FTRS)
    packed = pack_params(params)

    bert_output = jax.random.normal(k_bert, (BATCH, SEQ, BERT_HIDDEN), jnp.float32)
    image_feats = jax.random.normal(k_img, (BATCH, NUM_FTRS), jnp.float32)
    eps1 = jax.random.normal(k_e1, (BATCH, Z_DIM), jnp.float32)
    eps2 = jax.random.normal(k_e2, (BATCH, Z_DIM), jnp.float32)

    class_output, text_image_fusion, image_z, text_z = cnn_fusion_forward(
        packed, bert_output, image_feats, eps1, eps2)
    jax.block_until_ready((class_output, text_image_fusion, image_z, text_z))

    assert class_output.shape == (BATCH, 2)
    assert text_image_fusion.shape == (BATCH, 3 * SIM_DIM)
    assert image_z.shape == (BATCH, SIM_DIM)
    assert text_z.shape == (BATCH, SIM_DIM)
    assert bool(jnp.all(jnp.isfinite(class_output)))
    assert bool(jnp.all(jnp.isfinite(text_image_fusion)))
    assert bool(jnp.all(jnp.isfinite(image_z)))
    assert bool(jnp.all(jnp.isfinite(text_z)))
    print("KERNEL_OK")
</pallas_src>

<mosaic_0001>
module attributes {stable_mosaic.version = 11 : i64} {
  func.func @_fused_forward_kernel(%arg0: memref<8x8x64xf32, #tpu.memory_space<vmem>>, %arg1: memref<8x1024xf32, #tpu.memory_space<vmem>>, %arg2: memref<8x4xf32, #tpu.memory_space<vmem>>, %arg3: memref<1088x256xbf16, #tpu.memory_space<vmem>>, %arg4: memref<1024x128xbf16, #tpu.memory_space<vmem>>, %arg5: memref<768x64xbf16, #tpu.memory_space<vmem>>, %arg6: memref<16x256xf32, #tpu.memory_space<vmem>>, %arg7: memref<8x384xf32, #tpu.memory_space<vmem>>) attributes {dimension_semantics = [], scalar_prefetch = 0 : i64, scratch_operands = 0 : i64, tpu.core_type = #tpu.core_type<tc>} {
    %c0 = arith.constant 0 : index
    %c0_0 = arith.constant 0 : index
    %0 = vector.load %arg1[%c0, %c0_0] : memref<8x1024xf32, #tpu.memory_space<vmem>>, vector<8x1024xf32>
    %c0_1 = arith.constant 0 : index
    %c0_2 = arith.constant 0 : index
    %1 = vector.load %arg3[%c0_1, %c0_2] : memref<1088x256xbf16, #tpu.memory_space<vmem>>, vector<1024x256xbf16>
    %2 = arith.extf %1 : vector<1024x256xbf16> to vector<1024x256xf32>
    %cst = arith.constant dense<0.000000e+00> : vector<8x256xf32>
    %3 = tpu.matmul %0, %2, %cst {dimension_numbers = #tpu.dot_dimension_numbers<[1], [0], [0], [1], [0, 0, 1, 1], [], []>} : vector<8x1024xf32>, vector<1024x256xf32>, vector<8x256xf32> -> vector<8x256xf32>
    %c0_3 = arith.constant 0 : index
    %c0_4 = arith.constant 0 : index
    %4 = vector.load %arg6[%c0_3, %c0_4] : memref<16x256xf32, #tpu.memory_space<vmem>>, vector<1x256xf32>
    %5 = vector.broadcast %4 : vector<1x256xf32> to vector<8x256xf32>
    %6 = arith.addf %3, %5 : vector<8x256xf32>
    %cst_5 = arith.constant 0.000000e+00 : f32
    %7 = vector.broadcast %cst_5 : f32 to vector<8x256xf32>
    %8 = arith.maximumf %6, %7 : vector<8x256xf32>
    %c0_6 = arith.constant 0 : index
    %c0_7 = arith.constant 0 : index
    %9 = vector.load %arg4[%c0_6, %c0_7] : memref<1024x128xbf16, #tpu.memory_space<vmem>>, vector<256x128xbf16>
    %10 = arith.extf %9 : vector<256x128xbf16> to vector<256x128xf32>
    %cst_8 = arith.constant dense<0.000000e+00> : vector<8x128xf32>
    %11 = tpu.matmul %8, %10, %cst_8 {dimension_numbers = #tpu.dot_dimension_numbers<[1], [0], [0], [1], [0, 0, 1, 1], [], []>} : vector<8x256xf32>, vector<256x128xf32>, vector<8x128xf32> -> vector<8x128xf32>
    %c1 = arith.constant 1 : index
    %c0_9 = arith.constant 0 : index
    %12 = vector.load %arg6[%c1, %c0_9] : memref<16x256xf32, #tpu.memory_space<vmem>>, vector<1x128xf32>
    %13 = vector.broadcast %12 : vector<1x128xf32> to vector<8x128xf32>
    %14 = arith.addf %11, %13 : vector<8x128xf32>
    %cst_10 = arith.constant 0.000000e+00 : f32
    %15 = vector.broadcast %cst_10 : f32 to vector<8x128xf32>
    %16 = arith.maximumf %14, %15 : vector<8x128xf32>
    %c512 = arith.constant 512 : index
    %c0_11 = arith.constant 0 : index
    %17 = vector.load %arg4[%c512, %c0_11] : memref<1024x128xbf16, #tpu.memory_space<vmem>>, vector<128x128xbf16>
    %18 = arith.extf %17 : vector<128x128xbf16> to vector<128x128xf32>
    %cst_12 = arith.constant dense<0.000000e+00> : vector<8x128xf32>
    %19 = tpu.matmul %16, %18, %cst_12 {dimension_numbers = #tpu.dot_dimension_numbers<[1], [0], [0], [1], [0, 0, 1, 1], [], []>} : vector<8x128xf32>, vector<128x128xf32>, vector<8x128xf32> -> vector<8x128xf32>
    %c2 = arith.constant 2 : index
    %c0_13 = arith.constant 0 : index
    %20 = vector.load %arg6[%c2, %c0_13] : memref<16x256xf32, #tpu.memory_space<vmem>>, vector<1x128xf32>
    %21 = vector.broadcast %20 : vector<1x128xf32> to vector<8x128xf32>
    %22 = arith.addf %19, %21 : vector<8x128xf32>
    %cst_14 = arith.constant 0.000000e+00 : f32
    %23 = vector.broadcast %cst_14 : f32 to vector<8x128xf32>
    %24 = arith.maximumf %22, %23 : vector<8x128xf32>
    %c0_15 = arith.constant 0 : index
    %c0_16 = arith.constant 0 : index
    %25 = vector.load %arg5[%c0_15, %c0_16] : memref<768x64xbf16, #tpu.memory_space<vmem>>, vector<128x64xbf16>
    %26 = arith.extf %25 : vector<128x64xbf16> to vector<128x64xf32>
    %cst_17 = arith.constant dense<0.000000e+00> : vector<8x64xf32>
    %27 = tpu.matmul %24, %26, %cst_17 {dimension_numbers = #tpu.dot_dimension_numbers<[1], [0], [0], [1], [0, 0, 1, 1], [], []>} : vector<8x128xf32>, vector<128x64xf32>, vector<8x64xf32> -> vector<8x64xf32>
    %c3 = arith.constant 3 : index
    %c0_18 = arith.constant 0 : index
    %28 = vector.load %arg6[%c3, %c0_18] : memref<16x256xf32, #tpu.memory_space<vmem>>, vector<1x64xf32>
    %29 = vector.broadcast %28 : vector<1x64xf32> to vector<8x64xf32>
    %30 = arith.addf %27, %29 : vector<8x64xf32>
    %cst_19 = arith.constant 0.000000e+00 : f32
    %31 = vector.broadcast %cst_19 : f32 to vector<8x64xf32>
    %32 = arith.maximumf %30, %31 : vector<8x64xf32>
    %c0_20 = arith.constant 0 : index
    %c0_21 = arith.constant 0 : index
    %c0_22 = arith.constant 0 : index
    %33 = vector.load %arg0[%c0_20, %c0_21, %c0_22] : memref<8x8x64xf32, #tpu.memory_space<vmem>>, vector<8x8x64xf32>
    %cst_23 = arith.constant dense<0.000000e+00> : vector<8x64xf32>
    %34 = vector.multi_reduction <add>, %33, %cst_23 [0] : vector<8x8x64xf32> to vector<8x64xf32>
    %cst_24 = arith.constant 8.000000e+00 : f32
    %35 = vector.broadcast %cst_24 : f32 to vector<8x64xf32>
    %36 = arith.divf %34, %35 : vector<8x64xf32>
    %c1024 = arith.constant 1024 : index
    %c0_25 = arith.constant 0 : index
    %37 = vector.load %arg3[%c1024, %c0_25] : memref<1088x256xbf16, #tpu.memory_space<vmem>>, vector<64x256xbf16>
    %38 = arith.extf %37 : vector<64x256xbf16> to vector<64x256xf32>
    %cst_26 = arith.constant dense<0.000000e+00> : vector<8x256xf32>
    %39 = tpu.matmul %36, %38, %cst_26 {dimension_numbers = #tpu.dot_dimension_numbers<[1], [0], [0], [1], [0, 0, 1, 1], [], []>} : vector<8x64xf32>, vector<64x256xf32>, vector<8x256xf32> -> vector<8x256xf32>
    %c4 = arith.constant 4 : index
    %c0_27 = arith.constant 0 : index
    %40 = vector.load %arg6[%c4, %c0_27] : memref<16x256xf32, #tpu.memory_space<vmem>>, vector<1x256xf32>
    %41 = vector.broadcast %40 : vector<1x256xf32> to vector<8x256xf32>
    %42 = arith.addf %39, %41 : vector<8x256xf32>
    %cst_28 = arith.constant 0.000000e+00 : f32
    %43 = vector.broadcast %cst_28 : f32 to vector<8x256xf32>
    %44 = arith.maximumf %42, %43 : vector<8x256xf32>
    %c256 = arith.constant 256 : index
    %c0_29 = arith.constant 0 : index
    %45 = vector.load %arg4[%c256, %c0_29] : memref<1024x128xbf16, #tpu.memory_space<vmem>>, vector<256x128xbf16>
    %46 = arith.extf %45 : vector<256x128xbf16> to vector<256x128xf32>
    %cst_30 = arith.constant dense<0.000000e+00> : vector<8x128xf32>
    %47 = tpu.matmul %44, %46, %cst_30 {dimension_numbers = #tpu.dot_dimension_numbers<[1], [0], [0], [1], [0, 0, 1, 1], [], []>} : vector<8x256xf32>, vector<256x128xf32>, vector<8x128xf32> -> vector<8x128xf32>
    %c5 = arith.constant 5 : index
    %c0_31 = arith.constant 0 : index
    %48 = vector.load %arg6[%c5, %c0_31] : memref<16x256xf32, #tpu.memory_space<vmem>>, vector<1x128xf32>
    %49 = vector.broadcast %48 : vector<1x128xf32> to vector<8x128xf32>
    %50 = arith.addf %47, %49 : vector<8x128xf32>
    %cst_32 = arith.constant 0.000000e+00 : f32
    %51 = vector.broadcast %cst_32 : f32 to vector<8x128xf32>
    %52 = arith.maximumf %50, %51 : vector<8x128xf32>
    %c640 = arith.constant 640 : index
    %c0_33 = arith.constant 0 : index
    %53 = vector.load %arg4[%c640, %c0_33] : memref<1024x128xbf16, #tpu.memory_space<vmem>>, vector<128x128xbf16>
    %54 = arith.extf %53 : vector<128x128xbf16> to vector<128x128xf32>
    %cst_34 = arith.constant dense<0.000000e+00> : vector<8x128xf32>
    %55 = tpu.matmul %52, %54, %cst_34 {dimension_numbers = #tpu.dot_dimension_numbers<[1], [0], [0], [1], [0, 0, 1, 1], [], []>} : vector<8x128xf32>, vector<128x128xf32>, vector<8x128xf32> -> vector<8x128xf32>
    %c6 = arith.constant 6 : index
    %c0_35 = arith.constant 0 : index
    %56 = vector.load %arg6[%c6, %c0_35] : memref<16x256xf32, #tpu.memory_space<vmem>>, vector<1x128xf32>
    %57 = vector.broadcast %56 : vector<1x128xf32> to vector<8x128xf32>
    %58 = arith.addf %55, %57 : vector<8x128xf32>
    %cst_36 = arith.constant 0.000000e+00 : f32
    %59 = vector.broadcast %cst_36 : f32 to vector<8x128xf32>
    %60 = arith.maximumf %58, %59 : vector<8x128xf32>
    %c128 = arith.constant 128 : index
    %c0_37 = arith.constant 0 : index
    %61 = vector.load %arg5[%c128, %c0_37] : memref<768x64xbf16, #tpu.memory_space<vmem>>, vector<128x64xbf16>
    %62 = arith.extf %61 : vector<128x64xbf16> to vector<128x64xf32>
    %cst_38 = arith.constant dense<0.000000e+00> : vector<8x64xf32>
    %63 = tpu.matmul %60, %62, %cst_38 {dimension_numbers = #tpu.dot_dimension_numbers<[1], [0], [0], [1], [0, 0, 1, 1], [], []>} : vector<8x128xf32>, vector<128x64xf32>, vector<8x64xf32> -> vector<8x64xf32>
    %c7 = arith.constant 7 : index
    %c0_39 = arith.constant 0 : index
    %64 = vector.load %arg6[%c7, %c0_39] : memref<16x256xf32, #tpu.memory_space<vmem>>, vector<1x64xf32>
    %65 = vector.broadcast %64 : vector<1x64xf32> to vector<8x64xf32>
    %66 = arith.addf %63, %65 : vector<8x64xf32>
    %cst_40 = arith.constant 0.000000e+00 : f32
    %67 = vector.broadcast %cst_40 : f32 to vector<8x64xf32>
    %68 = arith.maximumf %66, %67 : vector<8x64xf32>
    %69 = tpu.concatenate %68, %32 in 1 : vector<8x64xf32>, vector<8x64xf32> -> vector<8x128xf32>
    %c768 = arith.constant 768 : index
    %c0_41 = arith.constant 0 : index
    %70 = vector.load %arg4[%c768, %c0_41] : memref<1024x128xbf16, #tpu.memory_space<vmem>>, vector<128x128xbf16>
    %71 = arith.extf %70 : vector<128x128xbf16> to vector<128x128xf32>
    %cst_42 = arith.constant dense<0.000000e+00> : vector<8x128xf32>
    %72 = tpu.matmul %69, %71, %cst_42 {dimension_numbers = #tpu.dot_dimension_numbers<[1], [0], [0], [1], [0, 0, 1, 1], [], []>} : vector<8x128xf32>, vector<128x128xf32>, vector<8x128xf32> -> vector<8x128xf32>
    %c8 = arith.constant 8 : index
    %c0_43 = arith.constant 0 : index
    %73 = vector.load %arg6[%c8, %c0_43] : memref<16x256xf32, #tpu.memory_space<vmem>>, vector<1x128xf32>
    %74 = vector.broadcast %73 : vector<1x128xf32> to vector<8x128xf32>
    %75 = arith.addf %72, %74 : vector<8x128xf32>
    %cst_44 = arith.constant 0.000000e+00 : f32
    %76 = vector.broadcast %cst_44 : f32 to vector<8x128xf32>
    %77 = arith.maximumf %75, %76 : vector<8x128xf32>
    %c256_45 = arith.constant 256 : index
    %c0_46 = arith.constant 0 : index
    %78 = vector.load %arg5[%c256_45, %c0_46] : memref<768x64xbf16, #tpu.memory_space<vmem>>, vector<128x64xbf16>
    %79 = arith.extf %78 : vector<128x64xbf16> to vector<128x64xf32>
    %cst_47 = arith.constant dense<0.000000e+00> : vector<8x64xf32>
    %80 = tpu.matmul %77, %79, %cst_47 {dimension_numbers = #tpu.dot_dimension_numbers<[1], [0], [0], [1], [0, 0, 1, 1], [], []>} : vector<8x128xf32>, vector<128x64xf32>, vector<8x64xf32> -> vector<8x64xf32>
    %c9 = arith.constant 9 : index
    %c0_48 = arith.constant 0 : index
    %81 = vector.load %arg6[%c9, %c0_48] : memref<16x256xf32, #tpu.memory_space<vmem>>, vector<1x64xf32>
    %82 = vector.broadcast %81 : vector<1x64xf32> to vector<8x64xf32>
    %83 = arith.addf %80, %82 : vector<8x64xf32>
    %cst_49 = arith.constant 0.000000e+00 : f32
    %84 = vector.broadcast %cst_49 : f32 to vector<8x64xf32>
    %85 = arith.maximumf %83, %84 : vector<8x64xf32>
    %c896 = arith.constant 896 : index
    %c0_50 = arith.constant 0 : index
    %86 = vector.load %arg4[%c896, %c0_50] : memref<1024x128xbf16, #tpu.memory_space<vmem>>, vector<128x128xbf16>
    %87 = arith.extf %86 : vector<128x128xbf16> to vector<128x128xf32>
    %cst_51 = arith.constant dense<0.000000e+00> : vector<8x128xf32>
    %88 = tpu.matmul %69, %87, %cst_51 {dimension_numbers = #tpu.dot_dimension_numbers<[1], [0], [0], [1], [0, 0, 1, 1], [], []>} : vector<8x128xf32>, vector<128x128xf32>, vector<8x128xf32> -> vector<8x128xf32>
    %c12 = arith.constant 12 : index
    %c0_52 = arith.constant 0 : index
    %89 = vector.load %arg6[%c12, %c0_52] : memref<16x256xf32, #tpu.memory_space<vmem>>, vector<1x128xf32>
    %90 = vector.broadcast %89 : vector<1x128xf32> to vector<8x128xf32>
    %91 = arith.addf %88, %90 : vector<8x128xf32>
    %cst_53 = arith.constant 0.000000e+00 : f32
    %92 = vector.broadcast %cst_53 : f32 to vector<8x128xf32>
    %93 = arith.cmpf ogt, %91, %92 : vector<8x128xf32>
    %cst_54 = arith.constant 1.000000e-01 : f32
    %94 = vector.broadcast %cst_54 : f32 to vector<8x128xf32>
    %95 = arith.mulf %94, %91 : vector<8x128xf32>
    %96 = arith.select %93, %91, %95 : vector<8x128xi1>, vector<8x128xf32>
    %c640_55 = arith.constant 640 : index
    %c0_56 = arith.constant 0 : index
    %97 = vector.load %arg5[%c640_55, %c0_56] : memref<768x64xbf16, #tpu.memory_space<vmem>>, vector<128x64xbf16>
    %98 = arith.extf %97 : vector<128x64xbf16> to vector<128x64xf32>
    %cst_57 = arith.constant dense<0.000000e+00> : vector<8x64xf32>
    %99 = tpu.matmul %96, %98, %cst_57 {dimension_numbers = #tpu.dot_dimension_numbers<[1], [0], [0], [1], [0, 0, 1, 1], [], []>} : vector<8x128xf32>, vector<128x64xf32>, vector<8x64xf32> -> vector<8x64xf32>
    %c13 = arith.constant 13 : index
    %c0_58 = arith.constant 0 : index
    %100 = vector.load %arg6[%c13, %c0_58] : memref<16x256xf32, #tpu.memory_space<vmem>>, vector<1x64xf32>
    %101 = vector.broadcast %100 : vector<1x64xf32> to vector<8x64xf32>
    %102 = arith.addf %99, %101 : vector<8x64xf32>
    %103 = vector.extract_strided_slice %102 {offsets = [0, 0], sizes = [8, 4], strides = [1, 1]} : vector<8x64xf32> to vector<8x4xf32>
    %104 = vector.extract_strided_slice %102 {offsets = [0, 4], sizes = [8, 4], strides = [1, 1]} : vector<8x64xf32> to vector<8x4xf32>
    %cst_59 = arith.constant 0.000000e+00 : f32
    %105 = vector.broadcast %cst_59 : f32 to vector<8x4xf32>
    %106 = arith.maximumf %104, %105 : vector<8x4xf32>
    %107 = vector.broadcast %cst_59 : f32 to vector<8x4xf32>
    %108 = arith.subf %104, %107 : vector<8x4xf32>
    %109 = arith.cmpf one, %108, %108 : vector<8x4xf32>
    %110 = vector.broadcast %cst_59 : f32 to vector<8x4xf32>
    %111 = arith.addf %104, %110 : vector<8x4xf32>
    %112 = math.absf %108 : vector<8x4xf32>
    %cst_60 = arith.constant 0.000000e+00 : f32
    %113 = vector.broadcast %cst_60 : f32 to vector<8x4xf32>
    %114 = arith.subf %113, %112 : vector<8x4xf32>
    %115 = math.exp %114 : vector<8x4xf32>
    %116 = math.log1p %115 : vector<8x4xf32>
    %117 = arith.addf %106, %116 : vector<8x4xf32>
    %118 = arith.select %109, %111, %117 : vector<8x4xi1>, vector<8x4xf32>
    %cst_61 = arith.constant 1.000000e-07 : f32
    %119 = vector.broadcast %cst_61 : f32 to vector<8x4xf32>
    %120 = arith.addf %118, %119 : vector<8x4xf32>
    %c0_62 = arith.constant 0 : index
    %c0_63 = arith.constant 0 : index
    %121 = vector.load %arg2[%c0_62, %c0_63] : memref<8x4xf32, #tpu.memory_space<vmem>>, vector<8x4xf32>
    %122 = arith.mulf %120, %121 : vector<8x4xf32>
    %123 = arith.addf %103, %122 : vector<8x4xf32>
    %124 = vector.extract_strided_slice %103 {offsets = [0, 0], sizes = [8, 2], strides = [1, 1]} : vector<8x4xf32> to vector<8x2xf32>
    %125 = vector.extract_strided_slice %103 {offsets = [0, 2], sizes = [8, 2], strides = [1, 1]} : vector<8x4xf32> to vector<8x2xf32>
    %126 = vector.extract_strided_slice %120 {offsets = [0, 0], sizes = [8, 2], strides = [1, 1]} : vector<8x4xf32> to vector<8x2xf32>
    %127 = vector.extract_strided_slice %120 {offsets = [0, 2], sizes = [8, 2], strides = [1, 1]} : vector<8x4xf32> to vector<8x2xf32>
    %128 = vector.extract_strided_slice %123 {offsets = [0, 0], sizes = [8, 2], strides = [1, 1]} : vector<8x4xf32> to vector<8x2xf32>
    %129 = vector.extract_strided_slice %123 {offsets = [0, 2], sizes = [8, 2], strides = [1, 1]} : vector<8x4xf32> to vector<8x2xf32>
    %130 = arith.subf %128, %124 : vector<8x2xf32>
    %131 = arith.divf %130, %126 : vector<8x2xf32>
    %132 = arith.mulf %131, %131 : vector<8x2xf32>
    %cst_64 = arith.constant -5.000000e-01 : f32
    %133 = vector.broadcast %cst_64 : f32 to vector<8x2xf32>
    %134 = arith.mulf %133, %132 : vector<8x2xf32>
    %135 = math.log %126 : vector<8x2xf32>
    %136 = arith.subf %134, %135 : vector<8x2xf32>
    %cst_65 = arith.constant 6.28318548 : f32
    %137 = math.log %cst_65 : f32
    %cst_66 = arith.constant 5.000000e-01 : f32
    %138 = arith.mulf %cst_66, %137 : f32
    %139 = vector.broadcast %138 : f32 to vector<8x2xf32>
    %140 = arith.subf %136, %139 : vector<8x2xf32>
    %cst_67 = arith.constant dense<0.000000e+00> : vector<8xf32>
    %141 = vector.multi_reduction <add>, %140, %cst_67 [1] : vector<8x2xf32> to vector<8xf32>
    %142 = vector.shape_cast %141 : vector<8xf32> to vector<8x1xf32>
    %143 = arith.subf %128, %125 : vector<8x2xf32>
    %144 = arith.divf %143, %127 : vector<8x2xf32>
    %145 = arith.mulf %144, %144 : vector<8x2xf32>
    %cst_68 = arith.constant -5.000000e-01 : f32
    %146 = vector.broadcast %cst_68 : f32 to vector<8x2xf32>
    %147 = arith.mulf %146, %145 : vector<8x2xf32>
    %148 = math.log %127 : vector<8x2xf32>
    %149 = arith.subf %147, %148 : vector<8x2xf32>
    %cst_69 = arith.constant 6.28318548 : f32
    %150 = math.log %cst_69 : f32
    %cst_70 = arith.constant 5.000000e-01 : f32
    %151 = arith.mulf %cst_70, %150 : f32
    %152 = vector.broadcast %151 : f32 to vector<8x2xf32>
    %153 = arith.subf %149, %152 : vector<8x2xf32>
    %cst_71 = arith.constant dense<0.000000e+00> : vector<8xf32>
    %154 = vector.multi_reduction <add>, %153, %cst_71 [1] : vector<8x2xf32> to vector<8xf32>
    %155 = vector.shape_cast %154 : vector<8xf32> to vector<8x1xf32>
    %156 = arith.subf %142, %155 : vector<8x1xf32>
    %157 = arith.subf %129, %125 : vector<8x2xf32>
    %158 = arith.divf %157, %127 : vector<8x2xf32>
    %159 = arith.mulf %158, %158 : vector<8x2xf32>
    %cst_72 = arith.constant -5.000000e-01 : f32
    %160 = vector.broadcast %cst_72 : f32 to vector<8x2xf32>
    %161 = arith.mulf %160, %159 : vector<8x2xf32>
    %162 = math.log %127 : vector<8x2xf32>
    %163 = arith.subf %161, %162 : vector<8x2xf32>
    %cst_73 = arith.constant 6.28318548 : f32
    %164 = math.log %cst_73 : f32
    %cst_74 = arith.constant 5.000000e-01 : f32
    %165 = arith.mulf %cst_74, %164 : f32
    %166 = vector.broadcast %165 : f32 to vector<8x2xf32>
    %167 = arith.subf %163, %166 : vector<8x2xf32>
    %cst_75 = arith.constant dense<0.000000e+00> : vector<8xf32>
    %168 = vector.multi_reduction <add>, %167, %cst_75 [1] : vector<8x2xf32> to vector<8xf32>
    %169 = vector.shape_cast %168 : vector<8xf32> to vector<8x1xf32>
    %170 = arith.subf %129, %124 : vector<8x2xf32>
    %171 = arith.divf %170, %126 : vector<8x2xf32>
    %172 = arith.mulf %171, %171 : vector<8x2xf32>
    %cst_76 = arith.constant -5.000000e-01 : f32
    %173 = vector.broadcast %cst_76 : f32 to vector<8x2xf32>
    %174 = arith.mulf %173, %172 : vector<8x2xf32>
    %175 = math.log %126 : vector<8x2xf32>
    %176 = arith.subf %174, %175 : vector<8x2xf32>
    %cst_77 = arith.constant 6.28318548 : f32
    %177 = math.log %cst_77 : f32
    %cst_78 = arith.constant 5.000000e-01 : f32
    %178 = arith.mulf %cst_78, %177 : f32
    %179 = vector.broadcast %178 : f32 to vector<8x2xf32>
    %180 = arith.subf %176, %179 : vector<8x2xf32>
    %cst_79 = arith.constant dense<0.000000e+00> : vector<8xf32>
    %181 = vector.multi_reduction <add>, %180, %cst_79 [1] : vector<8x2xf32> to vector<8xf32>
    %182 = vector.shape_cast %181 : vector<8xf32> to vector<8x1xf32>
    %183 = arith.subf %169, %182 : vector<8x1xf32>
    %184 = arith.addf %156, %183 : vector<8x1xf32>
    %cst_80 = arith.constant 5.000000e-01 : f32
    %185 = vector.broadcast %cst_80 : f32 to vector<8x1xf32>
    %186 = arith.mulf %185, %184 : vector<8x1xf32>
    %187 = arith.negf %186 : vector<8x1xf32>
    %188 = math.exp %187 : vector<8x1xf32>
    %cst_81 = arith.constant 1.000000e+00 : f32
    %189 = vector.broadcast %cst_81 : f32 to vector<8x1xf32>
    %190 = arith.addf %189, %188 : vector<8x1xf32>
    %191 = arith.divf %189, %190 : vector<8x1xf32>
    %cst_82 = arith.constant 2.500000e-01 : f32
    %cst_83 = arith.constant 7.500000e-01 : f32
    %192 = vector.broadcast %cst_82 : f32 to vector<8x1xf32>
    %193 = arith.maximumf %192, %191 : vector<8x1xf32>
    %194 = vector.broadcast %cst_83 : f32 to vector<8x1xf32>
    %195 = arith.minimumf %194, %193 : vector<8x1xf32>
    %cst_84 = arith.constant 1.000000e+00 : f32
    %196 = vector.broadcast %cst_84 : f32 to vector<8x1xf32>
    %197 = arith.subf %196, %195 : vector<8x1xf32>
    %198 = vector.broadcast %197 : vector<8x1xf32> to vector<8x64xf32>
    %199 = arith.mulf %198, %68 : vector<8x64xf32>
    %200 = vector.broadcast %197 : vector<8x1xf32> to vector<8x64xf32>
    %201 = arith.mulf %200, %32 : vector<8x64xf32>
    %202 = vector.broadcast %195 : vector<8x1xf32> to vector<8x64xf32>
    %203 = arith.mulf %202, %85 : vector<8x64xf32>
    %c384 = arith.constant 384 : index
    %c0_85 = arith.constant 0 : index
    %204 = vector.load %arg5[%c384, %c0_85] : memref<768x64xbf16, #tpu.memory_space<vmem>>, vector<64x64xbf16>
    %205 = arith.extf %204 : vector<64x64xbf16> to vector<64x64xf32>
    %cst_86 = arith.constant dense<0.000000e+00> : vector<8x64xf32>
    %206 = tpu.matmul %199, %205, %cst_86 {dimension_numbers = #tpu.dot_dimension_numbers<[1], [0], [0], [1], [0, 0, 1, 1], [], []>} : vector<8x64xf32>, vector<64x64xf32>, vector<8x64xf32> -> vector<8x64xf32>
    %c448 = arith.constant 448 : index
    %c0_87 = arith.constant 0 : index
    %207 = vector.load %arg5[%c448, %c0_87] : memref<768x64xbf16, #tpu.memory_space<vmem>>, vector<64x64xbf16>
    %208 = arith.extf %207 : vector<64x64xbf16> to vector<64x64xf32>
    %cst_88 = arith.constant dense<0.000000e+00> : vector<8x64xf32>
    %209 = tpu.matmul %201, %208, %cst_88 {dimension_numbers = #tpu.dot_dimension_numbers<[1], [0], [0], [1], [0, 0, 1, 1], [], []>} : vector<8x64xf32>, vector<64x64xf32>, vector<8x64xf32> -> vector<8x64xf32>
    %210 = arith.addf %206, %209 : vector<8x64xf32>
    %c512_89 = arith.constant 512 : index
    %c0_90 = arith.constant 0 : index
    %211 = vector.load %arg5[%c512_89, %c0_90] : memref<768x64xbf16, #tpu.memory_space<vmem>>, vector<64x64xbf16>
    %212 = arith.extf %211 : vector<64x64xbf16> to vector<64x64xf32>
    %cst_91 = arith.constant dense<0.000000e+00> : vector<8x64xf32>
    %213 = tpu.matmul %203, %212, %cst_91 {dimension_numbers = #tpu.dot_dimension_numbers<[1], [0], [0], [1], [0, 0, 1, 1], [], []>} : vector<8x64xf32>, vector<64x64xf32>, vector<8x64xf32> -> vector<8x64xf32>
    %214 = arith.addf %210, %213 : vector<8x64xf32>
    %c10 = arith.constant 10 : index
    %c0_92 = arith.constant 0 : index
    %215 = vector.load %arg6[%c10, %c0_92] : memref<16x256xf32, #tpu.memory_space<vmem>>, vector<1x64xf32>
    %216 = vector.broadcast %215 : vector<1x64xf32> to vector<8x64xf32>
    %217 = arith.addf %214, %216 : vector<8x64xf32>
    %cst_93 = arith.constant 0.000000e+00 : f32
    %218 = vector.broadcast %cst_93 : f32 to vector<8x64xf32>
    %219 = arith.maximumf %217, %218 : vector<8x64xf32>
    %c576 = arith.constant 576 : index
    %c0_94 = arith.constant 0 : index
    %220 = vector.load %arg5[%c576, %c0_94] : memref<768x64xbf16, #tpu.memory_space<vmem>>, vector<64x64xbf16>
    %221 = arith.extf %220 : vector<64x64xbf16> to vector<64x64xf32>
    %cst_95 = arith.constant dense<0.000000e+00> : vector<8x64xf32>
    %222 = tpu.matmul %219, %221, %cst_95 {dimension_numbers = #tpu.dot_dimension_numbers<[1], [0], [0], [1], [0, 0, 1, 1], [], []>} : vector<8x64xf32>, vector<64x64xf32>, vector<8x64xf32> -> vector<8x64xf32>
    %c11 = arith.constant 11 : index
    %c0_96 = arith.constant 0 : index
    %223 = vector.load %arg6[%c11, %c0_96] : memref<16x256xf32, #tpu.memory_space<vmem>>, vector<1x64xf32>
    %224 = vector.broadcast %223 : vector<1x64xf32> to vector<8x64xf32>
    %225 = arith.addf %222, %224 : vector<8x64xf32>
    %226 = tpu.concatenate %68, %32, %199, %201, %203, %225 in 1 : vector<8x64xf32>, vector<8x64xf32>, vector<8x64xf32>, vector<8x64xf32>, vector<8x64xf32>, vector<8x64xf32> -> vector<8x384xf32>
    %c0_97 = arith.constant 0 : index
    %c0_98 = arith.constant 0 : index
    %227 = vector.load %arg7[%c0_97, %c0_98] : memref<8x384xf32, #tpu.memory_space<vmem>>, vector<8x384xf32>
    tpu.vector_store %arg7[%c0_97, %c0_98], %226 {strides = array<i32>} : memref<8x384xf32, #tpu.memory_space<vmem>>, vector<8x384xf32>,
    return
  }
}

</mosaic_0001>

<bundles_post_ra>
// kernel: tpu_custom_call.1
= control target key start
LH: loop header
LB: loop body
LE: loop exit
PB: predicated region body
PF: predicated region fallthrough
CT: control target
= control target key end

     0   :  { %12 = vsyncpa [#allocation3], 0  ;;  %s3646_s0 = inlined_call_operand.vmem [shape: f32[8,8,64], index: 0, kind: input, shape index: {}]   ;;  %s3647_s1 = inlined_call_operand.hbm [shape: f32[8,1024], index: 1, kind: input, shape index: {}]   ;;  %s3648_s2 = inlined_call_operand.vmem [shape: f32[8,4], index: 2, kind: input, shape index: {}]   ;;  %s3649_s3 = inlined_call_operand.hbm [shape: bf16[1088,256], index: 3, kind: input, shape index: {}]   ;;  %s3650_s4 = inlined_call_operand.vmem [shape: bf16[1024,128], index: 4, kind: input, shape index: {}]   ;;  %s3651_s5 = inlined_call_operand.vmem [shape: bf16[768,64], index: 5, kind: input, shape index: {}]   ;;  %s3652_s6 = inlined_call_operand.hbm [shape: f32[16,256], index: 6, kind: input, shape index: {}]   ;;  %s3653_s7 = inlined_call_operand.hbm [shape: f32[8,384], index: 7, kind: output, shape index: {}]  }
   0x1   :  { %13 = vsyncpa [#allocation6], 0  ;;  %s34_s26 = sshll.u32 %s3649_s3, 4  ;;  %s35_s26 = int_to_ptr.hbm [resolvable:$true] %s34_s26 }
   0x2   :  { %14 = vsyncpa [#allocation4], 0  ;;  %s2613_s27 = smov [#allocation5]   ;;  %s22_s8 = sshll.u32 %s3647_s1, 4  ;;  %s23_s8 = int_to_ptr.hbm [resolvable:$true] %s22_s8 }
   0x3   :  { %s36_s28 = sshll.u32 %s2613_s27, 4  ;;  %s2614_s9 = smov 128   ;;  %s37_s28 = int_to_ptr.vmem [resolvable:$true] %s36_s28 }
   0x4   :  { %s2615_s10 = smov 8   ;;  %s2616_s11 = smov [#allocation2]  }
   0x5   :  { %42 = dma.hbm_to_vmem [thread:$0]  %s35_s26, 17408, %s37_s28, [#allocation6], %s2614_s9, %s2614_s9, %s2615_s10  }
   0x6   :  { %s24_s12 = sshll.u32 %s2616_s11, 4  ;;  %s51_s15 = sshll.u32 %s3652_s6, 4  ;;  %s25_s12 = int_to_ptr.vmem [resolvable:$true] %s24_s12  ;;  %s52_s15 = int_to_ptr.hbm [resolvable:$true] %s51_s15 }
   0x7   :  { %27 = dma.hbm_to_vmem [thread:$0]  %s23_s8, 1024, %s25_s12, [#allocation3]  }
   0x8   :  { %s2617_s3 = smov [#allocation7]   ;;  %s2618_s17 = smov 256  }
   0x9   :  { %s53_s16 = sshll.u32 %s2617_s3, 4  ;;  %s2619_s18 = smov 16   ;;  %s54_s16 = int_to_ptr.vmem [resolvable:$true] %s53_s16 }
   0xa   :  { %59 = dma.hbm_to_vmem [thread:$0]  %s52_s15, 512, %s54_s16, [#allocation6], %s2618_s17, %s2618_s17, %s2619_s18  }
   0xb   :  { %2607 = dma.done.wait [#allocation3], 1024  }
   0xc   :  { %2608 = vsyncadd [#allocation3], 4294966272 }
   0xd   :  { %2609 = dma.done.wait [#allocation6], 17920  }
   0xe   :  { %2610 = vsyncadd [#allocation6], 4294949376  ;;  %v2677_v0 = vld [vmem:[#allocation5 + $0x178] sm:$0xff]  ;;  %v2681_v2 = vld [vmem:[#allocation5 + $0x170] sm:$0xff]  ;;  %vm1014_vm0 = vcmask 523264   ;;  %s2621_s18 = smov 64  }
   0xf   :  { %v2679_v1 = vld [vmem:[#allocation5 + $0x78] sm:$0xff]  ;;  %v302_v3 = vunpack.c.l.bf16 %v2677_v0  ;;  %v2687_v6 = vld [vmem:[#allocation5 + $0x70] sm:$0xff]  ;;  %v300_v8 = vunpack.c.l.bf16 %v2681_v2  ;;  %v2693_v10 = vld [vmem:[#allocation5 + $0x168] sm:$0xff]  ;;  %s2622_s16 = smov 4   ;;  %s2624_s17 = smov 126   ;;  %vm1610_vm13 = vcmask 15360  }
  0x10   :  { %v238_v4 = vunpack.c.l.bf16 %v2679_v1  ;;  %v2685_v5 = vld [vmem:[#allocation5 + $0x1f8] sm:$0xff]  ;;  %v2695_v11 = vld [vmem:[#allocation5 + $0x1f0] sm:$0xff]  ;;  %v2697_v12 = vld [vmem:[#allocation5 + $0x68] sm:$0xff]  ;;  %v236_v13 = vunpack.c.l.bf16 %v2687_v6  ;;  %v298_v18 = vunpack.c.l.bf16 %v2693_v10  ;;  %s2625_s1 = smov 2   ;;  %s2626_s6 = smov 122  }
  0x11   :  { %v2689_v7 = vld [vmem:[#allocation5 + $0xf8] sm:$0xff]  ;;  %v334_v9 = vunpack.c.l.bf16 %v2685_v5  ;;  %510 = vmatpush.msra.mxu2 %v302_v3  ;;  %v2701_v15 = vld [vmem:[#allocation5 + $0xf0] sm:$0xff]  ;;  %v2703_v16 = vld [vmem:[#allocation5 + $0x160] sm:$0xff]  ;;  %v332_v19 = vunpack.c.l.bf16 %v2695_v11  ;;  %v234_v22 = vunpack.c.l.bf16 %v2697_v12  ;;  %s1899_s26 = sshll.u32 %s3653_s7, 4  ;;  %s1900_s26 = int_to_ptr.hbm [resolvable:$true] %s1899_s26 }
  0x12   :  { %470 = vmatpush.msra.mxu0 %v238_v4  ;;  %v270_v14 = vunpack.c.l.bf16 %v2689_v7  ;;  %v2705_v17 = vld [vmem:[#allocation5 + $0x1e8] sm:$0xff]  ;;  %v2709_v20 = vld [vmem:[#allocation5 + $0x60] sm:$0xff]  ;;  %v268_v23 = vunpack.c.l.bf16 %v2701_v15  ;;  %v2715_v24 = vld [vmem:[#allocation5 + $0x158] sm:$0xff]  ;;  %v296_v26 = vunpack.c.l.bf16 %v2703_v16 }
  0x13   :  { %530 = vmatpush.msra.mxu3 %v334_v9  ;;  %v2711_v21 = vld [vmem:[#allocation5 + $0xe8] sm:$0xff]  ;;  %511 = vmatpush.msra.mxu2 %v300_v8  ;;  %v2717_v25 = vld [vmem:[#allocation5 + $0x1e0] sm:$0xff]  ;;  %v330_v27 = vunpack.c.l.bf16 %v2705_v17  ;;  %v2721_v28 = vld [vmem:[#allocation5 + $0x58] sm:$0xff]  ;;  %v232_v30 = vunpack.c.l.bf16 %v2709_v20  ;;  %v294_v34 = vunpack.c.l.bf16 %v2715_v24 }
  0x14   :  { %471 = vmatpush.msra.mxu0 %v236_v13  ;;  %490 = vmatpush.msra.mxu1 %v270_v14  ;;  %v2723_v29 = vld [vmem:[#allocation5 + $0xe0] sm:$0xff]  ;;  %v266_v31 = vunpack.c.l.bf16 %v2711_v21  ;;  %v2727_v32 = vld [vmem:[#allocation5 + $0x150] sm:$0xff]  ;;  %v2729_v33 = vld [vmem:[#allocation5 + $0x1d8] sm:$0xff]  ;;  %v328_v35 = vunpack.c.l.bf16 %v2717_v25  ;;  %v230_v38 = vunpack.c.l.bf16 %v2721_v28 }
  0x15   :  { %531 = vmatpush.msra.mxu3 %v332_v19  ;;  %512 = vmatpush.msra.mxu2 %v298_v18  ;;  %v2733_v36 = vld [vmem:[#allocation5 + $0x50] sm:$0xff]  ;;  %v2735_v37 = vld [vmem:[#allocation5 + $0xd8] sm:$0xff]  ;;  %v264_v39 = vunpack.c.l.bf16 %v2723_v29  ;;  %v2739_v40 = vld [vmem:[#allocation5 + $0x148] sm:$0xff]  ;;  %v292_v42 = vunpack.c.l.bf16 %v2727_v32  ;;  %v326_v43 = vunpack.c.l.bf16 %v2729_v33 }
  0x16   :  { %472 = vmatpush.msra.mxu0 %v234_v22  ;;  %491 = vmatpush.msra.mxu1 %v268_v23  ;;  %v2741_v41 = vld [vmem:[#allocation5 + $0x1d0] sm:$0xff]  ;;  %v2745_v44 = vld [vmem:[#allocation5 + $0x48] sm:$0xff]  ;;  %v228_v46 = vunpack.c.l.bf16 %v2733_v36  ;;  %v262_v47 = vunpack.c.l.bf16 %v2735_v37  ;;  %v2751_v48 = vld [vmem:[#allocation5 + $0x140] sm:$0xff]  ;;  %v290_v50 = vunpack.c.l.bf16 %v2739_v40 }
  0x17   :  { %532 = vmatpush.msra.mxu3 %v330_v27  ;;  %513 = vmatpush.msra.mxu2 %v296_v26  ;;  %v2747_v45 = vld [vmem:[#allocation5 + $0xd0] sm:$0xff]  ;;  %v2753_v49 = vld [vmem:[#allocation5 + $0x1c8] sm:$0xff]  ;;  %v324_v51 = vunpack.c.l.bf16 %v2741_v41  ;;  %v2757_v52 = vld [vmem:[#allocation5 + $0x40] sm:$0xff]  ;;  %v226_v54 = vunpack.c.l.bf16 %v2745_v44  ;;  %v288_v58 = vunpack.c.l.bf16 %v2751_v48 }
  0x18   :  { %473 = vmatpush.msra.mxu0 %v232_v30  ;;  %492 = vmatpush.msra.mxu1 %v266_v31  ;;  %v2759_v53 = vld [vmem:[#allocation5 + $0xc8] sm:$0xff]  ;;  %v260_v55 = vunpack.c.l.bf16 %v2747_v45  ;;  %v2763_v56 = vld [vmem:[#allocation5 + $0x138] sm:$0xff]  ;;  %v2765_v57 = vld [vmem:[#allocation5 + $0x1c0] sm:$0xff]  ;;  %v322_v59 = vunpack.c.l.bf16 %v2753_v49  ;;  %v224_v62 = vunpack.c.l.bf16 %v2757_v52 }
  0x19   :  { %533 = vmatpush.msra.mxu3 %v328_v35  ;;  %514 = vmatpush.msra.mxu2 %v294_v34  ;;  %v2769_v60 = vld [vmem:[#allocation5 + $0x38] sm:$0xff]  ;;  %v2771_v61 = vld [vmem:[#allocation5 + $0xc0] sm:$0xff]  ;;  %v258_v63 = vunpack.c.l.bf16 %v2759_v53  ;;  %v2775_v3 = vld [vmem:[#allocation5 + $0x130] sm:$0xff]  ;;  %v286_v8 = vunpack.c.l.bf16 %v2763_v56  ;;  %v320_v9 = vunpack.c.l.bf16 %v2765_v57 }
  0x1a   :  { %474 = vmatpush.msra.mxu0 %v230_v38  ;;  %493 = vmatpush.msra.mxu1 %v264_v39  ;;  %v2777_v4 = vld [vmem:[#allocation5 + $0x1b8] sm:$0xff]  ;;  %v2781_v13 = vld [vmem:[#allocation5 + $0x30] sm:$0xff]  ;;  %v222_v18 = vunpack.c.l.bf16 %v2769_v60  ;;  %v256_v19 = vunpack.c.l.bf16 %v2771_v61  ;;  %v2787_v22 = vld [vmem:[#allocation5 + $0x128] sm:$0xff]  ;;  %v284_v26 = vunpack.c.l.bf16 %v2775_v3 }
  0x1b   :  { %534 = vmatpush.msra.mxu3 %v326_v43  ;;  %515 = vmatpush.msra.mxu2 %v292_v42  ;;  %v2783_v14 = vld [vmem:[#allocation5 + $0xb8] sm:$0xff]  ;;  %v2789_v23 = vld [vmem:[#allocation5 + $0x1b0] sm:$0xff]  ;;  %v318_v27 = vunpack.c.l.bf16 %v2777_v4  ;;  %v2793_v30 = vld [vmem:[#allocation5 + $0x28] sm:$0xff]  ;;  %v220_v34 = vunpack.c.l.bf16 %v2781_v13  ;;  %v282_v42 = vunpack.c.l.bf16 %v2787_v22 }
  0x1c   :  { %475 = vmatpush.msra.mxu0 %v228_v46  ;;  %494 = vmatpush.msra.mxu1 %v262_v47  ;;  %v2795_v31 = vld [vmem:[#allocation5 + $0xb0] sm:$0xff]  ;;  %v254_v35 = vunpack.c.l.bf16 %v2783_v14  ;;  %v2799_v38 = vld [vmem:[#allocation5 + $0x120] sm:$0xff]  ;;  %v2801_v39 = vld [vmem:[#allocation5 + $0x1a8] sm:$0xff]  ;;  %v316_v43 = vunpack.c.l.bf16 %v2789_v23 }
  0x1d   :  { %535 = vmatpush.msra.mxu3 %v324_v51  ;;  %516 = vmatpush.msra.mxu2 %v290_v50  ;;  %v2805_v46 = vld [vmem:[#allocation5 + $0x20] sm:$0xff]  ;;  %v2807_v47 = vld [vmem:[#allocation5 + $0xa8] sm:$0xff]  ;;  %v218_v50 = vunpack.c.l.bf16 %v2793_v30  ;;  %v252_v51 = vunpack.c.l.bf16 %v2795_v31 }
  0x1e   :  { %476 = vmatpush.msra.mxu0 %v226_v54  ;;  %495 = vmatpush.msra.mxu1 %v260_v55  ;;  %3730 = vst [vmem:[#allocation12_spill] sm:$0xff] %v2807_v47  ;;  %v2811_v54 = vld [vmem:[#allocation5 + $0x118] sm:$0xff]  ;;  %v2813_v55 = vld [vmem:[#allocation5 + $0x1a0] sm:$0xff] }
  0x1f   :  { %536 = vmatpush.msra.mxu3 %v322_v59  ;;  %517 = vmatpush.msra.mxu2 %v288_v58  ;;  %3731 = vst [vmem:[#allocation13_spill] sm:$0xff] %v2811_v54  ;;  %v280_v58 = vunpack.c.l.bf16 %v2799_v38  ;;  %v314_v59 = vunpack.c.l.bf16 %v2801_v39 }
  0x20   :  { %477 = vmatpush.msra.mxu0 %v224_v62  ;;  %496 = vmatpush.msra.mxu1 %v258_v63  ;;  %3732 = vst [vmem:[#allocation14_spill] sm:$0xff] %v2813_v55  ;;  %v2817_v62 = vld [vmem:[#allocation5 + $0x18] sm:$0xff]  ;;  %v2819_v63 = vld [vmem:[#allocation5 + $0xa0] sm:$0xff] }
  0x21   :  { %537 = vmatpush.msra.mxu3 %v320_v9  ;;  %518 = vmatpush.msra.mxu2 %v286_v8  ;;  %3733 = vst [vmem:[#allocation15_spill] sm:$0xff] %v2817_v62  ;;  %v216_v8 = vunpack.c.l.bf16 %v2805_v46  ;;  %v250_v9 = vunpack.c.l.bf16 %v2807_v47  ;;  %v2837_v47 = vld [vmem:[#allocation5 + $0x190] sm:$0xff] }
  0x22   :  { %478 = vmatpush.msra.mxu0 %v222_v18  ;;  %497 = vmatpush.msra.mxu1 %v256_v19  ;;  %3734 = vst [vmem:[#allocation16_spill] sm:$0xff] %v2819_v63  ;;  %v2823_v18 = vld [vmem:[#allocation5 + $0x110] sm:$0xff]  ;;  %v2825_v19 = vld [vmem:[#allocation5 + $0x198] sm:$0xff] }
  0x23   :  { %538 = vmatpush.msra.mxu3 %v318_v27  ;;  %519 = vmatpush.msra.mxu2 %v284_v26  ;;  %3735 = vst [vmem:[#allocation17_spill] sm:$0xff] %v2823_v18  ;;  %v278_v26 = vunpack.c.l.bf16 %v2811_v54  ;;  %v312_v27 = vunpack.c.l.bf16 %v2813_v55  ;;  %v2841_v55 = vld [vmem:[#allocation5 + $0x8] sm:$0xff]  ;;  %v2843_v54 = vld [vmem:[#allocation5 + $0x90] sm:$0xff] }
  0x24   :  { %479 = vmatpush.msra.mxu0 %v220_v34  ;;  %498 = vmatpush.msra.mxu1 %v254_v35  ;;  %3736 = vst [vmem:[#allocation18_spill] sm:$0xff] %v2825_v19  ;;  %v2829_v34 = vld [vmem:[#allocation5 + $0x10] sm:$0xff]  ;;  %v2831_v35 = vld [vmem:[#allocation5 + $0x98] sm:$0xff] }
  0x25   :  { %539 = vmatpush.msra.mxu3 %v316_v43  ;;  %520 = vmatpush.msra.mxu2 %v282_v42  ;;  %3737 = vst [vmem:[#allocation19_spill] sm:$0xff] %v2829_v34  ;;  %v214_v42 = vunpack.c.l.bf16 %v2817_v62  ;;  %v248_v43 = vunpack.c.l.bf16 %v2819_v63  ;;  %v2847_v63 = vld [vmem:[#allocation5 + $0x100] sm:$0xff]  ;;  %v2849_v62 = vld [vmem:[#allocation5 + $0x188] sm:$0xff] }
  0x26   :  { %480 = vmatpush.msra.mxu0 %v218_v50  ;;  %499 = vmatpush.msra.mxu1 %v252_v51  ;;  %3738 = vst [vmem:[#allocation20_spill] sm:$0xff] %v2831_v35  ;;  %v2835_v50 = vld [vmem:[#allocation5 + $0x108] sm:$0xff]  ;;  %v276_v51 = vunpack.c.l.bf16 %v2823_v18  ;;  %v2855_v18 = vld [vmem:[#allocation5] sm:$0xff] }
  0x27   :  { %540 = vmatpush.msra.mxu3 %v314_v59  ;;  %521 = vmatpush.msra.mxu2 %v280_v58  ;;  %3739 = vst [vmem:[#allocation21_spill] sm:$0xff] %v2835_v50  ;;  %v310_v59 = vunpack.c.l.bf16 %v2825_v19  ;;  %v212_v58 = vunpack.c.l.bf16 %v2829_v34  ;;  %v2853_v19 = vld [vmem:[#allocation5 + $0x378] sm:$0xff]  ;;  %v2861_v34 = vld [vmem:[#allocation5 + $0x180] sm:$0xff] }
  0x28   :  { %481 = vmatpush.msra.mxu0 %v216_v8  ;;  %3740 = vst [vmem:[#allocation22_spill] sm:$0xff] %v2837_v47  ;;  %500 = vmatpush.msra.mxu1 %v250_v9  ;;  %v246_v8 = vunpack.c.l.bf16 %v2831_v35  ;;  %v274_v9 = vunpack.c.l.bf16 %v2835_v50  ;;  %v2859_v35 = vld [vmem:[#allocation5 + $0x88] sm:$0xff]  ;;  %v2867_v50 = vld [vmem:[#allocation5 + $0x370] sm:$0xff] }
  0x29   :  { %541 = vmatpush.msra.mxu3 %v312_v27  ;;  %3741 = vst [vmem:[#allocation23_spill] sm:$0xff] %v2841_v55  ;;  %522 = vmatpush.msra.mxu2 %v278_v26  ;;  %v308_v27 = vunpack.c.l.bf16 %v2837_v47  ;;  %v210_v26 = vunpack.c.l.bf16 %v2841_v55  ;;  %v2865_v47 = vld [vmem:[#allocation5 + $0x278] sm:$0xff]  ;;  %v2873_v55 = vld [vmem:[#allocation5 + $0x80] sm:$0xff] }
  0x2a   :  { %3742 = vst [vmem:[#allocation24_spill] sm:$0xff] %v2843_v54  ;;  %482 = vmatpush.msra.mxu0 %v214_v42  ;;  %501 = vmatpush.msra.mxu1 %v248_v43  ;;  %v244_v42 = vunpack.c.l.bf16 %v2843_v54  ;;  %v272_v43 = vunpack.c.l.bf16 %v2847_v63  ;;  %v2871_v54 = vld [vmem:[#allocation5 + $0x3f8] sm:$0xff] }
  0x2b   :  { %3743 = vst [vmem:[#allocation25_spill] sm:$0xff] %v2847_v63  ;;  %542 = vmatpush.msra.mxu3 %v310_v59  ;;  %523 = vmatpush.msra.mxu2 %v276_v51  ;;  %v306_v59 = vunpack.c.l.bf16 %v2849_v62  ;;  %v430_v51 = vunpack.c.l.bf16 %v2853_v19  ;;  %v2879_v63 = vld [vmem:[#allocation5 + $0x2f8] sm:$0xff] }
  0x2c   :  { %3744 = vst [vmem:[#allocation26_spill] sm:$0xff] %v2849_v62  ;;  %483 = vmatpush.msra.mxu0 %v212_v58  ;;  %502 = vmatpush.msra.mxu1 %v246_v8  ;;  %v208_v58 = vunpack.c.l.bf16 %v2855_v18  ;;  %v242_v8 = vunpack.c.l.bf16 %v2859_v35  ;;  %v2877_v62 = vld [vmem:[#allocation5 + $0x270] sm:$0xff] }
  0x2d   :  { %3745 = vst [vmem:[#allocation27_spill] sm:$0xff] %v2853_v19  ;;  %543 = vmatpush.msra.mxu3 %v308_v27  ;;  %524 = vmatpush.msra.mxu2 %v274_v9  ;;  %v304_v27 = vunpack.c.l.bf16 %v2861_v34  ;;  %v366_v9 = vunpack.c.l.bf16 %v2865_v47  ;;  %v2885_v19 = vld [vmem:[#allocation5 + $0x3f0] sm:$0xff] }
  0x2e   :  { %3746 = vst [vmem:[#allocation28_spill] sm:$0xff] %v2855_v18  ;;  %484 = vmatpush.msra.mxu0 %v210_v26  ;;  %503 = vmatpush.msra.mxu1 %v244_v42  ;;  %v428_v26 = vunpack.c.l.bf16 %v2867_v50  ;;  %v2883_v18 = vld [vmem:[#allocation5 + $0x368] sm:$0xff]  ;;  %v462_v42 = vunpack.c.l.bf16 %v2871_v54 }
  0x2f   :  { %3747 = vst [vmem:[#allocation29_spill] sm:$0xff] %v2859_v35  ;;  %544 = vmatpush.msra.mxu3 %v306_v59  ;;  %525 = vmatpush.msra.mxu2 %v272_v43  ;;  %v240_v59 = vunpack.c.l.bf16 %v2873_v55  ;;  %v2891_v35 = vld [vmem:[#allocation5 + $0x2f0] sm:$0xff]  ;;  %v364_v43 = vunpack.c.l.bf16 %v2877_v62 }
  0x30   :  { %3748 = vst [vmem:[#allocation30_spill] sm:$0xff] %v2861_v34  ;;  %485 = vmatpush.msra.mxu0 %v208_v58  ;;  %504 = vmatpush.msra.mxu1 %v242_v8  ;;  %v2889_v34 = vld [vmem:[#allocation5 + $0x268] sm:$0xff]  ;;  %v398_v58 = vunpack.c.l.bf16 %v2879_v63  ;;  %v460_v8 = vunpack.c.l.bf16 %v2885_v19 }
  0x31   :  { %3749 = vst [vmem:[#allocation31_spill] sm:$0xff] %v2865_v47  ;;  %590 = vmatpush.msrb.mxu2 %v430_v51  ;;  %545 = vmatpush.msra.mxu3 %v304_v27  ;;  %v2897_v47 = vld [vmem:[#allocation5 + $0x3e8] sm:$0xff]  ;;  %v426_v51 = vunpack.c.l.bf16 %v2883_v18  ;;  %v362_v27 = vunpack.c.l.bf16 %v2889_v34 }
  0x32   :  { %3750 = vst [vmem:[#allocation32_spill] sm:$0xff] %v2867_v50  ;;  %550 = vmatpush.msrb.mxu0 %v366_v9  ;;  %v2895_v50 = vld [vmem:[#allocation5 + $0x360] sm:$0xff]  ;;  %505 = vmatpush.msra.mxu1 %v240_v59  ;;  %v396_v9 = vunpack.c.l.bf16 %v2891_v35 }
  0x33   :  { %3751 = vst [vmem:[#allocation33_spill] sm:$0xff] %v2871_v54  ;;  %591 = vmatpush.msrb.mxu2 %v428_v26  ;;  %610 = vmatpush.msrb.mxu3 %v462_v42  ;;  %v2903_v54 = vld [vmem:[#allocation5 + $0x2e8] sm:$0xff]  ;;  %v424_v26 = vunpack.c.l.bf16 %v2895_v50  ;;  %v458_v42 = vunpack.c.l.bf16 %v2897_v47 }
  0x34   :  { %3752 = vst [vmem:[#allocation34_spill] sm:$0xff] %v2873_v55  ;;  %v2901_v55 = vld [vmem:[#allocation5 + $0x260] sm:$0xff]  ;;  %551 = vmatpush.msrb.mxu0 %v364_v43  ;;  %570 = vmatpush.msrb.mxu1 %v398_v58  ;;  %v394_v43 = vunpack.c.l.bf16 %v2903_v54 }
  0x35   :  { %3753 = vst [vmem:[#allocation35_spill] sm:$0xff] %v2877_v62  ;;  %v2909_v62 = vld [vmem:[#allocation5 + $0x3e0] sm:$0xff]  ;;  %592 = vmatpush.msrb.mxu2 %v426_v51  ;;  %611 = vmatpush.msrb.mxu3 %v460_v8  ;;  %v360_v59 = vunpack.c.l.bf16 %v2901_v55 }
  0x36   :  { %3754 = vst [vmem:[#allocation36_spill] sm:$0xff] %v2879_v63  ;;  %v2907_v63 = vld [vmem:[#allocation5 + $0x358] sm:$0xff]  ;;  %552 = vmatpush.msrb.mxu0 %v362_v27  ;;  %571 = vmatpush.msrb.mxu1 %v396_v9  ;;  %v456_v51 = vunpack.c.l.bf16 %v2909_v62 }
  0x37   :  { %3755 = vst [vmem:[#allocation37_spill] sm:$0xff] %v2883_v18  ;;  %v2915_v18 = vld [vmem:[#allocation5 + $0x2e0] sm:$0xff]  ;;  %593 = vmatpush.msrb.mxu2 %v424_v26  ;;  %v422_v58 = vunpack.c.l.bf16 %v2907_v63  ;;  %612 = vmatpush.msrb.mxu3 %v458_v42 }
  0x38   :  { %3756 = vst [vmem:[#allocation38_spill] sm:$0xff] %v2885_v19  ;;  %v2913_v19 = vld [vmem:[#allocation5 + $0x258] sm:$0xff]  ;;  %553 = vmatpush.msrb.mxu0 %v360_v59  ;;  %v392_v27 = vunpack.c.l.bf16 %v2915_v18  ;;  %572 = vmatpush.msrb.mxu1 %v394_v43 }
  0x39   :  { %3757 = vst [vmem:[#allocation39_spill] sm:$0xff] %v2889_v34  ;;  %v2921_v34 = vld [vmem:[#allocation5 + $0x3d8] sm:$0xff]  ;;  %v358_v8 = vunpack.c.l.bf16 %v2913_v19  ;;  %594 = vmatpush.msrb.mxu2 %v422_v58  ;;  %613 = vmatpush.msrb.mxu3 %v456_v51 }
  0x3a   :  { %3758 = vst [vmem:[#allocation40_spill] sm:$0xff] %v2891_v35  ;;  %v2919_v35 = vld [vmem:[#allocation5 + $0x350] sm:$0xff]  ;;  %v454_v26 = vunpack.c.l.bf16 %v2921_v34  ;;  %573 = vmatpush.msrb.mxu1 %v392_v27 }
  0x3b   :  { %3759 = vst [vmem:[#allocation41_spill] sm:$0xff] %v2895_v50  ;;  %v2927_v50 = vld [vmem:[#allocation5 + $0x2d8] sm:$0xff]  ;;  %v420_v9 = vunpack.c.l.bf16 %v2919_v35  ;;  %554 = vmatpush.msrb.mxu0 %v358_v8 }
  0x3c   :  { %3760 = vst [vmem:[#allocation42_spill] sm:$0xff] %v2897_v47  ;;  %v2925_v47 = vld [vmem:[#allocation5 + $0x250] sm:$0xff]  ;;  %v390_v59 = vunpack.c.l.bf16 %v2927_v50  ;;  %614 = vmatpush.msrb.mxu3 %v454_v26 }
  0x3d   :  { %3761 = vst [vmem:[#allocation43_spill] sm:$0xff] %v2901_v55  ;;  %v2933_v55 = vld [vmem:[#allocation5 + $0x3d0] sm:$0xff]  ;;  %v356_v42 = vunpack.c.l.bf16 %v2925_v47  ;;  %595 = vmatpush.msrb.mxu2 %v420_v9 }
  0x3e   :  { %3762 = vst [vmem:[#allocation44_spill] sm:$0xff] %v2903_v54  ;;  %v2931_v54 = vld [vmem:[#allocation5 + $0x348] sm:$0xff]  ;;  %v452_v58 = vunpack.c.l.bf16 %v2933_v55  ;;  %574 = vmatpush.msrb.mxu1 %v390_v59 }
  0x3f   :  { %3763 = vst [vmem:[#allocation45_spill] sm:$0xff] %v2907_v63  ;;  %v2939_v63 = vld [vmem:[#allocation5 + $0x2d0] sm:$0xff]  ;;  %v418_v43 = vunpack.c.l.bf16 %v2931_v54  ;;  %555 = vmatpush.msrb.mxu0 %v356_v42 }
  0x40   :  { %3764 = vst [vmem:[#allocation46_spill] sm:$0xff] %v2909_v62  ;;  %v2937_v62 = vld [vmem:[#allocation5 + $0x248] sm:$0xff]  ;;  %v388_v8 = vunpack.c.l.bf16 %v2939_v63  ;;  %615 = vmatpush.msrb.mxu3 %v452_v58 }
  0x41   :  { %3765 = vst [vmem:[#allocation47_spill] sm:$0xff] %v2913_v19  ;;  %v2945_v19 = vld [vmem:[#allocation5 + $0x3c8] sm:$0xff]  ;;  %v354_v51 = vunpack.c.l.bf16 %v2937_v62  ;;  %596 = vmatpush.msrb.mxu2 %v418_v43 }
  0x42   :  { %3766 = vst [vmem:[#allocation48_spill] sm:$0xff] %v2915_v18  ;;  %v2943_v18 = vld [vmem:[#allocation5 + $0x340] sm:$0xff]  ;;  %v450_v9 = vunpack.c.l.bf16 %v2945_v19  ;;  %575 = vmatpush.msrb.mxu1 %v388_v8 }
  0x43   :  { %3767 = vst [vmem:[#allocation49_spill] sm:$0xff] %v2919_v35  ;;  %v2951_v35 = vld [vmem:[#allocation5 + $0x2c8] sm:$0xff]  ;;  %v416_v27 = vunpack.c.l.bf16 %v2943_v18  ;;  %556 = vmatpush.msrb.mxu0 %v354_v51 }
  0x44   :  { %3768 = vst [vmem:[#allocation50_spill] sm:$0xff] %v2921_v34  ;;  %v2949_v34 = vld [vmem:[#allocation5 + $0x240] sm:$0xff]  ;;  %v386_v42 = vunpack.c.l.bf16 %v2951_v35  ;;  %616 = vmatpush.msrb.mxu3 %v450_v9 }
  0x45   :  { %3769 = vst [vmem:[#allocation51_spill] sm:$0xff] %v2925_v47  ;;  %v2957_v47 = vld [vmem:[#allocation5 + $0x3c0] sm:$0xff]  ;;  %v352_v26 = vunpack.c.l.bf16 %v2949_v34  ;;  %597 = vmatpush.msrb.mxu2 %v416_v27 }
  0x46   :  { %3770 = vst [vmem:[#allocation52_spill] sm:$0xff] %v2927_v50  ;;  %v2955_v50 = vld [vmem:[#allocation5 + $0x338] sm:$0xff]  ;;  %v448_v43 = vunpack.c.l.bf16 %v2957_v47  ;;  %576 = vmatpush.msrb.mxu1 %v386_v42 }
  0x47   :  { %3771 = vst [vmem:[#allocation53_spill] sm:$0xff] %v2931_v54  ;;  %v2963_v54 = vld [vmem:[#allocation5 + $0x2c0] sm:$0xff]  ;;  %v414_v59 = vunpack.c.l.bf16 %v2955_v50  ;;  %557 = vmatpush.msrb.mxu0 %v352_v26 }
  0x48   :  { %3772 = vst [vmem:[#allocation54_spill] sm:$0xff] %v2933_v55  ;;  %v2961_v55 = vld [vmem:[#allocation5 + $0x238] sm:$0xff]  ;;  %v384_v51 = vunpack.c.l.bf16 %v2963_v54  ;;  %617 = vmatpush.msrb.mxu3 %v448_v43 }
  0x49   :  { %3773 = vst [vmem:[#allocation55_spill] sm:$0xff] %v2937_v62  ;;  %v2969_v62 = vld [vmem:[#allocation5 + $0x3b8] sm:$0xff]  ;;  %v350_v58 = vunpack.c.l.bf16 %v2961_v55  ;;  %598 = vmatpush.msrb.mxu2 %v414_v59 }
  0x4a   :  { %3774 = vst [vmem:[#allocation56_spill] sm:$0xff] %v2939_v63  ;;  %v2967_v63 = vld [vmem:[#allocation5 + $0x330] sm:$0xff]  ;;  %v446_v27 = vunpack.c.l.bf16 %v2969_v62  ;;  %577 = vmatpush.msrb.mxu1 %v384_v51 }
  0x4b   :  { %3775 = vst [vmem:[#allocation57_spill] sm:$0xff] %v2943_v18  ;;  %v2975_v18 = vld [vmem:[#allocation5 + $0x2b8] sm:$0xff]  ;;  %v412_v8 = vunpack.c.l.bf16 %v2967_v63  ;;  %558 = vmatpush.msrb.mxu0 %v350_v58 }
  0x4c   :  { %3776 = vst [vmem:[#allocation58_spill] sm:$0xff] %v2945_v19  ;;  %v2973_v19 = vld [vmem:[#allocation5 + $0x230] sm:$0xff]  ;;  %v382_v26 = vunpack.c.l.bf16 %v2975_v18  ;;  %618 = vmatpush.msrb.mxu3 %v446_v27 }
  0x4d   :  { %3777 = vst [vmem:[#allocation59_spill] sm:$0xff] %v2949_v34  ;;  %v2981_v34 = vld [vmem:[#allocation5 + $0x3b0] sm:$0xff]  ;;  %v348_v9 = vunpack.c.l.bf16 %v2973_v19  ;;  %599 = vmatpush.msrb.mxu2 %v412_v8 }
  0x4e   :  { %3778 = vst [vmem:[#allocation60_spill] sm:$0xff] %v2951_v35  ;;  %v2979_v35 = vld [vmem:[#allocation5 + $0x328] sm:$0xff]  ;;  %v444_v59 = vunpack.c.l.bf16 %v2981_v34  ;;  %578 = vmatpush.msrb.mxu1 %v382_v26 }
  0x4f   :  { %3779 = vst [vmem:[#allocation61_spill] sm:$0xff] %v2955_v50  ;;  %v2987_v50 = vld [vmem:[#allocation5 + $0x2b0] sm:$0xff]  ;;  %v410_v42 = vunpack.c.l.bf16 %v2979_v35  ;;  %559 = vmatpush.msrb.mxu0 %v348_v9 }
  0x50   :  { %3780 = vst [vmem:[#allocation62_spill] sm:$0xff] %v2957_v47  ;;  %v2985_v47 = vld [vmem:[#allocation5 + $0x228] sm:$0xff]  ;;  %v380_v58 = vunpack.c.l.bf16 %v2987_v50  ;;  %619 = vmatpush.msrb.mxu3 %v444_v59 }
  0x51   :  { %3781 = vst [vmem:[#allocation63_spill] sm:$0xff] %v2961_v55  ;;  %v2993_v55 = vld [vmem:[#allocation5 + $0x3a8] sm:$0xff]  ;;  %v346_v43 = vunpack.c.l.bf16 %v2985_v47  ;;  %600 = vmatpush.msrb.mxu2 %v410_v42 }
  0x52   :  { %3782 = vst [vmem:[#allocation64_spill] sm:$0xff] %v2963_v54  ;;  %v2991_v54 = vld [vmem:[#allocation5 + $0x320] sm:$0xff]  ;;  %v442_v8 = vunpack.c.l.bf16 %v2993_v55  ;;  %579 = vmatpush.msrb.mxu1 %v380_v58 }
  0x53   :  { %3783 = vst [vmem:[#allocation65_spill] sm:$0xff] %v2967_v63  ;;  %v2999_v63 = vld [vmem:[#allocation5 + $0x2a8] sm:$0xff]  ;;  %v408_v51 = vunpack.c.l.bf16 %v2991_v54  ;;  %560 = vmatpush.msrb.mxu0 %v346_v43 }
  0x54   :  { %3784 = vst [vmem:[#allocation66_spill] sm:$0xff] %v2969_v62  ;;  %v2997_v62 = vld [vmem:[#allocation5 + $0x220] sm:$0xff]  ;;  %v378_v9 = vunpack.c.l.bf16 %v2999_v63  ;;  %620 = vmatpush.msrb.mxu3 %v442_v8 }
  0x55   :  { %3785 = vst [vmem:[#allocation67_spill] sm:$0xff] %v2973_v19  ;;  %v3005_v19 = vld [vmem:[#allocation5 + $0x3a0] sm:$0xff]  ;;  %v344_v27 = vunpack.c.l.bf16 %v2997_v62  ;;  %601 = vmatpush.msrb.mxu2 %v408_v51 }
  0x56   :  { %3786 = vst [vmem:[#allocation68_spill] sm:$0xff] %v2975_v18  ;;  %v3003_v18 = vld [vmem:[#allocation5 + $0x318] sm:$0xff]  ;;  %v440_v42 = vunpack.c.l.bf16 %v3005_v19  ;;  %580 = vmatpush.msrb.mxu1 %v378_v9 }
  0x57   :  { %3787 = vst [vmem:[#allocation69_spill] sm:$0xff] %v2979_v35  ;;  %v3011_v35 = vld [vmem:[#allocation5 + $0x2a0] sm:$0xff]  ;;  %v406_v26 = vunpack.c.l.bf16 %v3003_v18  ;;  %561 = vmatpush.msrb.mxu0 %v344_v27 }
  0x58   :  { %3788 = vst [vmem:[#allocation70_spill] sm:$0xff] %v2981_v34  ;;  %v3009_v34 = vld [vmem:[#allocation5 + $0x218] sm:$0xff]  ;;  %v376_v43 = vunpack.c.l.bf16 %v3011_v35  ;;  %621 = vmatpush.msrb.mxu3 %v440_v42 }
  0x59   :  { %3789 = vst [vmem:[#allocation71_spill] sm:$0xff] %v2985_v47  ;;  %v3017_v47 = vld [vmem:[#allocation5 + $0x398] sm:$0xff]  ;;  %v342_v59 = vunpack.c.l.bf16 %v3009_v34  ;;  %602 = vmatpush.msrb.mxu2 %v406_v26 }
  0x5a   :  { %3790 = vst [vmem:[#allocation72_spill] sm:$0xff] %v2987_v50  ;;  %v3015_v50 = vld [vmem:[#allocation5 + $0x310] sm:$0xff]  ;;  %v438_v51 = vunpack.c.l.bf16 %v3017_v47  ;;  %581 = vmatpush.msrb.mxu1 %v376_v43 }
  0x5b   :  { %3791 = vst [vmem:[#allocation73_spill] sm:$0xff] %v2991_v54  ;;  %v3023_v54 = vld [vmem:[#allocation5 + $0x298] sm:$0xff]  ;;  %v404_v58 = vunpack.c.l.bf16 %v3015_v50  ;;  %562 = vmatpush.msrb.mxu0 %v342_v59 }
  0x5c   :  { %3792 = vst [vmem:[#allocation74_spill] sm:$0xff] %v2993_v55  ;;  %v3021_v55 = vld [vmem:[#allocation5 + $0x210] sm:$0xff]  ;;  %v374_v27 = vunpack.c.l.bf16 %v3023_v54  ;;  %622 = vmatpush.msrb.mxu3 %v438_v51 }
  0x5d   :  { %3793 = vst [vmem:[#allocation75_spill] sm:$0xff] %v2997_v62  ;;  %v3029_v62 = vld [vmem:[#allocation5 + $0x390] sm:$0xff]  ;;  %v340_v8 = vunpack.c.l.bf16 %v3021_v55  ;;  %603 = vmatpush.msrb.mxu2 %v404_v58 }
  0x5e   :  { %3794 = vst [vmem:[#allocation76_spill] sm:$0xff] %v2999_v63  ;;  %v3027_v63 = vld [vmem:[#allocation5 + $0x308] sm:$0xff]  ;;  %v436_v26 = vunpack.c.l.bf16 %v3029_v62  ;;  %582 = vmatpush.msrb.mxu1 %v374_v27  ;;  %v239_v27 = vunpack.c.h.bf16 %v2679_v1  ;;  %v271_v1 = vunpack.c.h.bf16 %v2689_v7  ;;  %v331_v7 = vunpack.c.h.bf16 %v2705_v17 }
  0x5f   :  { %3795 = vst [vmem:[#allocation77_spill] sm:$0xff] %v3003_v18  ;;  %v3035_v18 = vld [vmem:[#allocation5 + $0x290] sm:$0xff]  ;;  %v402_v9 = vunpack.c.l.bf16 %v3027_v63  ;;  %563 = vmatpush.msrb.mxu0 %v340_v8  ;;  %v265_v17 = vunpack.c.h.bf16 %v2723_v29  ;;  %v291_v29 = vunpack.c.h.bf16 %v2739_v40  ;;  %v225_v40 = vunpack.c.h.bf16 %v2757_v52 }
  0x60   :  { %3796 = vst [vmem:[#allocation78_spill] sm:$0xff] %v3005_v19  ;;  %v3033_v19 = vld [vmem:[#allocation5 + $0x208] sm:$0xff]  ;;  %v372_v59 = vunpack.c.l.bf16 %v3035_v18  ;;  %623 = vmatpush.msrb.mxu3 %v436_v26  ;;  %v3068_v26 = vld [vmem:[#allocation2 + $0x18] sm:$0xff]  ;;  %v319_v52 = vunpack.c.h.bf16 %v2777_v4  ;;  %v281_v4 = vunpack.c.h.bf16 %v2799_v38 }
  0x61   :  { %3797 = vst [vmem:[#allocation79_spill] sm:$0xff] %v3009_v34  ;;  %v3041_v34 = vld [vmem:[#allocation5 + $0x388] sm:$0xff]  ;;  %v338_v42 = vunpack.c.l.bf16 %v3033_v19  ;;  %604 = vmatpush.msrb.mxu2 %v402_v9  ;;  %v301_v9 = vunpack.c.h.bf16 %v2681_v2  ;;  %v299_v2 = vunpack.c.h.bf16 %v2693_v10  ;;  %546 = vmatmul.f32.vlgmr.msra.gmra.mxu3 %v3068_v26  ;;  %v233_v10 = vunpack.c.h.bf16 %v2709_v20  ;;  %v3094_v20 = vld [vmem:[#allocation2 + $0x20] sm:$0xff]  ;;  %v3810_v38 = vld [vmem:[#allocation16_spill] sm:$0xff] }
  0x62   :  { %3798 = vst [vmem:[#allocation80_spill] sm:$0xff] %v3011_v35  ;;  %v3039_v35 = vld [vmem:[#allocation5 + $0x300] sm:$0xff]  ;;  %v434_v58 = vunpack.c.l.bf16 %v3041_v34  ;;  %583 = vmatpush.msrb.mxu1 %v372_v59 }
  0x63   :  { %3799 = vst [vmem:[#allocation81_spill] sm:$0xff] %v3015_v50  ;;  %v3047_v50 = vld [vmem:[#allocation5 + $0x288] sm:$0xff]  ;;  %v400_v43 = vunpack.c.l.bf16 %v3039_v35  ;;  %564 = vmatpush.msrb.mxu0 %v338_v42  ;;  %v335_v42 = vunpack.c.h.bf16 %v2685_v5  ;;  %v333_v5 = vunpack.c.h.bf16 %v2695_v11  ;;  %v3087_v11 = vld [vmem:[#allocation2 + $0x30] sm:$0xff] }
  0x64   :  { %3800 = vst [vmem:[#allocation82_spill] sm:$0xff] %v3017_v47  ;;  %v3045_v47 = vld [vmem:[#allocation5 + $0x200] sm:$0xff]  ;;  %v370_v8 = vunpack.c.l.bf16 %v3047_v50  ;;  %624 = vmatpush.msrb.mxu3 %v434_v58  ;;  %v3077_v58 = vld [vmem:[#allocation2 + $0x8] sm:$0xff] }
  0x65   :  { %3801 = vst [vmem:[#allocation83_spill] sm:$0xff] %v3021_v55  ;;  %v303_v55 = vunpack.c.h.bf16 %v2677_v0  ;;  %v336_v51 = vunpack.c.l.bf16 %v3045_v47  ;;  %605 = vmatpush.msrb.mxu2 %v400_v43  ;;  %v237_v43 = vunpack.c.h.bf16 %v2687_v6  ;;  %v269_v6 = vunpack.c.h.bf16 %v2701_v15  ;;  %506 = vmatmul.f32.vlgmr.msra.gmra.mxu1 %v3077_v58 }
  0x66   :  { %3802 = vst [vmem:[#allocation84_spill] sm:$0xff] %v3023_v54  ;;  %v3051_v54 = vld [vmem:[#allocation5 + $0x380] sm:$0xff]  ;;  %584 = vmatpush.msrb.mxu1 %v370_v8  ;;  %v267_v8 = vunpack.c.h.bf16 %v2711_v21  ;;  %v329_v15 = vunpack.c.h.bf16 %v2717_v25  ;;  %v3096_v21 = vld [vmem:[#allocation2 + $0x38] sm:$0xff]  ;;  %v229_v25 = vunpack.c.h.bf16 %v2733_v36  ;;  %v261_v36 = vunpack.c.h.bf16 %v2747_v45 }
  0x67   :  { %3803 = vst [vmem:[#allocation85_spill] sm:$0xff] %v3029_v62  ;;  %v3056_v62 = vld [vmem:[#allocation2 + $0x10] sm:$0xff]  ;;  %v432_v0 = vunpack.c.l.bf16 %v3051_v54  ;;  %565 = vmatpush.msrb.mxu0 %v336_v51  ;;  %v297_v51 = vunpack.c.h.bf16 %v2703_v16  ;;  %v231_v16 = vunpack.c.h.bf16 %v2721_v28  ;;  %v263_v28 = vunpack.c.h.bf16 %v2735_v37 }
  0x68   :  { %3804 = vst [vmem:[#allocation86_spill] sm:$0xff] %v3033_v19  ;;  %v3060_v19 = vld [vmem:[#allocation5 + $0x280] sm:$0xff]  ;;  %526 = vmatmul.f32.vlgmr.msra.gmra.mxu2 %v3056_v62  ;;  %v323_v37 = vunpack.c.h.bf16 %v2753_v49  ;;  %v223_v45 = vunpack.c.h.bf16 %v2769_v60  ;;  %v285_v49 = vunpack.c.h.bf16 %v2775_v3  ;;  %v317_v60 = vunpack.c.h.bf16 %v2789_v23 }
  0x69   :  { %3805 = vst [vmem:[#allocation87_spill] sm:$0xff] %v3041_v34  ;;  %v3066_v34 = vld [vmem:[#allocation2] sm:$0xff]  ;;  %670 = vmatpush.msra.mxu2 %v303_v55  ;;  %v368_v59 = vunpack.c.l.bf16 %v3060_v19  ;;  %625 = vmatpush.msrb.mxu3 %v432_v0  ;;  %v235_v55 = vunpack.c.h.bf16 %v2697_v12  ;;  %v295_v12 = vunpack.c.h.bf16 %v2715_v24  ;;  %v293_v0 = vunpack.c.h.bf16 %v2727_v32 }
  0x6a   :  { %486 = vmatmul.f32.vlgmr.msra.gmra.mxu0 %v3066_v34  ;;  %v327_v24 = vunpack.c.h.bf16 %v2729_v33  ;;  %626 = vmatmul.f32.vlgmr.msrb.gmra.mxu3 %v3096_v21  ;;  %v325_v32 = vunpack.c.h.bf16 %v2741_v41  ;;  %v227_v33 = vunpack.c.h.bf16 %v2745_v44  ;;  %v287_v41 = vunpack.c.h.bf16 %v2763_v56 }
  0x6b   :  { %630 = vmatpush.msra.mxu0 %v239_v27  ;;  %671 = vmatpush.msra.mxu2 %v301_v9  ;;  %v3105_v27 = vld [vmem:[#allocation2 + $0x28] sm:$0xff]  ;;  %v289_v9 = vunpack.c.h.bf16 %v2751_v48  ;;  %v321_v44 = vunpack.c.h.bf16 %v2765_v57  ;;  %v257_v48 = vunpack.c.h.bf16 %v2771_v61  ;;  %v255_v56 = vunpack.c.h.bf16 %v2783_v14 }
  0x6c   :  { %690 = vmatpush.msra.mxu3 %v335_v42  ;;  %585 = vmatpush.msrb.mxu1 %v368_v59  ;;  %v259_v42 = vunpack.c.h.bf16 %v2759_v53  ;;  %v221_v53 = vunpack.c.h.bf16 %v2781_v13  ;;  %v283_v57 = vunpack.c.h.bf16 %v2787_v22  ;;  %v219_v61 = vunpack.c.h.bf16 %v2793_v30  ;;  %v3806_v22 = vld [vmem:[#allocation12_spill] sm:$0xff]  ;;  %v3808_v30 = vld [vmem:[#allocation14_spill] sm:$0xff] }
  0x6d   :  { %631 = vmatpush.msra.mxu0 %v237_v43  ;;  %672 = vmatpush.msra.mxu2 %v299_v2  ;;  %v253_v3 = vunpack.c.h.bf16 %v2795_v31  ;;  %v315_v13 = vunpack.c.h.bf16 %v2801_v39  ;;  %v217_v14 = vunpack.c.h.bf16 %v2805_v46  ;;  %v251_v59 = vunpack.c.h.bf16 %v3806_v22  ;;  %v3807_v43 = vld [vmem:[#allocation13_spill] sm:$0xff]  ;;  %v3809_v2 = vld [vmem:[#allocation15_spill] sm:$0xff]  ;;  %v3812_v46 = vld [vmem:[#allocation18_spill] sm:$0xff] }
  0x6e   :  { %650 = vmatpush.msra.mxu1 %v271_v1  ;;  %691 = vmatpush.msra.mxu3 %v333_v5  ;;  %v279_v23 = vunpack.c.h.bf16 %v3807_v43  ;;  %v313_v1 = vunpack.c.h.bf16 %v3808_v30  ;;  %v215_v31 = vunpack.c.h.bf16 %v3809_v2  ;;  %v249_v5 = vunpack.c.h.bf16 %v3810_v38 }
  0x6f   :  { %632 = vmatpush.msra.mxu0 %v235_v55  ;;  %673 = vmatpush.msra.mxu2 %v297_v51  ;;  %v3811_v55 = vld [vmem:[#allocation17_spill] sm:$0xff]  ;;  %v3813_v51 = vld [vmem:[#allocation19_spill] sm:$0xff] }
  0x70   :  { %651 = vmatpush.msra.mxu1 %v269_v6  ;;  %692 = vmatpush.msra.mxu3 %v331_v7  ;;  %v277_v39 = vunpack.c.h.bf16 %v3811_v55  ;;  %v311_v6 = vunpack.c.h.bf16 %v3812_v46  ;;  %v213_v7 = vunpack.c.h.bf16 %v3813_v51 }
  0x71   :  { %606 = vmatmul.f32.vlgmr.msrb.gmra.mxu2 %v3087_v11  ;;  %633 = vmatpush.msra.mxu0 %v233_v10  ;;  %v3814_v10 = vld [vmem:[#allocation20_spill] sm:$0xff] }
  0x72   :  { %652 = vmatpush.msra.mxu1 %v267_v8  ;;  %674 = vmatpush.msra.mxu2 %v295_v12  ;;  %v247_v8 = vunpack.c.h.bf16 %v3814_v10  ;;  %v3815_v12 = vld [vmem:[#allocation21_spill] sm:$0xff] }
  0x73   :  { %693 = vmatpush.msra.mxu3 %v329_v15  ;;  %566 = vmatmul.f32.vlgmr.msrb.gmra.mxu0 %v3094_v20  ;;  %v275_v15 = vunpack.c.h.bf16 %v3815_v12 }
  0x74   :  { %634 = vmatpush.msra.mxu0 %v231_v16  ;;  %653 = vmatpush.msra.mxu1 %v265_v17  ;;  %v3816_v16 = vld [vmem:[#allocation22_spill] sm:$0xff] }
  0x75   :  { %675 = vmatpush.msra.mxu2 %v293_v0  ;;  %694 = vmatpush.msra.mxu3 %v327_v24  ;;  %v309_v17 = vunpack.c.h.bf16 %v3816_v16  ;;  %v3817_v0 = vld [vmem:[#allocation23_spill] sm:$0xff] }
  0x76   :  { %586 = vmatmul.f32.vlgmr.msrb.gmra.mxu1 %v3105_v27  ;;  %635 = vmatpush.msra.mxu0 %v229_v25  ;;  %v211_v24 = vunpack.c.h.bf16 %v3817_v0  ;;  %v3818_v25 = vld [vmem:[#allocation24_spill] sm:$0xff] }
  0x77   :  { %654 = vmatpush.msra.mxu1 %v263_v28  ;;  %676 = vmatpush.msra.mxu2 %v291_v29  ;;  %v245_v28 = vunpack.c.h.bf16 %v3818_v25  ;;  %v3819_v29 = vld [vmem:[#allocation25_spill] sm:$0xff] }
  0x78   :  { %695 = vmatpush.msra.mxu3 %v325_v32  ;;  %636 = vmatpush.msra.mxu0 %v227_v33  ;;  %v273_v32 = vunpack.c.h.bf16 %v3819_v29  ;;  %v3820_v33 = vld [vmem:[#allocation26_spill] sm:$0xff] }
  0x79   :  { %655 = vmatpush.msra.mxu1 %v261_v36  ;;  %677 = vmatpush.msra.mxu2 %v289_v9  ;;  %v307_v36 = vunpack.c.h.bf16 %v3820_v33  ;;  %v3821_v9 = vld [vmem:[#allocation27_spill] sm:$0xff] }
  0x7a   :  { %696 = vmatpush.msra.mxu3 %v323_v37  ;;  %637 = vmatpush.msra.mxu0 %v225_v40  ;;  %v431_v37 = vunpack.c.h.bf16 %v3821_v9  ;;  %v3822_v40 = vld [vmem:[#allocation28_spill] sm:$0xff] }
  0x7b   :  { %656 = vmatpush.msra.mxu1 %v259_v42  ;;  %678 = vmatpush.msra.mxu2 %v287_v41  ;;  %v209_v42 = vunpack.c.h.bf16 %v3822_v40  ;;  %v3823_v41 = vld [vmem:[#allocation29_spill] sm:$0xff] }
  0x7c   :  { %697 = vmatpush.msra.mxu3 %v321_v44  ;;  %638 = vmatpush.msra.mxu0 %v223_v45  ;;  %v243_v44 = vunpack.c.h.bf16 %v3823_v41  ;;  %v3824_v45 = vld [vmem:[#allocation30_spill] sm:$0xff] }
  0x7d   :  { %657 = vmatpush.msra.mxu1 %v257_v48  ;;  %679 = vmatpush.msra.mxu2 %v285_v49  ;;  %v305_v48 = vunpack.c.h.bf16 %v3824_v45  ;;  %v3825_v49 = vld [vmem:[#allocation31_spill] sm:$0xff] }
  0x7e   :  { %698 = vmatpush.msra.mxu3 %v319_v52  ;;  %639 = vmatpush.msra.mxu0 %v221_v53  ;;  %v367_v52 = vunpack.c.h.bf16 %v3825_v49  ;;  %v3826_v53 = vld [vmem:[#allocation32_spill] sm:$0xff] }
  0x7f   :  { %658 = vmatpush.msra.mxu1 %v255_v56  ;;  %680 = vmatpush.msra.mxu2 %v283_v57  ;;  %v429_v56 = vunpack.c.h.bf16 %v3826_v53  ;;  %v3827_v57 = vld [vmem:[#allocation33_spill] sm:$0xff] }
  0x80   :  { %699 = vmatpush.msra.mxu3 %v317_v60  ;;  %640 = vmatpush.msra.mxu0 %v219_v61  ;;  %v463_v60 = vunpack.c.h.bf16 %v3827_v57  ;;  %v3828_v61 = vld [vmem:[#allocation34_spill] sm:$0xff] }
  0x81   :  { %659 = vmatpush.msra.mxu1 %v253_v3  ;;  %681 = vmatpush.msra.mxu2 %v281_v4  ;;  %v241_v3 = vunpack.c.h.bf16 %v3828_v61  ;;  %v3829_v4 = vld [vmem:[#allocation35_spill] sm:$0xff] }
  0x82   :  { %700 = vmatpush.msra.mxu3 %v315_v13  ;;  %641 = vmatpush.msra.mxu0 %v217_v14  ;;  %v365_v13 = vunpack.c.h.bf16 %v3829_v4  ;;  %v3830_v14 = vld [vmem:[#allocation36_spill] sm:$0xff] }
  0x83   :  { %660 = vmatpush.msra.mxu1 %v251_v59  ;;  %682 = vmatpush.msra.mxu2 %v279_v23  ;;  %v399_v22 = vunpack.c.h.bf16 %v3830_v14  ;;  %v3831_v59 = vld [vmem:[#allocation37_spill] sm:$0xff]  ;;  %v3832_v23 = vld [vmem:[#allocation38_spill] sm:$0xff] }
  0x84   :  { %701 = vmatpush.msra.mxu3 %v313_v1  ;;  %642 = vmatpush.msra.mxu0 %v215_v31  ;;  %v427_v43 = vunpack.c.h.bf16 %v3831_v59  ;;  %v461_v30 = vunpack.c.h.bf16 %v3832_v23  ;;  %v3833_v1 = vld [vmem:[#allocation39_spill] sm:$0xff]  ;;  %v3834_v31 = vld [vmem:[#allocation40_spill] sm:$0xff] }
  0x85   :  { %661 = vmatpush.msra.mxu1 %v249_v5  ;;  %683 = vmatpush.msra.mxu2 %v277_v39  ;;  %v363_v2 = vunpack.c.h.bf16 %v3833_v1  ;;  %v397_v38 = vunpack.c.h.bf16 %v3834_v31  ;;  %v3835_v5 = vld [vmem:[#allocation41_spill] sm:$0xff]  ;;  %v3836_v39 = vld [vmem:[#allocation42_spill] sm:$0xff] }
  0x86   :  { %702 = vmatpush.msra.mxu3 %v311_v6  ;;  %643 = vmatpush.msra.mxu0 %v213_v7  ;;  %v425_v55 = vunpack.c.h.bf16 %v3835_v5  ;;  %v459_v46 = vunpack.c.h.bf16 %v3836_v39  ;;  %v3837_v6 = vld [vmem:[#allocation43_spill] sm:$0xff]  ;;  %v3838_v7 = vld [vmem:[#allocation44_spill] sm:$0xff] }
  0x87   :  { %662 = vmatpush.msra.mxu1 %v247_v8  ;;  %684 = vmatpush.msra.mxu2 %v275_v15  ;;  %v361_v51 = vunpack.c.h.bf16 %v3837_v6  ;;  %v395_v10 = vunpack.c.h.bf16 %v3838_v7  ;;  %v3839_v8 = vld [vmem:[#allocation45_spill] sm:$0xff]  ;;  %v3840_v15 = vld [vmem:[#allocation46_spill] sm:$0xff] }
  0x88   :  { %703 = vmatpush.msra.mxu3 %v309_v17  ;;  %644 = vmatpush.msra.mxu0 %v211_v24  ;;  %v423_v12 = vunpack.c.h.bf16 %v3839_v8  ;;  %v457_v16 = vunpack.c.h.bf16 %v3840_v15  ;;  %v3841_v17 = vld [vmem:[#allocation47_spill] sm:$0xff]  ;;  %v3842_v24 = vld [vmem:[#allocation48_spill] sm:$0xff] }
  0x89   :  { %663 = vmatpush.msra.mxu1 %v245_v28  ;;  %685 = vmatpush.msra.mxu2 %v273_v32  ;;  %v359_v0 = vunpack.c.h.bf16 %v3841_v17  ;;  %v393_v25 = vunpack.c.h.bf16 %v3842_v24  ;;  %v3843_v28 = vld [vmem:[#allocation49_spill] sm:$0xff]  ;;  %v3844_v32 = vld [vmem:[#allocation50_spill] sm:$0xff] }
  0x8a   :  { %704 = vmatpush.msra.mxu3 %v307_v36  ;;  %645 = vmatpush.msra.mxu0 %v209_v42  ;;  %v421_v29 = vunpack.c.h.bf16 %v3843_v28  ;;  %v455_v33 = vunpack.c.h.bf16 %v3844_v32  ;;  %v3845_v36 = vld [vmem:[#allocation51_spill] sm:$0xff]  ;;  %v3847_v42 = vld [vmem:[#allocation53_spill] sm:$0xff] }
  0x8b   :  { %750 = vmatpush.msrb.mxu2 %v431_v37  ;;  %664 = vmatpush.msra.mxu1 %v243_v44  ;;  %v357_v9 = vunpack.c.h.bf16 %v3845_v36  ;;  %v3846_v37 = vld [vmem:[#allocation52_spill] sm:$0xff]  ;;  %v419_v41 = vunpack.c.h.bf16 %v3847_v42  ;;  %v3848_v44 = vld [vmem:[#allocation54_spill] sm:$0xff] }
  0x8c   :  { %705 = vmatpush.msra.mxu3 %v305_v48  ;;  %710 = vmatpush.msrb.mxu0 %v367_v52  ;;  %v391_v40 = vunpack.c.h.bf16 %v3846_v37  ;;  %v453_v45 = vunpack.c.h.bf16 %v3848_v44  ;;  %v3849_v48 = vld [vmem:[#allocation55_spill] sm:$0xff]  ;;  %v3850_v52 = vld [vmem:[#allocation56_spill] sm:$0xff] }
  0x8d   :  { %751 = vmatpush.msrb.mxu2 %v429_v56  ;;  %665 = vmatpush.msra.mxu1 %v241_v3  ;;  %v355_v49 = vunpack.c.h.bf16 %v3849_v48  ;;  %v389_v53 = vunpack.c.h.bf16 %v3850_v52  ;;  %v3851_v56 = vld [vmem:[#allocation57_spill] sm:$0xff]  ;;  %v3853_v3 = vld [vmem:[#allocation59_spill] sm:$0xff] }
  0x8e   :  { %770 = vmatpush.msrb.mxu3 %v463_v60  ;;  %711 = vmatpush.msrb.mxu0 %v365_v13  ;;  %v417_v57 = vunpack.c.h.bf16 %v3851_v56  ;;  %v3852_v60 = vld [vmem:[#allocation58_spill] sm:$0xff]  ;;  %v353_v4 = vunpack.c.h.bf16 %v3853_v3  ;;  %v3854_v13 = vld [vmem:[#allocation60_spill] sm:$0xff] }
  0x8f   :  { %730 = vmatpush.msrb.mxu1 %v399_v22  ;;  %752 = vmatpush.msrb.mxu2 %v427_v43  ;;  %v451_v61 = vunpack.c.h.bf16 %v3852_v60  ;;  %v387_v14 = vunpack.c.h.bf16 %v3854_v13  ;;  %v3855_v22 = vld [vmem:[#allocation61_spill] sm:$0xff]  ;;  %v3856_v43 = vld [vmem:[#allocation62_spill] sm:$0xff] }
  0x90   :  { %771 = vmatpush.msrb.mxu3 %v461_v30  ;;  %712 = vmatpush.msrb.mxu0 %v363_v2  ;;  %v415_v59 = vunpack.c.h.bf16 %v3855_v22  ;;  %v449_v23 = vunpack.c.h.bf16 %v3856_v43  ;;  %v3857_v30 = vld [vmem:[#allocation63_spill] sm:$0xff]  ;;  %v3858_v2 = vld [vmem:[#allocation64_spill] sm:$0xff]  ;;  %v3879_v22 = vld [vmem:[#allocation85_spill] sm:$0xff] }
  0x91   :  { %731 = vmatpush.msrb.mxu1 %v397_v38  ;;  %753 = vmatpush.msrb.mxu2 %v425_v55  ;;  %v351_v1 = vunpack.c.h.bf16 %v3857_v30  ;;  %v385_v31 = vunpack.c.h.bf16 %v3858_v2  ;;  %v3859_v38 = vld [vmem:[#allocation65_spill] sm:$0xff]  ;;  %v3860_v55 = vld [vmem:[#allocation66_spill] sm:$0xff]  ;;  %v401_v30 = vunpack.c.h.bf16 %v3039_v35  ;;  %v369_v35 = vunpack.c.h.bf16 %v3060_v19 }
  0x92   :  { %772 = vmatpush.msrb.mxu3 %v459_v46  ;;  %713 = vmatpush.msrb.mxu0 %v361_v51  ;;  %v413_v5 = vunpack.c.h.bf16 %v3859_v38  ;;  %v447_v39 = vunpack.c.h.bf16 %v3860_v55  ;;  %v3861_v46 = vld [vmem:[#allocation67_spill] sm:$0xff]  ;;  %v3862_v51 = vld [vmem:[#allocation68_spill] sm:$0xff] }
  0x93   :  { %732 = vmatpush.msrb.mxu1 %v395_v10  ;;  %754 = vmatpush.msrb.mxu2 %v423_v12  ;;  %v349_v6 = vunpack.c.h.bf16 %v3861_v46  ;;  %v383_v7 = vunpack.c.h.bf16 %v3862_v51  ;;  %v3863_v10 = vld [vmem:[#allocation69_spill] sm:$0xff]  ;;  %v3864_v12 = vld [vmem:[#allocation70_spill] sm:$0xff]  ;;  %v2369_v46 = vld [vmem:[%s3650_s4 + $0x10] sm:$0xff]  }
  0x94   :  { %773 = vmatpush.msrb.mxu3 %v457_v16  ;;  %714 = vmatpush.msrb.mxu0 %v359_v0  ;;  %v411_v8 = vunpack.c.h.bf16 %v3863_v10  ;;  %v445_v15 = vunpack.c.h.bf16 %v3864_v12  ;;  %v3865_v16 = vld [vmem:[#allocation71_spill] sm:$0xff]  ;;  %v3866_v0 = vld [vmem:[#allocation72_spill] sm:$0xff]  ;;  %v1930_v51 = vunpack.c.l.bf16 %v2369_v46  ;;  %v1921_v12 = vld [vmem:[%s3650_s4] sm:$0xff]  }
  0x95   :  { %733 = vmatpush.msrb.mxu1 %v393_v25  ;;  %755 = vmatpush.msrb.mxu2 %v421_v29  ;;  %v347_v17 = vunpack.c.h.bf16 %v3865_v16  ;;  %v381_v24 = vunpack.c.h.bf16 %v3866_v0  ;;  %v3867_v25 = vld [vmem:[#allocation73_spill] sm:$0xff]  ;;  %v3868_v29 = vld [vmem:[#allocation74_spill] sm:$0xff]  ;;  %v1922_v16 = vunpack.c.l.bf16 %v1921_v12  ;;  %v2381_v0 = vld [vmem:[%s3650_s4 + $0x70] sm:$0xff]  }
  0x96   :  { %774 = vmatpush.msrb.mxu3 %v455_v33  ;;  %715 = vmatpush.msrb.mxu0 %v357_v9  ;;  %v409_v28 = vunpack.c.h.bf16 %v3867_v25  ;;  %v443_v32 = vunpack.c.h.bf16 %v3868_v29  ;;  %v3869_v33 = vld [vmem:[#allocation75_spill] sm:$0xff]  ;;  %v3870_v9 = vld [vmem:[#allocation76_spill] sm:$0xff]  ;;  %v464_v29 = vld [vmem:[#allocation7] ss:$8 sm:$0x3] }
  0x97   :  { %734 = vmatpush.msrb.mxu1 %v391_v40  ;;  %756 = vmatpush.msrb.mxu2 %v419_v41  ;;  %v345_v36 = vunpack.c.h.bf16 %v3869_v33  ;;  %v379_v37 = vunpack.c.h.bf16 %v3870_v9  ;;  %v3871_v40 = vld [vmem:[#allocation77_spill] sm:$0xff]  ;;  %v3872_v41 = vld [vmem:[#allocation78_spill] sm:$0xff]  ;;  %v1978_v33 = vunpack.c.l.bf16 %v2381_v0 }
  0x98   :  { %775 = vmatpush.msrb.mxu3 %v453_v45  ;;  %716 = vmatpush.msrb.mxu0 %v355_v49  ;;  %v407_v42 = vunpack.c.h.bf16 %v3871_v40  ;;  %v441_v44 = vunpack.c.h.bf16 %v3872_v41  ;;  %v3873_v45 = vld [vmem:[#allocation79_spill] sm:$0xff]  ;;  %v3874_v49 = vld [vmem:[#allocation80_spill] sm:$0xff] }
  0x99   :  { %735 = vmatpush.msrb.mxu1 %v389_v53  ;;  %757 = vmatpush.msrb.mxu2 %v417_v57  ;;  %v343_v48 = vunpack.c.h.bf16 %v3873_v45  ;;  %v377_v52 = vunpack.c.h.bf16 %v3874_v49  ;;  %v3875_v53 = vld [vmem:[#allocation81_spill] sm:$0xff]  ;;  %v3876_v57 = vld [vmem:[#allocation82_spill] sm:$0xff] }
  0x9a   :  { %776 = vmatpush.msrb.mxu3 %v451_v61  ;;  %717 = vmatpush.msrb.mxu0 %v353_v4  ;;  %v405_v56 = vunpack.c.h.bf16 %v3875_v53  ;;  %v439_v60 = vunpack.c.h.bf16 %v3876_v57  ;;  %v3877_v61 = vld [vmem:[#allocation83_spill] sm:$0xff]  ;;  %v3878_v4 = vld [vmem:[#allocation84_spill] sm:$0xff] }
  0x9b   :  { %736 = vmatpush.msrb.mxu1 %v387_v14  ;;  %758 = vmatpush.msrb.mxu2 %v415_v59  ;;  %v341_v3 = vunpack.c.h.bf16 %v3877_v61  ;;  %v375_v13 = vunpack.c.h.bf16 %v3878_v4  ;;  %v403_v14 = vunpack.c.h.bf16 %v3027_v63  ;;  %v3880_v59 = vld [vmem:[#allocation86_spill] sm:$0xff]  ;;  %v337_v63 = vunpack.c.h.bf16 %v3045_v47 }
  0x9c   :  { %777 = vmatpush.msrb.mxu3 %v449_v23  ;;  %718 = vmatpush.msrb.mxu0 %v351_v1  ;;  %v339_v43 = vunpack.c.h.bf16 %v3880_v59  ;;  %v373_v23 = vunpack.c.h.bf16 %v3035_v18  ;;  %v3881_v1 = vld [vmem:[#allocation87_spill] sm:$0xff]  ;;  %v433_v18 = vunpack.c.h.bf16 %v3051_v54 }
  0x9d   :  { %737 = vmatpush.msrb.mxu1 %v385_v31  ;;  %759 = vmatpush.msrb.mxu2 %v413_v5  ;;  %v435_v2 = vunpack.c.h.bf16 %v3881_v1  ;;  %v2370_v5 = vld [vmem:[%s3650_s4 + $0x18] sm:$0xff]   ;;  %v2377_v1 = vld [vmem:[%s3650_s4 + $0x50] sm:$0xff]  }
  0x9e   :  { %778 = vmatpush.msrb.mxu3 %v447_v39  ;;  %719 = vmatpush.msrb.mxu0 %v349_v6  ;;  %v1935_v55 = vunpack.c.h.bf16 %v2370_v5  ;;  %v1934_v39 = vunpack.c.l.bf16 %v2370_v5  ;;  %v1931_v6 = vunpack.c.h.bf16 %v2369_v46 }
  0x9f   :  { %738 = vmatpush.msrb.mxu1 %v383_v7  ;;  %760 = vmatpush.msrb.mxu2 %v411_v8  ;;  %v2368_v7 = vld [vmem:[%s3650_s4 + $0x8] sm:$0xff]  }
  0xa0   :  { %779 = vmatpush.msrb.mxu3 %v445_v15  ;;  %720 = vmatpush.msrb.mxu0 %v347_v17  ;;  %v1927_v10 = vunpack.c.h.bf16 %v2368_v7  ;;  %v1926_v8 = vunpack.c.l.bf16 %v2368_v7  ;;  %v1923_v15 = vunpack.c.h.bf16 %v1921_v12  ;;  %v2382_v17 = vld [vmem:[%s3650_s4 + $0x78] sm:$0xff]  }
  0xa1   :  { %739 = vmatpush.msrb.mxu1 %v381_v24  ;;  %761 = vmatpush.msrb.mxu2 %v409_v28  ;;  %v1983_v24 = vunpack.c.h.bf16 %v2382_v17  ;;  %v1982_v25 = vunpack.c.l.bf16 %v2382_v17  ;;  %v1979_v28 = vunpack.c.h.bf16 %v2381_v0  ;;  %v2390_v12 = vld [vmem:[%s3650_s4 + $0x138] sm:$0xff]  }
  0xa2   :  { %780 = vmatpush.msrb.mxu3 %v443_v32  ;;  %686 = vmatmul.f32.vlgmr.msra.gmra.mxu2 %v3056_v62  ;;  %v437_v62 = vunpack.c.h.bf16 %v3879_v22  ;;  %v2380_v32 = vld [vmem:[%s3650_s4 + $0x68] sm:$0xff]   ;;  %v2379_v22 = vld [vmem:[%s3650_s4 + $0x60] sm:$0xff]   ;;  %v2014_v17 = vunpack.c.l.bf16 %v2390_v12 }
  0xa3   :  { %721 = vmatpush.msrb.mxu0 %v345_v36  ;;  %740 = vmatpush.msrb.mxu1 %v379_v37  ;;  %v466_v36 = vperm.slane %v464_v29, 0  ;;  %v1975_v9 = vunpack.c.h.bf16 %v2380_v32  ;;  %v1974_v37 = vunpack.c.l.bf16 %v2380_v32  ;;  %v1970_v59 = vunpack.c.l.bf16 %v2379_v22 }
  0xa4   :  { %762 = vmatpush.msrb.mxu2 %v407_v42  ;;  %781 = vmatpush.msrb.mxu3 %v441_v44 }
  0xa5   :  { %646 = vmatmul.f32.vlgmr.msra.gmra.mxu0 %v3066_v34  ;;  %706 = vmatmul.f32.vlgmr.msra.gmra.mxu3 %v3068_v26  ;;  %v371_v34 = vunpack.c.h.bf16 %v3047_v50  ;;  %v2374_v26 = vld [vmem:[%s3650_s4 + $0x38] sm:$0xff]   ;;  %v2373_v50 = vld [vmem:[%s3650_s4 + $0x30] sm:$0xff]  }
  0xa6   :  { %722 = vmatpush.msrb.mxu0 %v343_v48  ;;  %741 = vmatpush.msrb.mxu1 %v377_v52  ;;  %v1951_v47 = vunpack.c.h.bf16 %v2374_v26  ;;  %v1950_v54 = vunpack.c.l.bf16 %v2374_v26  ;;  %v1947_v19 = vunpack.c.h.bf16 %v2373_v50 }
  0xa7   :  { %763 = vmatpush.msrb.mxu2 %v405_v56  ;;  %782 = vmatpush.msrb.mxu3 %v439_v60 }
  0xa8   :  { %666 = vmatmul.f32.vlgmr.msra.gmra.mxu1 %v3077_v58  ;;  %723 = vmatpush.msrb.mxu0 %v341_v3  ;;  %v2372_v58 = vld [vmem:[%s3650_s4 + $0x28] sm:$0xff]  }
  0xa9   :  { %742 = vmatpush.msrb.mxu1 %v375_v13  ;;  %764 = vmatpush.msrb.mxu2 %v403_v14  ;;  %v1943_v31 = vunpack.c.h.bf16 %v2372_v58  ;;  %v1942_v38 = vunpack.c.l.bf16 %v2372_v58 }
  0xaa   :  { %783 = vmatpush.msrb.mxu3 %v437_v62  ;;  %724 = vmatpush.msrb.mxu0 %v339_v43  ;;  %v1971_v62 = vunpack.c.h.bf16 %v2379_v22  ;;  %v2378_v43 = vld [vmem:[%s3650_s4 + $0x58] sm:$0xff]  }
  0xab   :  { %743 = vmatpush.msrb.mxu1 %v373_v23  ;;  %765 = vmatpush.msrb.mxu2 %v401_v30  ;;  %v1967_v23 = vunpack.c.h.bf16 %v2378_v43  ;;  %v1966_v30 = vunpack.c.l.bf16 %v2378_v43 }
  0xac   :  { %784 = vmatpush.msrb.mxu3 %v435_v2  ;;  %766 = vmatmul.f32.vlgmr.msrb.gmra.mxu2 %v3087_v11  ;;  %v1946_v11 = vunpack.c.l.bf16 %v2373_v50  ;;  %v1963_v2 = vunpack.c.h.bf16 %v2377_v1 }
  0xad   :  { %725 = vmatpush.msrb.mxu0 %v337_v63  ;;  %744 = vmatpush.msrb.mxu1 %v371_v34  ;;  %v1962_v63 = vunpack.c.l.bf16 %v2377_v1  ;;  %v2376_v34 = vld [vmem:[%s3650_s4 + $0x48] sm:$0xff]   ;;  %v1009_v1 = vld [vmem:[%s3646_s0 + $0x18] sm:$0xff] }
  0xae   :  { %785 = vmatpush.msrb.mxu3 %v433_v18  ;;  %726 = vmatmul.f32.vlgmr.msrb.gmra.mxu0 %v3094_v20  ;;  %v2371_v20 = vld [vmem:[%s3650_s4 + $0x20] sm:$0xff]   ;;  %v1959_v26 = vunpack.c.h.bf16 %v2376_v34  ;;  %v1958_v18 = vunpack.c.l.bf16 %v2376_v34 }
  0xaf   :  { %786 = vmatmul.f32.vlgmr.msrb.gmra.mxu3 %v3096_v21  ;;  %745 = vmatpush.msrb.mxu1 %v369_v35  ;;  %v1939_v21 = vunpack.c.h.bf16 %v2371_v20  ;;  %v2375_v35 = vld [vmem:[%s3650_s4 + $0x40] sm:$0xff]  }
  0xb0   :  { %746 = vmatmul.f32.vlgmr.msrb.gmra.mxu1 %v3105_v27  ;;  %857 = vmatpush.msra.mxu0 %v1951_v47  ;;  %v1938_v27 = vunpack.c.l.bf16 %v2371_v20  ;;  %v1955_v47 = vunpack.c.h.bf16 %v2375_v35  ;;  %v1954_v50 = vunpack.c.l.bf16 %v2375_v35 }
  0xb1   :  { %877 = vmatpush.msra.mxu1 %v1983_v24  ;;  %v2388_v24 = vld [vmem:[%s3650_s4 + $0x128] sm:$0xff]  }
  0xb2   :  { %858 = vmatpush.msra.mxu0 %v1950_v54  ;;  %v467_v54 = vperm.slane %v464_v29, 1  ;;  %v2387_v29 = vld [vmem:[%s3650_s4 + $0x120] sm:$0xff]   ;;  %v2006_v32 = vunpack.c.l.bf16 %v2388_v24 }
  0xb3   :  { %878 = vmatpush.msra.mxu1 %v1982_v25 }
  0xb4   :  { %859 = vmatpush.msra.mxu0 %v1947_v19 }
  0xb5   :  { %879 = vmatpush.msra.mxu1 %v1979_v28  ;;  %v2007_v28 = vunpack.c.h.bf16 %v2388_v24 }
  0xb6   :  { %860 = vmatpush.msra.mxu0 %v1946_v11 }
  0xb7   :  { %880 = vmatpush.msra.mxu1 %v1978_v33  ;;  %v2003_v33 = vunpack.c.h.bf16 %v2387_v29 }
  0xb8   :  { %861 = vmatpush.msra.mxu0 %v1943_v31 }
  0xb9   :  { %881 = vmatpush.msra.mxu1 %v1975_v9  ;;  %v2002_v9 = vunpack.c.l.bf16 %v2387_v29 }
  0xba   :  { %862 = vmatpush.msra.mxu0 %v1942_v38 }
  0xbb   :  { %882 = vmatpush.msra.mxu1 %v1974_v37 }
  0xbc   :  { %863 = vmatpush.msra.mxu0 %v1939_v21 }
  0xbd   :  { %883 = vmatpush.msra.mxu1 %v1971_v62 }
  0xbe   :  { %864 = vmatpush.msra.mxu0 %v1938_v27 }
  0xbf   :  { %884 = vmatpush.msra.mxu1 %v1970_v59 }
  0xc0   :  { %865 = vmatpush.msra.mxu0 %v1935_v55 }
  0xc1   :  { %885 = vmatpush.msra.mxu1 %v1967_v23 }
  0xc2   :  { %866 = vmatpush.msra.mxu0 %v1934_v39 }
  0xc3   :  { %886 = vmatpush.msra.mxu1 %v1966_v30  ;;  %v1043_v30 = vld [vmem:[#allocation5 + $0x428] sm:$0xff] }
  0xc4   :  { %867 = vmatpush.msra.mxu0 %v1931_v6  ;;  %v1057_v35 = vunpack.c.h.bf16 %v1043_v30 }
  0xc5   :  { %887 = vmatpush.msra.mxu1 %v1963_v2 }
  0xc6   :  { %868 = vmatpush.msra.mxu0 %v1930_v51 }
  0xc7   :  { %888 = vmatpush.msra.mxu1 %v1962_v63  ;;  %v1056_v63 = vunpack.c.l.bf16 %v1043_v30 }
  0xc8   :  { %869 = vmatpush.msra.mxu0 %v1927_v10 }
  0xc9   :  { %889 = vmatpush.msra.mxu1 %v1959_v26 }
  0xca   :  { %870 = vmatpush.msra.mxu0 %v1926_v8 }
  0xcb   :  { %890 = vmatpush.msra.mxu1 %v1958_v18  ;;  %v1042_v18 = vld [vmem:[#allocation5 + $0x420] sm:$0xff] }
  0xcc   :  { %871 = vmatpush.msra.mxu0 %v1923_v15  ;;  %v2389_v15 = vld [vmem:[%s3650_s4 + $0x130] sm:$0xff]  }
  0xcd   :  { %891 = vmatpush.msra.mxu1 %v1955_v47  ;;  %v2011_v0 = vunpack.c.h.bf16 %v2389_v15  ;;  %v2010_v25 = vunpack.c.l.bf16 %v2389_v15  ;;  %v1041_v47 = vld [vmem:[#allocation5 + $0x418] sm:$0xff] }
  0xce   :  { %872 = vmatpush.msra.mxu0 %v1922_v16  ;;  %v2015_v16 = vunpack.c.h.bf16 %v2390_v12  ;;  %v1013_v15 = vld [vmem:[%s3646_s0 + $0x38] sm:$0xff] }
  0xcf   :  { %892 = vmatpush.msra.mxu1 %v1954_v50  ;;  %v1040_v50 = vld [vmem:[#allocation5 + $0x410] sm:$0xff] }
  0xd0   :  { %931 = vmatpush.msra.mxu2 %v2015_v16  ;;  %v1051_v24 = vunpack.c.h.bf16 %v1040_v50 }
  0xd2   :  { %932 = vmatpush.msra.mxu2 %v2014_v17 }
  0xd4   :  { %933 = vmatpush.msra.mxu2 %v2011_v0 }
  0xd6   :  { %934 = vmatpush.msra.mxu2 %v2010_v25 }
  0xd8   :  { %935 = vmatpush.msra.mxu2 %v2007_v28 }
  0xda   :  { %936 = vmatpush.msra.mxu2 %v2006_v32 }
  0xdc   :  { %937 = vmatpush.msra.mxu2 %v2003_v33 }
  0xde   :  { %938 = vmatpush.msra.mxu2 %v2002_v9 }
  0xe2   :  { %v507_v41 = vpop.f32.mrf.mxu1 }
  0xe4   :  { %v547_v49 = vpop.f32.mrf.mxu3 }
  0xe7   :  { %v487_v40 = vpop.f32.mrf.mxu0 }
  0xe8   :  { %v488_v42 = vadd.f32 %v487_v40, %v466_v36  ;;  %v2386_v36 = vld [vmem:[%s3650_s4 + $0x118] sm:$0xff]   ;;  %v2385_v40 = vld [vmem:[%s3650_s4 + $0x110] sm:$0xff]  }
  0xe9   :  { %v1999_v37 = vunpack.c.h.bf16 %v2386_v36 }
  0xea   :  { %v508_v45 = vadd.f32 %v507_v41, %v488_v42  ;;  %v1998_v42 = vunpack.c.l.bf16 %v2386_v36  ;;  %v1995_v41 = vunpack.c.h.bf16 %v2385_v40  ;;  %v2405_v36 = vld [vmem:[%s3650_s4 + $0xb8] sm:$0xff]  }
  0xeb   :  { %v527_v44 = vpop.f32.mrf.mxu2  ;;  %939 = vmatpush.msra.mxu2 %v1999_v37  ;;  %v1028_v37 = vsel %vm1014_vm0, %v1013_v15, 0.0  ;;  %v2411_v15 = vld [vmem:[%s3650_s4 + $0xe8] sm:$0xff]  }
  0xec   :  { %v528_v48 = vadd.f32 %v527_v44, %v508_v45  ;;  %v2384_v44 = vld [vmem:[%s3650_s4 + $0x108] sm:$0xff]   ;;  %v1994_v45 = vunpack.c.l.bf16 %v2385_v40 }
  0xed   :  { %v627_v4 = vpop.f32.mrf.mxu3  ;;  %940 = vmatpush.msra.mxu2 %v1998_v42 }
  0xee   :  { %v548_v52 = vadd.f32 %v547_v49, %v528_v48  ;;  %v1991_v48 = vunpack.c.h.bf16 %v2384_v44  ;;  %v1990_v49 = vunpack.c.l.bf16 %v2384_v44  ;;  %v2395_v44 = vld [vmem:[%s3651_s5 + $0x28] sm:$0xff]  }
  0xef   :  { %941 = vmatpush.msra.mxu2 %v1995_v41 }
  0xf0   :  { %v567_v53 = vpop.f32.mrf.mxu0 }
  0xf1   :  { %v568_v56 = vadd.f32 %v567_v53, %v548_v52  ;;  %942 = vmatpush.msra.mxu2 %v1994_v45  ;;  %v2383_v52 = vld [vmem:[%s3650_s4 + $0x100] sm:$0xff]   ;;  %v1045_v53 = vld [vmem:[#allocation5 + $0x438] sm:$0xff]  ;;  %v2404_v45 = vld [vmem:[%s3650_s4 + $0xb0] sm:$0xff]  }
  0xf2   :  { %v1986_v62 = vunpack.c.l.bf16 %v2383_v52  ;;  %v1061_v43 = vunpack.c.h.bf16 %v1045_v53 }
  0xf3   :  { %v587_v57 = vpop.f32.mrf.mxu1  ;;  %943 = vmatpush.msra.mxu2 %v1991_v48 }
  0xf4   :  { %v607_v60 = vpop.f32.mrf.mxu2  ;;  %v588_v61 = vadd.f32 %v587_v57, %v568_v56  ;;  %v1006_v56 = vld [vmem:[%s3646_s0] sm:$0xff]  ;;  %v1987_v57 = vunpack.c.h.bf16 %v2383_v52  ;;  %1100 = vmatpush.msrb.mxu1 %v1061_v43  ;;  %v2079_v52 = vunpack.c.h.bf16 %v2405_v36  ;;  %v2393_v43 = vld [vmem:[%s3651_s5 + $0x18] sm:$0xff]  }
  0xf5   :  { %944 = vmatpush.msra.mxu2 %v1990_v49 }
  0xf6   :  { %v608_v3 = vadd.f32 %v607_v60, %v588_v61  ;;  %v1060_v60 = vunpack.c.l.bf16 %v1045_v53  ;;  %v1007_v61 = vld [vmem:[%s3646_s0 + $0x8] sm:$0xff] }
  0xf7   :  { %v1016_v22 = vsel %vm1014_vm0, %v1007_v61, 0.0  ;;  %945 = vmatpush.msra.mxu2 %v1987_v57  ;;  %v2075_v61 = vunpack.c.h.bf16 %v2404_v45 }
  0xf8   :  { %v628_v13 = vadd.f32 %v627_v4, %v608_v3  ;;  %v1015_v3 = vsel %vm1014_vm0, %v1006_v56, 0.0  ;;  %v2620_v4 = vmov 8.0   ;;  %1080 = vmatpush.msrb.mxu0 %v1060_v60  ;;  %v2078_v56 = vunpack.c.l.bf16 %v2405_v36 }
  0xf9   :  { %2493 = vrcp.f32 %v2620_v4  ;;  %v1017_v23 = vadd.f32 %v1016_v22, %v1015_v3  ;;  %946 = vmatpush.msra.mxu2 %v1986_v62  ;;  %v2039_v60 = vunpack.c.h.bf16 %v2395_v44  ;;  %v2394_v4 = vld [vmem:[%s3651_s5 + $0x20] sm:$0xff]   ;;  %v2074_v22 = vunpack.c.l.bf16 %v2404_v45 }
  0xfa   :  { %v790_v14 = vmax.f32 %v628_v13, 0.0  ;;  %v1044_v13 = vld [vmem:[#allocation5 + $0x430] sm:$0xff]  ;;  %v2035_v62 = vunpack.c.h.bf16 %v2394_v4  ;;  %v2034_v30 = vunpack.c.l.bf16 %v2394_v4 }
  0xfb   :  { %v1058_v59 = vunpack.c.l.bf16 %v1044_v13  ;;  %v1059_v34 = vunpack.c.h.bf16 %v1044_v13  ;;  %1179 = vmatpush.msrb.mxu2 %v2079_v52  ;;  %v2403_v13 = vld [vmem:[%s3650_s4 + $0xa8] sm:$0xff]  }
  0xfc   :  { %873 = vmatmul.f32.vlgmr.msra.gmra.mxu0 %v790_v14  ;;  %v1008_v14 = vld [vmem:[%s3646_s0 + $0x10] sm:$0xff] }
  0xfd   :  { %v1018_v2 = vsel %vm1014_vm0, %v1008_v14, 0.0  ;;  %1081 = vmatpush.msrb.mxu0 %v1058_v59  ;;  %1101 = vmatpush.msrb.mxu1 %v1059_v34  ;;  %v2038_v14 = vunpack.c.l.bf16 %v2395_v44  ;;  %v2071_v59 = vunpack.c.h.bf16 %v2403_v13  ;;  %v2392_v34 = vld [vmem:[%s3651_s5 + $0x10] sm:$0xff]  }
  0xfe   :  { %v1019_v26 = vadd.f32 %v1018_v2, %v1017_v23  ;;  %1180 = vmatpush.msrb.mxu2 %v2078_v56  ;;  %v2402_v23 = vld [vmem:[%s3650_s4 + $0xa0] sm:$0xff]   ;;  %v2031_v2 = vunpack.c.h.bf16 %v2393_v43 }
  0xff   :  { %1082 = vmatpush.msrb.mxu0 %v1056_v63  ;;  %1102 = vmatpush.msrb.mxu1 %v1057_v35  ;;  %v2067_v63 = vunpack.c.h.bf16 %v2402_v23  ;;  %v2066_v35 = vunpack.c.l.bf16 %v2402_v23  ;;  %v2398_v56 = vld [vmem:[%s3650_s4 + $0x80] sm:$0xff]   ;;  %v2420_v23 = vld [vmem:[%s3650_s4 + $0x170] sm:$0xff]  }
 0x100   :  { %1181 = vmatpush.msrb.mxu2 %v2075_v61  ;;  %v2050_v4 = vunpack.c.l.bf16 %v2398_v56 }
 0x102   :  { %1182 = vmatpush.msrb.mxu2 %v2074_v22 }
 0x104   :  { %1183 = vmatpush.msrb.mxu2 %v2071_v59 }
 0x122   :  { %v647_v19 = vpop.f32.mrf.mxu0 }
 0x123   :  { %v648_v58 = vadd.f32 %v647_v19, %v467_v54  ;;  %v1020_v54 = vsel %vm1014_vm0, %v1009_v1, 0.0  ;;  %v2494_v19 = vpop.eup %2493  ;;  %v2070_v1 = vunpack.c.l.bf16 %v2403_v13 }
 0x124   :  { %vm1035_vm1 = vweird.f32 %v2494_v19 }
 0x125   :  { %v667_v11 = vpop.f32.mrf.mxu1  ;;  %v687_v31 = vpop.f32.mrf.mxu2  ;;  %1184 = vmatpush.msrb.mxu2 %v2070_v1 }
 0x126   :  { %v668_v38 = vadd.f32 %v667_v11, %v648_v58  ;;  %v1054_v58 = vunpack.c.l.bf16 %v1042_v18  ;;  %v1052_v11 = vunpack.c.l.bf16 %v1041_v47 }
 0x127   :  { %1185 = vmatpush.msrb.mxu2 %v2067_v63  ;;  %v2419_v63 = vld [vmem:[%s3650_s4 + $0x168] sm:$0xff]  }
 0x128   :  { %v688_v20 = vadd.f32 %v687_v31, %v668_v38  ;;  %v707_v21 = vpop.f32.mrf.mxu3  ;;  %v1010_v31 = vld [vmem:[%s3646_s0 + $0x20] sm:$0xff]  ;;  %v1055_v38 = vunpack.c.h.bf16 %v1042_v18  ;;  %1083 = vmatpush.msrb.mxu0 %v1054_v58  ;;  %v2030_v18 = vunpack.c.l.bf16 %v2393_v43  ;;  %v2391_v58 = vld [vmem:[%s3651_s5 + $0x8] sm:$0xff]   ;;  %v2421_v43 = vld [vmem:[%s3650_s4 + $0x178] sm:$0xff]  }
 0x129   :  { %1186 = vmatpush.msrb.mxu2 %v2066_v35  ;;  %v2142_v1 = vunpack.c.l.bf16 %v2421_v43  ;;  %v2134_v35 = vunpack.c.l.bf16 %v2419_v63 }
 0x12a   :  { %v708_v27 = vadd.f32 %v707_v21, %v688_v20  ;;  %v1039_v20 = vld [vmem:[#allocation5 + $0x408] sm:$0xff]  ;;  %1084 = vmatpush.msrb.mxu0 %v1052_v11  ;;  %1103 = vmatpush.msrb.mxu1 %v1055_v38 }
 0x12b   :  { %v727_v5 = vpop.f32.mrf.mxu0  ;;  %v1011_v21 = vld [vmem:[%s3646_s0 + $0x28] sm:$0xff]  ;;  %v1048_v12 = vunpack.c.l.bf16 %v1039_v20  ;;  %v1049_v9 = vunpack.c.h.bf16 %v1039_v20 }
 0x12c   :  { %v728_v55 = vadd.f32 %v727_v5, %v708_v27  ;;  %v1050_v27 = vunpack.c.l.bf16 %v1040_v50  ;;  %v1012_v5 = vld [vmem:[%s3646_s0 + $0x30] sm:$0xff] }
 0x12d   :  { %v747_v39 = vpop.f32.mrf.mxu1  ;;  %v1026_v25 = vsel %vm1014_vm0, %v1012_v5, 0.0  ;;  %v2017_v5 = vld [vmem:[%s3651_s5] sm:$0xff]  }
 0x12e   :  { %v748_v46 = vadd.f32 %v747_v39, %v728_v55  ;;  %v1021_v55 = vadd.f32 %v1020_v54, %v1019_v26  ;;  %v1022_v39 = vsel %vm1014_vm0, %v1010_v31, 0.0  ;;  %1085 = vmatpush.msrb.mxu0 %v1050_v27  ;;  %v2401_v26 = vld [vmem:[%s3650_s4 + $0x98] sm:$0xff]   ;;  %v2027_v54 = vunpack.c.h.bf16 %v2392_v34 }
 0x12f   :  { %v767_v6 = vpop.f32.mrf.mxu2  ;;  %v2026_v31 = vunpack.c.l.bf16 %v2392_v34  ;;  %v2062_v38 = vunpack.c.l.bf16 %v2401_v26  ;;  %v2023_v27 = vunpack.c.h.bf16 %v2391_v58  ;;  %v2138_v34 = vunpack.c.l.bf16 %v2420_v23 }
 0x130   :  { %v768_v51 = vadd.f32 %v767_v6, %v748_v46  ;;  %v2397_v46 = vld [vmem:[%s3651_s5 + $0x38] sm:$0xff]   ;;  %v1053_v6 = vunpack.c.h.bf16 %v1041_v47  ;;  %v1023_v16 = vadd.f32 %v1022_v39, %v1021_v55  ;;  %1086 = vmatpush.msrb.mxu0 %v1048_v12  ;;  %v856_v47 = vld [vmem:[#allocation7 + $0x1] ss:$0 sm:$0xff]  ;;  %v2022_v39 = vunpack.c.l.bf16 %v2391_v58  ;;  %v930_v58 = vld [vmem:[#allocation7 + $0x2] ss:$0 sm:$0xff] }
 0x131   :  { %v2047_v17 = vunpack.c.h.bf16 %v2397_v46  ;;  %v2046_v0 = vunpack.c.l.bf16 %v2397_v46  ;;  %v2019_v46 = vunpack.c.h.bf16 %v2017_v5 }
 0x132   :  { %v787_v7 = vpop.f32.mrf.mxu3  ;;  %1104 = vmatpush.msrb.mxu1 %v1053_v6  ;;  %v2413_v6 = vld [vmem:[%s3650_s4 + $0xf8] sm:$0xff]  }
 0x133   :  { %v788_v10 = vadd.f32 %v787_v7, %v768_v51  ;;  %v1038_v51 = vld [vmem:[#allocation5 + $0x400] sm:$0xff]  ;;  %v1024_v7 = vsel %vm1014_vm0, %v1011_v21, 0.0  ;;  %985 = vmatpush.msra.mxu3 %v2047_v17  ;;  %v2103_v17 = vunpack.c.h.bf16 %v2411_v15 }
 0x134   :  { %v1046_v29 = vunpack.c.l.bf16 %v1038_v51  ;;  %v1025_v32 = vadd.f32 %v1024_v7, %v1023_v16  ;;  %1105 = vmatpush.msrb.mxu1 %v1051_v24  ;;  %v1047_v49 = vunpack.c.h.bf16 %v1038_v51  ;;  %v2018_v51 = vunpack.c.l.bf16 %v2017_v5 }
 0x135   :  { %v791_v8 = vmax.f32 %v788_v10, 0.0  ;;  %v1031_v10 = vmul.f32 8.0, %v2494_v19  ;;  %986 = vmatpush.msra.mxu3 %v2046_v0  ;;  %v2111_v7 = vunpack.c.h.bf16 %v2413_v6  ;;  %v2410_v0 = vld [vmem:[%s3650_s4 + $0xe0] sm:$0xff]   ;;  %v2102_v24 = vunpack.c.l.bf16 %v2411_v15 }
 0x136   :  { %v1027_v42 = vadd.f32 %v1026_v25, %v1025_v32  ;;  %1087 = vmatpush.msrb.mxu0 %v1046_v29  ;;  %1106 = vmatpush.msrb.mxu1 %v1049_v9  ;;  %v2099_v25 = vunpack.c.h.bf16 %v2410_v0  ;;  %v2098_v29 = vunpack.c.l.bf16 %v2410_v0 }
 0x137   :  { %893 = vmatmul.f32.vlgmr.msra.gmra.mxu1 %v791_v8  ;;  %v2396_v8 = vld [vmem:[%s3651_s5 + $0x30] sm:$0xff]   ;;  %v1032_v28 = vsub.f32 1.0, %v1031_v10 }
 0x138   :  { %v2043_v33 = vunpack.c.h.bf16 %v2396_v8  ;;  %v2042_v41 = vunpack.c.l.bf16 %v2396_v8  ;;  %v1029_v53 = vadd.f32 %v1028_v37, %v1027_v42  ;;  %1107 = vmatpush.msrb.mxu1 %v1047_v49  ;;  %v2412_v10 = vld [vmem:[%s3650_s4 + $0xf0] sm:$0xff]   ;;  %v2110_v8 = vunpack.c.l.bf16 %v2413_v6  ;;  %v1063_v49 = vld [vmem:[#allocation7 + $0x4] ss:$8 sm:$0x3] }
 0x139   :  { %v1033_v40 = vmul.f32 %v2494_v19, %v1032_v28  ;;  %v2107_v12 = vunpack.c.h.bf16 %v2412_v10  ;;  %v2106_v16 = vunpack.c.l.bf16 %v2412_v10  ;;  %v2409_v28 = vld [vmem:[%s3650_s4 + $0xd8] sm:$0xff]   ;;  %v2408_v37 = vld [vmem:[%s3650_s4 + $0xd0] sm:$0xff]   ;;  %v1065_v61 = vperm.slane %v1063_v49, 0 }
 0x13a   :  { %987 = vmatpush.msra.mxu3 %v2043_v33  ;;  %v2095_v32 = vunpack.c.h.bf16 %v2409_v28  ;;  %v2400_v33 = vld [vmem:[%s3650_s4 + $0x90] sm:$0xff]   ;;  %v2094_v9 = vunpack.c.l.bf16 %v2409_v28  ;;  %v2091_v42 = vunpack.c.h.bf16 %v2408_v37  ;;  %v2090_v45 = vunpack.c.l.bf16 %v2408_v37 }
 0x13b   :  { %v1034_v48 = vadd.f32 %v2494_v19, %v1033_v40  ;;  %v2059_v36 = vunpack.c.h.bf16 %v2400_v33  ;;  %v2058_v40 = vunpack.c.l.bf16 %v2400_v33 }
 0x13c   :  { %988 = vmatpush.msra.mxu3 %v2042_v41  ;;  %v2399_v41 = vld [vmem:[%s3650_s4 + $0x88] sm:$0xff]  }
 0x13d   :  { %v1036_v57 = vsel %vm1035_vm1, %v2494_v19, %v1034_v48  ;;  %v2063_v19 = vunpack.c.h.bf16 %v2401_v26  ;;  %v2055_v44 = vunpack.c.h.bf16 %v2399_v41  ;;  %v2407_v48 = vld [vmem:[%s3650_s4 + $0xc8] sm:$0xff]   ;;  %v2054_v52 = vunpack.c.l.bf16 %v2399_v41 }
 0x13e   :  { %v1037_v3 = vmul.f32 %v1036_v57, %v1029_v53  ;;  %989 = vmatpush.msra.mxu3 %v2039_v60  ;;  %v2087_v53 = vunpack.c.h.bf16 %v2407_v48  ;;  %v2086_v57 = vunpack.c.l.bf16 %v2407_v48  ;;  %v2406_v60 = vld [vmem:[%s3650_s4 + $0xc0] sm:$0xff]   ;;  %v2135_v26 = vunpack.c.h.bf16 %v2419_v63 }
 0x13f   :  { %1187 = vmatpush.msrb.mxu2 %v2063_v19  ;;  %v2083_v13 = vunpack.c.h.bf16 %v2406_v60 }
 0x140   :  { %1910 = vmatmul.msk.f32.vlgmr.msrb.gmra.mxu0 %vm1014_vm0, %v1037_v3  ;;  %1911 = vmatmul.msk.f32.vlgmr.msrb.gmra.mxu1 %vm1014_vm0, %v1037_v3  ;;  %v2051_v3 = vunpack.c.h.bf16 %v2398_v56  ;;  %v2425_v56 = vld [vmem:[%s3651_s5 + $0x58] sm:$0xff]  }
 0x141   :  { %990 = vmatpush.msra.mxu3 %v2038_v14  ;;  %1188 = vmatpush.msrb.mxu2 %v2062_v38  ;;  %v2082_v14 = vunpack.c.l.bf16 %v2406_v60  ;;  %v1066_v38 = vperm.slane %v1063_v49, 1  ;;  %v2159_v60 = vunpack.c.h.bf16 %v2425_v56 }
 0x143   :  { %991 = vmatpush.msra.mxu3 %v2035_v62  ;;  %1189 = vmatpush.msrb.mxu2 %v2059_v36  ;;  %v1178_v36 = vld [vmem:[#allocation7 + $0x5] ss:$0 sm:$0xff] }
 0x145   :  { %992 = vmatpush.msra.mxu3 %v2034_v30  ;;  %1190 = vmatpush.msrb.mxu2 %v2058_v40  ;;  %v2143_v30 = vunpack.c.h.bf16 %v2421_v43 }
 0x147   :  { %993 = vmatpush.msra.mxu3 %v2031_v2  ;;  %1191 = vmatpush.msrb.mxu2 %v2055_v44  ;;  %v2139_v2 = vunpack.c.h.bf16 %v2420_v23 }
 0x148   :  { %1253 = vmatpush.msra.mxu0 %v2143_v30  ;;  %v2437_v30 = vld [vmem:[%s3650_s4 + $0x1b8] sm:$0xff]  }
 0x149   :  { %994 = vmatpush.msra.mxu3 %v2030_v18  ;;  %1192 = vmatpush.msrb.mxu2 %v2054_v52  ;;  %v2418_v18 = vld [vmem:[%s3650_s4 + $0x160] sm:$0xff]   ;;  %v2207_v63 = vunpack.c.h.bf16 %v2437_v30 }
 0x14a   :  { %1254 = vmatpush.msra.mxu0 %v2142_v1  ;;  %v2426_v52 = vld [vmem:[%s3651_s5 + $0x60] sm:$0xff]   ;;  %v2453_v1 = vld [vmem:[%s3650_s4 + $0x1f8] sm:$0xff]  }
 0x14b   :  { %995 = vmatpush.msra.mxu3 %v2027_v54  ;;  %1193 = vmatpush.msrb.mxu2 %v2051_v3  ;;  %v2130_v54 = vunpack.c.l.bf16 %v2418_v18  ;;  %v2158_v3 = vunpack.c.l.bf16 %v2425_v56 }
 0x14c   :  { %1255 = vmatpush.msra.mxu0 %v2139_v2  ;;  %v2436_v2 = vld [vmem:[%s3650_s4 + $0x1b0] sm:$0xff]  }
 0x14d   :  { %996 = vmatpush.msra.mxu3 %v2026_v31  ;;  %1194 = vmatpush.msrb.mxu2 %v2050_v4 }
 0x14e   :  { %1256 = vmatpush.msra.mxu0 %v2138_v34  ;;  %v2271_v34 = vunpack.c.h.bf16 %v2453_v1 }
 0x14f   :  { %997 = vmatpush.msra.mxu3 %v2023_v27 }
 0x150   :  { %1257 = vmatpush.msra.mxu0 %v2135_v26  ;;  %v2206_v26 = vunpack.c.l.bf16 %v2437_v30  ;;  %v2459_v30 = vld [vmem:[%s3651_s5 + $0x168] sm:$0xff]  }
 0x151   :  { %998 = vmatpush.msra.mxu3 %v2022_v39  ;;  %v2416_v39 = vld [vmem:[%s3650_s4 + $0x150] sm:$0xff]  }
 0x152   :  { %1258 = vmatpush.msra.mxu0 %v2134_v35  ;;  %v2122_v6 = vunpack.c.l.bf16 %v2416_v39  ;;  %v2452_v35 = vld [vmem:[%s3650_s4 + $0x1f0] sm:$0xff]  }
 0x153   :  { %999 = vmatpush.msra.mxu3 %v2019_v46  ;;  %v2123_v46 = vunpack.c.h.bf16 %v2416_v39 }
 0x155   :  { %1000 = vmatpush.msra.mxu3 %v2018_v51  ;;  %v2415_v51 = vld [vmem:[%s3650_s4 + $0x148] sm:$0xff]  }
 0x156   :  { %v2118_v10 = vunpack.c.l.bf16 %v2415_v51 }
 0x157   :  { %1199 = vmatpush.msrb.mxu3 %v2111_v7  ;;  %v2119_v7 = vunpack.c.h.bf16 %v2415_v51 }
 0x159   :  { %1200 = vmatpush.msrb.mxu3 %v2110_v8  ;;  %v2414_v8 = vld [vmem:[%s3650_s4 + $0x140] sm:$0xff]  }
 0x15a   :  { %v2114_v15 = vunpack.c.l.bf16 %v2414_v8 }
 0x15b   :  { %1201 = vmatpush.msrb.mxu3 %v2107_v12  ;;  %v2115_v12 = vunpack.c.h.bf16 %v2414_v8 }
 0x15d   :  { %1202 = vmatpush.msrb.mxu3 %v2106_v16  ;;  %v2429_v16 = vld [vmem:[%s3651_s5 + $0x78] sm:$0xff]  }
 0x15e   :  { %v2175_v0 = vunpack.c.h.bf16 %v2429_v16 }
 0x15f   :  { %1203 = vmatpush.msrb.mxu3 %v2103_v17  ;;  %v2428_v17 = vld [vmem:[%s3651_s5 + $0x70] sm:$0xff]  }
 0x160   :  { %1307 = vmatpush.msra.mxu1 %v2175_v0  ;;  %v2170_v28 = vunpack.c.l.bf16 %v2428_v17 }
 0x161   :  { %1204 = vmatpush.msrb.mxu3 %v2102_v24  ;;  %v2174_v24 = vunpack.c.l.bf16 %v2429_v16 }
 0x163   :  { %1205 = vmatpush.msrb.mxu3 %v2099_v25  ;;  %v2171_v25 = vunpack.c.h.bf16 %v2428_v17  ;;  %1308 = vmatpush.msra.mxu1 %v2174_v24 }
 0x165   :  { %1206 = vmatpush.msrb.mxu3 %v2098_v29  ;;  %1309 = vmatpush.msra.mxu1 %v2171_v25  ;;  %v984_v29 = vld [vmem:[#allocation7 + $0x3] ss:$0 sm:$0xff]  ;;  %v2431_v25 = vld [vmem:[%s3650_s4 + $0x188] sm:$0xff]  }
 0x167   :  { %1207 = vmatpush.msrb.mxu3 %v2095_v32  ;;  %1310 = vmatpush.msra.mxu1 %v2170_v28  ;;  %v2447_v28 = vld [vmem:[%s3650_s4 + $0x1c8] sm:$0xff]  }
 0x169   :  { %1208 = vmatpush.msrb.mxu3 %v2094_v9 }
 0x16b   :  { %1209 = vmatpush.msrb.mxu3 %v2091_v42 }
 0x16d   :  { %1210 = vmatpush.msrb.mxu3 %v2090_v45  ;;  %v2427_v45 = vld [vmem:[%s3651_s5 + $0x68] sm:$0xff]  }
 0x16e   :  { %v2167_v48 = vunpack.c.h.bf16 %v2427_v45  ;;  %v2166_v49 = vunpack.c.l.bf16 %v2427_v45  ;;  %v2182_v45 = vunpack.c.l.bf16 %v2431_v25 }
 0x16f   :  { %1211 = vmatpush.msrb.mxu3 %v2087_v53  ;;  %v2163_v53 = vunpack.c.h.bf16 %v2426_v52 }
 0x170   :  { %1311 = vmatpush.msra.mxu1 %v2167_v48  ;;  %v2246_v48 = vunpack.c.l.bf16 %v2447_v28 }
 0x171   :  { %1212 = vmatpush.msrb.mxu3 %v2086_v57  ;;  %v2162_v57 = vunpack.c.l.bf16 %v2426_v52  ;;  %v2446_v52 = vld [vmem:[%s3650_s4 + $0x1c0] sm:$0xff]  }
 0x172   :  { %1312 = vmatpush.msra.mxu1 %v2166_v49  ;;  %v2430_v49 = vld [vmem:[%s3650_s4 + $0x180] sm:$0xff]   ;;  %v2243_v56 = vunpack.c.h.bf16 %v2446_v52 }
 0x173   :  { %1213 = vmatpush.msrb.mxu3 %v2083_v13  ;;  %v2423_v13 = vld [vmem:[%s3651_s5 + $0x48] sm:$0xff]  }
 0x174   :  { %1313 = vmatpush.msra.mxu1 %v2163_v53  ;;  %v2179_v53 = vunpack.c.h.bf16 %v2430_v49 }
 0x175   :  { %1214 = vmatpush.msrb.mxu3 %v2082_v14 }
 0x176   :  { %1314 = vmatpush.msra.mxu1 %v2162_v57  ;;  %v2178_v57 = vunpack.c.l.bf16 %v2430_v49 }
 0x178   :  { %1315 = vmatpush.msra.mxu1 %v2159_v60  ;;  %v2242_v60 = vunpack.c.l.bf16 %v2446_v52 }
 0x179   :  { %v874_v50 = vpop.f32.mrf.mxu0 }
 0x17a   :  { %v875_v11 = vadd.f32 %v874_v50, %v856_v47  ;;  %v2131_v47 = vunpack.c.h.bf16 %v2418_v18  ;;  %v2417_v50 = vld [vmem:[%s3650_s4 + $0x158] sm:$0xff]   ;;  %1316 = vmatpush.msra.mxu1 %v2158_v3  ;;  %v2270_v18 = vunpack.c.l.bf16 %v2453_v1  ;;  %v2460_v3 = vld [vmem:[%s3651_s5 + $0x170] sm:$0xff]   ;;  %v2443_v1 = vld [vmem:[%s3651_s5 + $0xa8] sm:$0xff]  }
 0x17b   :  { %v2127_v19 = vunpack.c.h.bf16 %v2417_v50 }
 0x17c   :  { %1259 = vmatpush.msra.mxu0 %v2131_v47  ;;  %v2203_v47 = vunpack.c.h.bf16 %v2436_v2 }
 0x17e   :  { %1260 = vmatpush.msra.mxu0 %v2130_v54  ;;  %v2435_v54 = vld [vmem:[%s3650_s4 + $0x1a8] sm:$0xff]  }
 0x180   :  { %1261 = vmatpush.msra.mxu0 %v2127_v19  ;;  %v2451_v19 = vld [vmem:[%s3650_s4 + $0x1e8] sm:$0xff]  }
 0x1b4   :  { %v894_v20 = vpop.f32.mrf.mxu1 }
 0x1b5   :  { %v895_v21 = vadd.f32 %v894_v20, %v875_v11 }
 0x1b7   :  { %v897_v55 = vmax.f32 %v895_v21, 0.0 }
 0x1b9   :  { %947 = vmatmul.f32.vlgmr.msra.gmra.mxu2 %v897_v55  ;;  %v2126_v55 = vunpack.c.l.bf16 %v2417_v50  ;;  %v2267_v50 = vunpack.c.h.bf16 %v2452_v35 }
 0x1ba   :  { %1366 = vmatpush.msra.mxu2 %v2207_v63 }
 0x1bb   :  { %1262 = vmatpush.msra.mxu0 %v2126_v55 }
 0x1bc   :  { %1367 = vmatpush.msra.mxu2 %v2206_v26  ;;  %v2231_v26 = vunpack.c.h.bf16 %v2443_v1 }
 0x1bd   :  { %v1089_v22 = vpop.f32.mrf.mxu0  ;;  %v1109_v20 = vpop.f32.mrf.mxu1  ;;  %1263 = vmatpush.msra.mxu0 %v2123_v46  ;;  %v2433_v46 = vld [vmem:[%s3650_s4 + $0x198] sm:$0xff]  }
 0x1be   :  { %v1090_v62 = vadd.f32 %v1089_v22, %v1065_v61  ;;  %v1110_v27 = vadd.f32 %v1109_v20, %v1066_v38  ;;  %v2424_v61 = vld [vmem:[%s3651_s5 + $0x50] sm:$0xff]   ;;  %v2151_v22 = vunpack.c.h.bf16 %v2423_v13  ;;  %1368 = vmatpush.msra.mxu2 %v2203_v47  ;;  %v2263_v38 = vunpack.c.h.bf16 %v2451_v19  ;;  %v2434_v20 = vld [vmem:[%s3650_s4 + $0x1a0] sm:$0xff]  }
 0x1bf   :  { %1264 = vmatpush.msra.mxu0 %v2122_v6  ;;  %v2155_v4 = vunpack.c.h.bf16 %v2424_v61  ;;  %v2154_v14 = vunpack.c.l.bf16 %v2424_v61  ;;  %v2195_v55 = vunpack.c.h.bf16 %v2434_v20  ;;  %v2449_v6 = vld [vmem:[%s3650_s4 + $0x1d8] sm:$0xff]   ;;  %v2194_v51 = vunpack.c.l.bf16 %v2434_v20 }
 0x1c0   :  { %v1112_v59 = vmax.f32 %v1090_v62, 0.0  ;;  %v1113_v5 = vmax.f32 %v1110_v27, 0.0  ;;  %v2150_v62 = vunpack.c.l.bf16 %v2423_v13  ;;  %v2198_v27 = vunpack.c.l.bf16 %v2435_v54  ;;  %v2461_v61 = vld [vmem:[%s3651_s5 + $0x178] sm:$0xff]  }
 0x1c1   :  { %1265 = vmatpush.msra.mxu0 %v2119_v7  ;;  %1317 = vmatpush.msra.mxu1 %v2155_v4  ;;  %v2255_v8 = vunpack.c.h.bf16 %v2449_v6  ;;  %v2190_v16 = vunpack.c.l.bf16 %v2433_v46  ;;  %v2254_v17 = vunpack.c.l.bf16 %v2449_v6  ;;  %v2445_v4 = vld [vmem:[%s3651_s5 + $0xb8] sm:$0xff]   ;;  %v2303_v13 = vunpack.c.h.bf16 %v2461_v61 }
 0x1c2   :  { %1195 = vmatmul.f32.vlgmr.msrb.gmra.mxu2 %v1112_v59  ;;  %v2422_v59 = vld [vmem:[%s3651_s5 + $0x40] sm:$0xff]   ;;  %v2294_v47 = vunpack.c.l.bf16 %v2459_v30 }
 0x1c3   :  { %1266 = vmatpush.msra.mxu0 %v2118_v10  ;;  %1318 = vmatpush.msra.mxu1 %v2154_v14  ;;  %v2147_v43 = vunpack.c.h.bf16 %v2422_v59  ;;  %v2146_v23 = vunpack.c.l.bf16 %v2422_v59  ;;  %v2191_v10 = vunpack.c.h.bf16 %v2433_v46  ;;  %v2302_v14 = vunpack.c.l.bf16 %v2461_v61 }
 0x1c4   :  { %v2238_v59 = vunpack.c.l.bf16 %v2445_v4 }
 0x1c5   :  { %1267 = vmatpush.msra.mxu0 %v2115_v12  ;;  %1319 = vmatpush.msra.mxu1 %v2151_v22  ;;  %v2432_v12 = vld [vmem:[%s3650_s4 + $0x190] sm:$0xff]   ;;  %v2239_v22 = vunpack.c.h.bf16 %v2445_v4 }
 0x1c6   :  { %v2187_v0 = vunpack.c.h.bf16 %v2432_v12  ;;  %v1529_v4 = vld [vmem:[#allocation7 + $0x15] ss:$0 sm:$0xff] }
 0x1c7   :  { %1268 = vmatpush.msra.mxu0 %v2114_v15  ;;  %1320 = vmatpush.msra.mxu1 %v2150_v62  ;;  %v2448_v15 = vld [vmem:[%s3650_s4 + $0x1d0] sm:$0xff]  }
 0x1c8   :  { %v2251_v24 = vunpack.c.h.bf16 %v2448_v15  ;;  %v2444_v62 = vld [vmem:[%s3651_s5 + $0xb0] sm:$0xff]  }
 0x1c9   :  { %1321 = vmatpush.msra.mxu1 %v2147_v43  ;;  %1474 = vmatpush.msrb.mxu0 %v2271_v34  ;;  %v2299_v43 = vunpack.c.h.bf16 %v2460_v3  ;;  %v2234_v63 = vunpack.c.l.bf16 %v2444_v62  ;;  %v2295_v34 = vunpack.c.h.bf16 %v2459_v30 }
 0x1cb   :  { %1322 = vmatpush.msra.mxu1 %v2146_v23  ;;  %1475 = vmatpush.msrb.mxu0 %v2270_v18  ;;  %v2235_v23 = vunpack.c.h.bf16 %v2444_v62  ;;  %v2458_v18 = vld [vmem:[%s3651_s5 + $0x160] sm:$0xff]  }
 0x1cd   :  { %1476 = vmatpush.msrb.mxu0 %v2267_v50  ;;  %1530 = vmatpush.msrb.mxu1 %v2303_v13  ;;  %v2230_v50 = vunpack.c.l.bf16 %v2443_v1 }
 0x1cf   :  { %1531 = vmatpush.msrb.mxu1 %v2302_v14 }
 0x1d1   :  { %1532 = vmatpush.msrb.mxu1 %v2299_v43 }
 0x23c   :  { %v948_v11 = vpop.f32.mrf.mxu2 }
 0x23d   :  { %v949_v31 = vadd.f32 %v948_v11, %v930_v58  ;;  %v2202_v58 = vunpack.c.l.bf16 %v2436_v2  ;;  %v2266_v11 = vunpack.c.l.bf16 %v2452_v35  ;;  %v2298_v2 = vunpack.c.l.bf16 %v2460_v3  ;;  %v2442_v35 = vld [vmem:[%s3651_s5 + $0xa0] sm:$0xff]  }
 0x23f   :  { %v951_v21 = vmax.f32 %v949_v31, 0.0  ;;  %v2199_v31 = vunpack.c.h.bf16 %v2435_v54  ;;  %1369 = vmatpush.msra.mxu2 %v2202_v58  ;;  %1477 = vmatpush.msrb.mxu0 %v2266_v11  ;;  %v2291_v54 = vunpack.c.h.bf16 %v2458_v18  ;;  %v2457_v58 = vld [vmem:[%s3651_s5 + $0x158] sm:$0xff]  }
 0x240   :  { %1533 = vmatpush.msrb.mxu1 %v2298_v2  ;;  %v2441_v11 = vld [vmem:[%s3651_s5 + $0x98] sm:$0xff]   ;;  %v2287_v20 = vunpack.c.h.bf16 %v2457_v58 }
 0x241   :  { %1001 = vmatmul.f32.vlgmr.msra.gmra.mxu3 %v951_v21  ;;  %v2450_v21 = vld [vmem:[%s3650_s4 + $0x1e0] sm:$0xff]   ;;  %1370 = vmatpush.msra.mxu2 %v2199_v31  ;;  %v2290_v31 = vunpack.c.l.bf16 %v2458_v18 }
 0x242   :  { %1478 = vmatpush.msrb.mxu0 %v2263_v38  ;;  %v2259_v39 = vunpack.c.h.bf16 %v2450_v21  ;;  %v2258_v7 = vunpack.c.l.bf16 %v2450_v21  ;;  %1420 = vmatpush.msra.mxu3 %v2239_v22  ;;  %v2226_v38 = vunpack.c.l.bf16 %v2442_v35  ;;  %v2223_v21 = vunpack.c.h.bf16 %v2441_v11 }
 0x243   :  { %1371 = vmatpush.msra.mxu2 %v2198_v27  ;;  %1534 = vmatpush.msrb.mxu1 %v2295_v34  ;;  %v2456_v27 = vld [vmem:[%s3651_s5 + $0x150] sm:$0xff]  }
 0x244   :  { %1421 = vmatpush.msra.mxu3 %v2238_v59  ;;  %v2283_v46 = vunpack.c.h.bf16 %v2456_v27 }
 0x245   :  { %v1196_v9 = vpop.f32.mrf.mxu2  ;;  %1372 = vmatpush.msra.mxu2 %v2195_v55  ;;  %1535 = vmatpush.msrb.mxu1 %v2294_v47  ;;  %v2286_v55 = vunpack.c.l.bf16 %v2457_v58 }
 0x246   :  { %v1197_v40 = vadd.f32 %v1196_v9, %v1178_v36  ;;  %v2183_v36 = vunpack.c.h.bf16 %v2431_v25  ;;  %v2247_v9 = vunpack.c.h.bf16 %v2447_v28  ;;  %1422 = vmatpush.msra.mxu3 %v2235_v23  ;;  %v2454_v28 = vld [vmem:[%s3651_s5 + $0x140] sm:$0xff]  }
 0x247   :  { %1373 = vmatpush.msra.mxu2 %v2194_v51  ;;  %1536 = vmatpush.msrb.mxu1 %v2291_v54  ;;  %v2455_v51 = vld [vmem:[%s3651_s5 + $0x148] sm:$0xff]  }
 0x248   :  { %1423 = vmatpush.msra.mxu3 %v2234_v63 }
 0x249   :  { %1215 = vmatmul.f32.vlgmr.msrb.gmra.mxu3 %v1113_v5  ;;  %v2262_v5 = vunpack.c.l.bf16 %v2451_v19  ;;  %1374 = vmatpush.msra.mxu2 %v2191_v10  ;;  %v2227_v19 = vunpack.c.h.bf16 %v2442_v35  ;;  %v2279_v10 = vunpack.c.h.bf16 %v2455_v51 }
 0x24a   :  { %1424 = vmatpush.msra.mxu3 %v2231_v26  ;;  %1537 = vmatpush.msrb.mxu1 %v2290_v31 }
 0x24b   :  { %1479 = vmatpush.msrb.mxu0 %v2262_v5  ;;  %1375 = vmatpush.msra.mxu2 %v2190_v16  ;;  %v2440_v5 = vld [vmem:[%s3651_s5 + $0x90] sm:$0xff]  }
 0x24c   :  { %1425 = vmatpush.msra.mxu3 %v2230_v50  ;;  %1538 = vmatpush.msrb.mxu1 %v2287_v20  ;;  %v2219_v6 = vunpack.c.h.bf16 %v2440_v5  ;;  %v2218_v25 = vunpack.c.l.bf16 %v2440_v5 }
 0x24d   :  { %1480 = vmatpush.msrb.mxu0 %v2259_v39  ;;  %1376 = vmatpush.msra.mxu2 %v2187_v0  ;;  %v2222_v39 = vunpack.c.l.bf16 %v2441_v11 }
 0x24e   :  { %1426 = vmatpush.msra.mxu3 %v2227_v19  ;;  %1539 = vmatpush.msrb.mxu1 %v2286_v55 }
 0x24f   :  { %1481 = vmatpush.msrb.mxu0 %v2258_v7  ;;  %v2282_v7 = vunpack.c.l.bf16 %v2456_v27 }
 0x250   :  { %1427 = vmatpush.msra.mxu3 %v2226_v38  ;;  %1540 = vmatpush.msrb.mxu1 %v2283_v46 }
 0x251   :  { %1482 = vmatpush.msrb.mxu0 %v2255_v8  ;;  %v1306_v8 = vld [vmem:[#allocation7 + $0x7] ss:$0 sm:$0xff] }
 0x252   :  { %1428 = vmatpush.msra.mxu3 %v2223_v21  ;;  %1541 = vmatpush.msrb.mxu1 %v2282_v7 }
 0x253   :  { %1483 = vmatpush.msrb.mxu0 %v2254_v17 }
 0x254   :  { %1429 = vmatpush.msra.mxu3 %v2222_v39  ;;  %1542 = vmatpush.msrb.mxu1 %v2279_v10 }
 0x255   :  { %1484 = vmatpush.msrb.mxu0 %v2251_v24  ;;  %v2278_v24 = vunpack.c.l.bf16 %v2455_v51 }
 0x256   :  { %1430 = vmatpush.msra.mxu3 %v2219_v6 }
 0x257   :  { %1543 = vmatpush.msrb.mxu1 %v2278_v24 }
 0x258   :  { %1431 = vmatpush.msra.mxu3 %v2218_v25 }
 0x2c4   :  { %v1002_v32 = vpop.f32.mrf.mxu3 }
 0x2c5   :  { %v3429_v33 = vadd.f32 %v1002_v32, %v984_v29  ;;  %v2186_v29 = vunpack.c.l.bf16 %v2432_v12  ;;  %v2250_v32 = vunpack.c.l.bf16 %v2448_v15 }
 0x2c7   :  { %v1005_v37 = vmax.f32 %v3429_v33, 0.0  ;;  %1377 = vmatpush.msra.mxu2 %v2186_v29  ;;  %1485 = vmatpush.msrb.mxu0 %v2250_v32  ;;  %v2275_v29 = vunpack.c.h.bf16 %v2454_v28  ;;  %v2439_v32 = vld [vmem:[%s3651_s5 + $0x88] sm:$0xff]  }
 0x2c9   :  { %1329 = vrot.lane.b32.xlu0 %v1005_v37, %s2621_s18  ;;  %1378 = vmatpush.msra.mxu2 %v2183_v36  ;;  %v2215_v36 = vunpack.c.h.bf16 %v2439_v32 }
 0x2ca   :  { %1486 = vmatpush.msrb.mxu0 %v2247_v9  ;;  %1544 = vmatpush.msrb.mxu1 %v2275_v29  ;;  %v2274_v9 = vunpack.c.l.bf16 %v2454_v28 }
 0x2cb   :  { %1379 = vmatpush.msra.mxu2 %v2182_v45  ;;  %1432 = vmatpush.msra.mxu3 %v2215_v36  ;;  %v1569_v45 = vld [vmem:[%s3648_s2] sm:$0xff]  ;;  %s2623_s2 = smov 124  }
 0x2cc   :  { %v1216_v42 = vpop.f32.mrf.mxu3  ;;  %1487 = vmatpush.msrb.mxu0 %v2246_v48  ;;  %1545 = vmatpush.msrb.mxu1 %v2274_v9  ;;  %v1473_v48 = vld [vmem:[#allocation7 + $0x14] ss:$0 sm:$0xff] }
 0x2cd   :  { %v1217_v41 = vadd.f32 %v1216_v42, %v1197_v40  ;;  %v1252_v40 = vld [vmem:[#allocation7 + $0x6] ss:$0 sm:$0xff]  ;;  %1380 = vmatpush.msra.mxu2 %v2179_v53 }
 0x2ce   :  { %1488 = vmatpush.msrb.mxu0 %v2243_v56  ;;  %v1365_v56 = vld [vmem:[#allocation7 + $0x10] ss:$0 sm:$0xff] }
 0x2cf   :  { %v1219_v44 = vmax.f32 %v1217_v41, 0.0  ;;  %1381 = vmatpush.msra.mxu2 %v2178_v57 }
 0x2d0   :  { %1489 = vmatpush.msrb.mxu0 %v2242_v60 }
 0x2d1   :  { %1269 = vmatmul.f32.vlgmr.msra.gmra.mxu0 %v1219_v44  ;;  %1571 = vrot.lane.b32.xlu0 %v1569_v45, %s2622_s16 }
 0x33b   :  { %v1330_v17 = vpop.permute.xlu0 %1329 }
 0x343   :  { %v1572_v54 = vpop.permute.xlu0 %1571 }
 0x34e   :  { %v1270_v42 = vpop.f32.mrf.mxu0 }
 0x34f   :  { %v1271_v41 = vadd.f32 %v1270_v42, %v1252_v40  ;;  %v2214_v40 = vunpack.c.l.bf16 %v2439_v32  ;;  %v2438_v42 = vld [vmem:[%s3651_s5 + $0x80] sm:$0xff]  }
 0x351   :  { %v1273_v44 = vmax.f32 %v1271_v41, 0.0  ;;  %1433 = vmatpush.msra.mxu3 %v2214_v40  ;;  %v2211_v41 = vunpack.c.h.bf16 %v2438_v42 }
 0x353   :  { %1323 = vmatmul.f32.vlgmr.msra.gmra.mxu1 %v1273_v44  ;;  %1434 = vmatpush.msra.mxu3 %v2211_v41  ;;  %v2210_v44 = vunpack.c.l.bf16 %v2438_v42 }
 0x355   :  { %1435 = vmatpush.msra.mxu3 %v2210_v44 }
 0x3d0   :  { %v1324_v12 = vpop.f32.mrf.mxu1 }
 0x3d1   :  { %v3540_v15 = vadd.f32 %v1324_v12, %v1306_v8 }
 0x3d3   :  { %v1327_v16 = vmax.f32 %v3540_v15, 0.0 }
 0x3d5   :  { %v1332_v0 = vsel %vm1014_vm0, %v1327_v16, %v1330_v17 }
 0x3d6   :  { %1382 = vmatmul.f32.vlgmr.msra.gmra.mxu2 %v1332_v0  ;;  %1889 = vst [vmem:[#allocation8] sm:$0xff] %v1332_v0  ;;  %1490 = vmatmul.f32.vlgmr.msrb.gmra.mxu0 %v1332_v0 }
 0x453   :  { %v1491_v49 = vpop.f32.mrf.mxu0 }
 0x454   :  { %v1492_v52 = vadd.f32 %v1491_v49, %v1473_v48 }
 0x456   :  { %vm1494_vm2 = vcmp.gt.f32.partialorder %v1492_v52, 0.0  ;;  %v1495_v53 = vmul.f32 0.1, %v1492_v52 }
 0x458   :  { %v1496_v57 = vsel %vm1494_vm2, %v1492_v52, %v1495_v53 }
 0x459   :  { %v1383_v60 = vpop.f32.mrf.mxu2  ;;  %1546 = vmatmul.f32.vlgmr.msrb.gmra.mxu1 %v1496_v57 }
 0x45a   :  { %v1384_v61 = vadd.f32 %v1383_v60, %v1365_v56 }
 0x45c   :  { %v1386_v3 = vmax.f32 %v1384_v61, 0.0 }
 0x45e   :  { %1436 = vmatmul.f32.vlgmr.msra.gmra.mxu3 %v1386_v3 }
 0x4d6   :  { %v1547_v13 = vpop.f32.mrf.mxu1 }
 0x4d7   :  { %v3558_v14 = vadd.f32 %v1547_v13, %v1529_v4 }
 0x4d9   :  { %v1553_v22 = vand.u32 2147483647, %v3558_v14  ;;  %v1550_v18 = vmax.f32 %v3558_v14, 0.0  ;;  %vm1551_vm4 = vcmp.ne.f32.partialorder %v3558_v14, %v3558_v14 }
 0x4db   :  { %v1554_v62 = vsub.f32 0.0, %v1553_v22 }
 0x4dd   :  { %v1555_v59 = vmul.f32 1.442695, %v1554_v62 }
 0x4df   :  { %2495 = vpow2.f32 %v1555_v59 }
 0x4e5   :  { %v2496_v43 = vpop.eup %2495 }
 0x4e6   :  { %v1557_v23 = vadd.f32 1.0, %v2496_v43  ;;  %v1560_v30 = vmul.f32 -0.5, %v2496_v43  ;;  %v1563_v2 = vand.u32 2147483647, %v2496_v43 }
 0x4e8   :  { %2497 = vlog2.f32 %v1557_v23  ;;  %v1561_v1 = vadd.f32 1.0, %v1560_v30  ;;  %vm1564_vm3 = vcmp.lt.f32.partialorder %v1563_v2, 0.0004427343 }
 0x4ea   :  { %v1562_v26 = vmul.f32 %v2496_v43, %v1561_v1 }
 0x4ee   :  { %v2498_v63 = vpop.eup %2497 }
 0x4ef   :  { %v1559_v34 = vmul.f32 0.6931472, %v2498_v63 }
 0x4f1   :  { %v1565_v35 = vsel %vm1564_vm3, %v1562_v26, %v1559_v34 }
 0x4f2   :  { %v1566_v47 = vadd.f32 %v1565_v35, %v1550_v18 }
 0x4f4   :  { %v1567_v50 = vsel %vm1551_vm4, %v3558_v14, %v1566_v47 }
 0x4f5   :  { %v1568_v19 = vadd.f32 1e-07, %v1567_v50 }
 0x4f7   :  { %v1574_v58 = vmul.f32 %v1572_v54, %v1568_v19  ;;  %1582 = vrot.lane.b32.xlu1 %v1568_v19, %s2623_s2  ;;  %2499 = vlog2.f32 %v1568_v19 }
 0x4f9   :  { %1576 = vrot.lane.b32.xlu2 %v1574_v58, %s2623_s2 }
 0x4fd   :  { %v2500_v11 = vpop.eup %2499 }
 0x4fe   :  { %v1603_v31 = vmul.f32 0.6931472, %v2500_v11 }
 0x4ff   :  { %1659 = vrot.lane.b32.xlu1 %v1568_v19, %s2624_s17 }
 0x500   :  { %1605 = vrot.lane.b32.xlu0 %v1603_v31, %s2623_s2 }
 0x501   :  { %1655 = vrot.lane.b32.xlu2 %v3558_v14, %s2625_s1 }
 0x507   :  { %1679 = vrot.lane.b32.xlu1 %v1603_v31, %s2624_s17 }
 0x508   :  { %1615 = vrot.lane.b32.xlu0 %v3558_v14, %s2624_s17 }
 0x509   :  { %1619 = vrot.lane.b32.xlu2 %v1568_v19, %s2626_s6 }
 0x50f   :  { %1639 = vrot.lane.b32.xlu1 %v1603_v31, %s2626_s6 }
 0x553   :  { %v1577_v38 = vpop.permute.xlu2 %1576 }
 0x554   :  { %v3571_v6 = vadd.f32 %v1577_v38, %v3558_v14 }
 0x556   :  { %v1580_v17 = vsub.f32 %v3571_v6, %v3558_v14 }
 0x55b   :  { %v1656_v21 = vpop.permute.xlu2 %1655 }
 0x55c   :  { %v1658_v49 = vsub.f32 %v3571_v6, %v1656_v21 }
 0x563   :  { %v1620_v0 = vpop.permute.xlu2 %1619 }
 0x564   :  { %v1633_v1 = vand.u32 2147483648, %v1620_v0  ;;  %vm1627_vm15 = vweird.f32 %v1620_v0  ;;  %v1631_v63 = vand.u32 2147483647, %v1620_v0 }
 0x566   :  { %v1634_v18 = vor.u32 1.1754944e-38, %v1633_v1  ;;  %vm1632_vm2 = vcmp.eq.f32.partialorder %v1631_v63, 8.507059e+37 }
 0x569   :  { %v1583_v20 = vpop.permute.xlu1 %1582 }
 0x56a   :  { %2501 = vrcp.f32 %v1583_v20  ;;  %v1596_v46 = vand.u32 2147483648, %v1583_v20  ;;  %v1594_v7 = vand.u32 2147483647, %v1583_v20  ;;  %vm1590_vm6 = vweird.f32 %v1583_v20 }
 0x56c   :  { %v1597_v12 = vor.u32 1.1754944e-38, %v1596_v46  ;;  %vm1595_vm8 = vcmp.eq.f32.partialorder %v1594_v7, 8.507059e+37  ;;  %v2469_v46 = vld [vmem:[%s3651_s5 + $0xf8] sm:$0xff]  }
 0x570   :  { %v2502_v27 = vpop.eup %2501 }
 0x571   :  { %v1586_v5 = vmul.f32 %v2502_v27, %v1583_v20  ;;  %v1660_v55 = vpop.permute.xlu1 %1659  ;;  %vm1591_vm5 = vweird.f32 %v2502_v27 }
 0x572   :  { %2503 = vrcp.f32 %v1660_v55  ;;  %vm1592_vm7 = vmor %vm1590_vm6, %vm1591_vm5  ;;  %v1673_v36 = vand.u32 2147483648, %v1660_v55  ;;  %v1671_v42 = vand.u32 2147483647, %v1660_v55  ;;  %vm1667_vm10 = vweird.f32 %v1660_v55  ;;  %v1606_v45 = vpop.permute.xlu0 %1605 }
 0x573   :  { %v1587_v39 = vsub.f32 1.0, %v1586_v5  ;;  %2505 = vrcp.f32 %v1620_v0  ;;  %v2473_v5 = vld [vmem:[%s3651_s5 + $0x118] sm:$0xff]  }
 0x574   :  { %v1674_v48 = vor.u32 1.1754944e-38, %v1673_v36  ;;  %vm1672_vm12 = vcmp.eq.f32.partialorder %v1671_v42, 8.507059e+37  ;;  %v2467_v42 = vld [vmem:[%s3651_s5 + $0xe8] sm:$0xff]  }
 0x575   :  { %v1588_v51 = vmul.f32 %v2502_v27, %v1587_v39  ;;  %v2351_v39 = vunpack.c.h.bf16 %v2473_v5 }
 0x577   :  { %v1589_v10 = vadd.f32 %v2502_v27, %v1588_v51  ;;  %1824 = vmatpush.msra.mxu0 %v2351_v39  ;;  %v2335_v51 = vunpack.c.h.bf16 %v2469_v46 }
 0x578   :  { %v2504_v8 = vpop.eup %2503 }
 0x579   :  { %v1663_v24 = vmul.f32 %v2504_v8, %v1660_v55  ;;  %v1593_v25 = vsel %vm1592_vm7, %v2502_v27, %v1589_v10  ;;  %vm1668_vm9 = vweird.f32 %v2504_v8  ;;  %v2506_v56 = vpop.eup %2505  ;;  %v1680_v22 = vpop.permute.xlu1 %1679  ;;  %v2350_v10 = vunpack.c.l.bf16 %v2473_v5  ;;  %1762 = vmatpush.msrb.mxu2 %v2335_v51 }
 0x57a   :  { %v1598_v28 = vsel %vm1595_vm8, %v1597_v12, %v1593_v25  ;;  %vm1669_vm11 = vmor %vm1667_vm10, %vm1668_vm9  ;;  %v1623_v3 = vmul.f32 %v2506_v56, %v1620_v0  ;;  %vm1628_vm14 = vweird.f32 %v2506_v56  ;;  %v1616_v2 = vpop.permute.xlu0 %1615  ;;  %v2334_v12 = vunpack.c.l.bf16 %v2469_v46  ;;  %v2464_v25 = vld [vmem:[%s3651_s5 + $0xd0] sm:$0xff]  }
 0x57b   :  { %v1664_v29 = vsub.f32 1.0, %v1663_v24  ;;  %v1599_v32 = vmul.f32 %v1598_v28, %v1580_v17  ;;  %vm1629_vm1 = vmor %vm1627_vm15, %vm1628_vm14  ;;  %v1618_v26 = vsub.f32 %v3571_v6, %v1616_v2  ;;  %v2465_v6 = vld [vmem:[%s3651_s5 + $0xd8] sm:$0xff]   ;;  %1825 = vmatpush.msra.mxu0 %v2350_v10  ;;  %v2468_v24 = vld [vmem:[%s3651_s5 + $0xf0] sm:$0xff]   ;;  %v2315_v36 = vunpack.c.h.bf16 %v2464_v25 }
 0x57c   :  { %v1624_v62 = vsub.f32 1.0, %v1623_v3  ;;  %v2319_v7 = vunpack.c.h.bf16 %v2465_v6  ;;  %v2318_v17 = vunpack.c.l.bf16 %v2465_v6  ;;  %1763 = vmatpush.msrb.mxu2 %v2334_v12  ;;  %v2466_v3 = vld [vmem:[%s3651_s5 + $0xe0] sm:$0xff]   ;;  %v2477_v10 = vld [vmem:[%s3651_s5 + $0x138] sm:$0xff]  }
 0x57d   :  { %v1665_v9 = vmul.f32 %v2504_v8, %v1664_v29  ;;  %v1600_v40 = vmul.f32 %v1599_v32, %v1599_v32  ;;  %v2471_v29 = vld [vmem:[%s3651_s5 + $0x108] sm:$0xff]   ;;  %v2331_v32 = vunpack.c.h.bf16 %v2468_v24  ;;  %v2322_v2 = vunpack.c.l.bf16 %v2466_v3 }
 0x57e   :  { %v1625_v23 = vmul.f32 %v2506_v56, %v1624_v62  ;;  %1785 = vmatpush.msrb.mxu3 %v2319_v7  ;;  %v2367_v12 = vunpack.c.h.bf16 %v2477_v10  ;;  %v2366_v33 = vunpack.c.l.bf16 %v2477_v10 }
 0x57f   :  { %v1601_v41 = vmul.f32 -0.5, %v1600_v40  ;;  %v1666_v44 = vadd.f32 %v2504_v8, %v1665_v9  ;;  %v2330_v9 = vunpack.c.l.bf16 %v2468_v24  ;;  %v2314_v40 = vunpack.c.l.bf16 %v2464_v25  ;;  %1764 = vmatpush.msrb.mxu2 %v2331_v32  ;;  %v2474_v24 = vld [vmem:[%s3651_s5 + $0x120] sm:$0xff]  }
 0x580   :  { %v1626_v30 = vadd.f32 %v2506_v56, %v1625_v23  ;;  %1786 = vmatpush.msrb.mxu3 %v2318_v17  ;;  %1868 = vmatpush.msra.mxu1 %v2367_v12  ;;  %v2355_v25 = vunpack.c.h.bf16 %v2474_v24 }
 0x581   :  { %v1608_v52 = vsub.f32 %v1601_v41, %v1606_v45  ;;  %v1670_v53 = vsel %vm1669_vm11, %v2504_v8, %v1666_v44  ;;  %v1640_v19 = vpop.permute.xlu1 %1639  ;;  %v2472_v8 = vld [vmem:[%s3651_s5 + $0x110] sm:$0xff]   ;;  %v2463_v41 = vld [vmem:[%s3651_s5 + $0xc8] sm:$0xff]   ;;  %v2343_v45 = vunpack.c.h.bf16 %v2471_v29  ;;  %1765 = vmatpush.msrb.mxu2 %v2330_v9 }
 0x582   :  { %v1675_v57 = vsel %vm1672_vm12, %v1674_v48, %v1670_v53  ;;  %v1630_v34 = vsel %vm1629_vm1, %v2506_v56, %v1626_v30  ;;  %v2347_v0 = vunpack.c.h.bf16 %v2472_v8  ;;  %v2346_v28 = vunpack.c.l.bf16 %v2472_v8  ;;  %1787 = vmatpush.msrb.mxu3 %v2315_v36  ;;  %v2470_v56 = vld [vmem:[%s3651_s5 + $0x100] sm:$0xff]   ;;  %v2476_v8 = vld [vmem:[%s3651_s5 + $0x130] sm:$0xff]   ;;  %1869 = vmatpush.msra.mxu1 %v2366_v33 }
 0x583   :  { %v1912_v60 = vadd.f32 -0.9189385, %v1608_v52  ;;  %v1676_v61 = vmul.f32 %v1675_v57, %v1658_v49  ;;  %v1635_v35 = vsel %vm1632_vm2, %v1634_v18, %v1630_v34  ;;  %v2327_v52 = vunpack.c.h.bf16 %v2467_v42 }
 0x584   :  { %v1636_v47 = vmul.f32 %v1635_v35, %v1618_v26  ;;  %1826 = vmatpush.msra.mxu0 %v2347_v0  ;;  %v2311_v53 = vunpack.c.h.bf16 %v2463_v41  ;;  %1788 = vmatpush.msrb.mxu3 %v2314_v40  ;;  %v2339_v62 = vunpack.c.h.bf16 %v2470_v56  ;;  %v2338_v30 = vunpack.c.l.bf16 %v2470_v56 }
 0x585   :  { %v1677_v4 = vmul.f32 %v1676_v61, %v1676_v61  ;;  %1649 = vrot.lane.b32.xlu2 %v1912_v60, %s2624_s17  ;;  %v1611_v13 = vsel %vm1610_vm13, %v1912_v60, 0.0  ;;  %v2342_v61 = vunpack.c.l.bf16 %v2471_v29  ;;  %1766 = vmatpush.msrb.mxu2 %v2327_v52  ;;  %v2362_v15 = vunpack.c.l.bf16 %v2476_v8 }
 0x586   :  { %1612 = vadd.xlane.f32.xlu1 %v1611_v13  ;;  %v1637_v50 = vmul.f32 %v1636_v47, %v1636_v47  ;;  %1827 = vmatpush.msra.mxu0 %v2346_v28  ;;  %v2326_v13 = vunpack.c.l.bf16 %v2467_v42  ;;  %v2354_v28 = vunpack.c.l.bf16 %v2474_v24 }
 0x587   :  { %v1678_v14 = vmul.f32 -0.5, %v1677_v4  ;;  %v2462_v4 = vld [vmem:[%s3651_s5 + $0xc0] sm:$0xff]   ;;  %1789 = vmatpush.msrb.mxu3 %v2311_v53 }
 0x588   :  { %v1638_v54 = vmul.f32 -0.5, %v1637_v50  ;;  %1828 = vmatpush.msra.mxu0 %v2343_v45  ;;  %1767 = vmatpush.msrb.mxu2 %v2326_v13  ;;  %v2306_v63 = vunpack.c.l.bf16 %v2462_v4 }
 0x589   :  { %v1682_v59 = vsub.f32 %v1678_v14, %v1680_v22  ;;  %v2310_v14 = vunpack.c.l.bf16 %v2463_v41  ;;  %v1837_v41 = vld [vmem:[#allocation7 + $0x12] ss:$0 sm:$0xff] }
 0x58a   :  { %v1642_v58 = vsub.f32 %v1638_v54, %v1640_v19  ;;  %1829 = vmatpush.msra.mxu0 %v2342_v61 }
 0x58b   :  { %v1914_v43 = vadd.f32 -0.9189385, %v1682_v59  ;;  %v2323_v59 = vunpack.c.h.bf16 %v2466_v3  ;;  %1790 = vmatpush.msrb.mxu3 %v2310_v14 }
 0x58c   :  { %v1913_v11 = vadd.f32 -0.9189385, %v1642_v58  ;;  %1830 = vmatpush.msra.mxu0 %v2339_v62  ;;  %v1419_v58 = vld [vmem:[#allocation7 + $0x11] ss:$0 sm:$0xff] }
 0x58d   :  { %1685 = vrot.lane.b32.xlu0 %v1914_v43, %s2624_s17  ;;  %v2307_v43 = vunpack.c.h.bf16 %v2462_v4  ;;  %1768 = vmatpush.msrb.mxu2 %v2323_v59 }
 0x58e   :  { %v1644_v31 = vsel %vm1610_vm13, %v1913_v11, 0.0  ;;  %1831 = vmatpush.msra.mxu0 %v2338_v30  ;;  %v1437_v11 = vpop.f32.mrf.mxu3 }
 0x58f   :  { %1791 = vmatpush.msrb.mxu3 %v2307_v43  ;;  %1769 = vmatpush.msrb.mxu2 %v2322_v2 }
 0x591   :  { %1792 = vmatpush.msrb.mxu3 %v2306_v63 }
 0x5ae   :  { %1645 = vadd.xlane.f32.xlu2 %v1644_v31 }
 0x5df   :  { %v1650_v38 = vpop.permute.xlu2 %1649 }
 0x5e0   :  { %v1652_v20 = vsel %vm1610_vm13, %v1650_v38, 0.0 }
 0x5e1   :  { %1653 = vadd.xlane.f32.xlu0 %v1652_v20  ;;  %v1438_v20 = vadd.f32 %v1437_v11, %v1419_v58 }
 0x5f9   :  { %v1613_v44 = vpop.xlane.xlu1 %1612 }
 0x5ff   :  { %v1686_v21 = vpop.permute.xlu0 %1685 }
 0x600   :  { %v1688_v27 = vsel %vm1610_vm13, %v1686_v21, 0.0 }
 0x601   :  { %1689 = vadd.xlane.f32.xlu2 %v1688_v27 }
 0x621   :  { %v1646_v55 = vpop.xlane.xlu2 %1645 }
 0x622   :  { %v1647_v57 = vsub.f32 %v1613_v44, %v1646_v55  ;;  %v1440_v55 = vmax.f32 %v1438_v20, 0.0 }
 0x654   :  { %v1654_v48 = vpop.xlane.xlu0 %1653 }
 0x674   :  { %v1690_v49 = vpop.xlane.xlu2 %1689 }
 0x675   :  { %v1691_v60 = vsub.f32 %v1654_v48, %v1690_v49  ;;  %v1856_v49 = vld [vmem:[#allocation7 + $0x13] ss:$0 sm:$0xff] }
 0x677   :  { %v1692_v22 = vadd.f32 %v1691_v60, %v1647_v57 }
 0x679   :  { %v1915_v23 = vmul.f32 -0.5, %v1692_v22 }
 0x67b   :  { %v1695_v1 = vmul.f32 1.442695, %v1915_v23 }
 0x67d   :  { %2507 = vpow2.f32 %v1695_v1 }
 0x683   :  { %v2508_v34 = vpop.eup %2507 }
 0x684   :  { %v1697_v26 = vadd.f32 1.0, %v2508_v34 }
 0x686   :  { %2509 = vrcp.f32 %v1697_v26  ;;  %v1709_v50 = vand.u32 2147483648, %v1697_v26  ;;  %v1707_v19 = vand.u32 2147483647, %v1697_v26  ;;  %vm1703_vm4 = vweird.f32 %v1697_v26 }
 0x688   :  { %v1710_v38 = vor.u32 1.1754944e-38, %v1709_v50  ;;  %vm1708_vm6 = vcmp.eq.f32.partialorder %v1707_v19, 8.507059e+37 }
 0x68c   :  { %v2510_v18 = vpop.eup %2509 }
 0x68d   :  { %v1699_v35 = vmul.f32 %v2510_v18, %v1697_v26  ;;  %vm1704_vm3 = vweird.f32 %v2510_v18 }
 0x68e   :  { %vm1705_vm5 = vmor %vm1703_vm4, %vm1704_vm3 }
 0x68f   :  { %v1700_v47 = vsub.f32 1.0, %v1699_v35 }
 0x691   :  { %v1701_v54 = vmul.f32 %v2510_v18, %v1700_v47 }
 0x693   :  { %v1702_v31 = vadd.f32 %v2510_v18, %v1701_v54 }
 0x695   :  { %v1706_v21 = vsel %vm1705_vm5, %v2510_v18, %v1702_v31 }
 0x696   :  { %v1711_v27 = vsel %vm1708_vm6, %v1710_v38, %v1706_v21 }
 0x697   :  { %v1713_v5 = vmax.f32 %v1711_v27, 0.25 }
 0x699   :  { %v1714_v39 = vmin.f32 %v1713_v5, 0.75 }
 0x69b   :  { %v1718_v46 = vmul.f32 %v1714_v39, %v1440_v55  ;;  %v1715_v6 = vsub.f32 1.0, %v1714_v39 }
 0x69d   :  { %1918 = vmatmul.msk.f32.vlgmr.msra.gmra.mxu0 %vm1014_vm0, %v1718_v46  ;;  %v1717_v51 = vmul.f32 %v1715_v6, %v1005_v37  ;;  %v1716_v7 = vmul.f32 %v1715_v6, %v1327_v16  ;;  %v2363_v37 = vunpack.c.h.bf16 %v2476_v8  ;;  %v2475_v16 = vld [vmem:[%s3651_s5 + $0x128] sm:$0xff]   ;;  %s2627_s5 = smov [#allocation8]  }
 0x69e   :  { %v2359_v17 = vunpack.c.h.bf16 %v2475_v16  ;;  %v2358_v0 = vunpack.c.l.bf16 %v2475_v16  ;;  %s1897_s23 = sshll.u32 %s2627_s5, 4  ;;  %s1898_s23 = int_to_ptr.vmem [resolvable:$true] %s1897_s23 }
 0x69f   :  { %1880 = vrot.lane.b32.xlu1 %v1717_v51, %s2621_s18  ;;  %1916 = vmatmul.msk.f32.vlgmr.msrb.gmra.mxu2 %vm1014_vm0, %v1717_v51 }
 0x6a0   :  { %1917 = vmatmul.msk.f32.vlgmr.msrb.gmra.mxu3 %vm1014_vm0, %v1716_v7  ;;  %1870 = vmatpush.msra.mxu1 %v2363_v37 }
 0x6a2   :  { %1871 = vmatpush.msra.mxu1 %v2362_v15 }
 0x6a4   :  { %1872 = vmatpush.msra.mxu1 %v2359_v17 }
 0x6a6   :  { %1873 = vmatpush.msra.mxu1 %v2358_v0 }
 0x6a8   :  { %1874 = vmatpush.msra.mxu1 %v2355_v25 }
 0x6aa   :  { %1875 = vmatpush.msra.mxu1 %v2354_v28 }
 0x711   :  { %v1881_v29 = vpop.permute.xlu1 %1880 }
 0x712   :  { %v1887_v32 = vsel %vm1014_vm0, %v1716_v7, %v1881_v29 }
 0x713   :  { %1890 = vst [vmem:[#allocation8 + $0x8] sm:$0xff] %v1887_v32 }
 0x71a   :  { %v1833_v42 = vpop.f32.mrf.mxu0 }
 0x722   :  { %v1771_v36 = vpop.f32.mrf.mxu2 }
 0x723   :  { %v1794_v9 = vpop.f32.mrf.mxu3 }
 0x724   :  { %v1795_v40 = vadd.f32 %v1794_v9, %v1771_v36 }
 0x726   :  { %v1836_v44 = vadd.f32 %v1833_v42, %v1795_v40 }
 0x728   :  { %v1838_v45 = vadd.f32 %v1837_v41, %v1836_v44 }
 0x72a   :  { %v1839_v48 = vmax.f32 %v1838_v45, 0.0 }
 0x72c   :  { %1919 = vmatmul.msk.f32.vlgmr.msra.gmra.mxu1 %vm1014_vm0, %v1839_v48 }
 0x7a9   :  { %v1877_v52 = vpop.f32.mrf.mxu1 }
 0x7aa   :  { %v1878_v53 = vadd.f32 %v1877_v52, %v1856_v49 }
 0x7ac   :  { %1884 = vrot.lane.b32.xlu2 %v1878_v53, %s2621_s18 }
 0x806   :  { %v1885_v56 = vpop.permute.xlu2 %1884 }
 0x807   :  { %v1888_v57 = vsel %vm1014_vm0, %v1718_v46, %v1885_v56 }
 0x808   :  { %1891 = vst [vmem:[#allocation8 + $0x10] sm:$0xff] %v1888_v57 }
 0x809   :  { %1902 = dma.vmem_to_hbm [thread:$0]  %s1898_s23, 384, %s1900_s26, [#allocation4]  }
 0x80a   :  { %2611 = dma.done.wait [#allocation4], 384  }
 0x80b   :  { %2612 = vsyncadd [#allocation4], 4294966912 }
 0x80c   :  { %1907 = vsyncpa [#allocation3], 1 }
 0x80d   :  { %1908 = vsyncpa [#allocation6], 1 }
 0x80e   :  { %1909 = vsyncpa [#allocation4], 1 }

</bundles_post_ra>
